<compile_context>
chip_gen: v5e
topology: v5e:2x2
jax: 0.10.0
libtpu: 0.0.40
codegen_flags: <defaults>
</compile_context>

<pallas_src>
import numpy as np
import jax
import jax.numpy as jnp
from jax import lax
from jax.experimental import pallas as pl
from jax.experimental.pallas import tpu as pltpu


def _sigmoid(x):
    # Single EUP tanh instead of exp + divide.
    return 0.5 * (jnp.tanh(0.5 * x) + 1.0)


def _round_up(x, m):
    return ((x + m - 1) // m) * m


def _choose_b_tile(B):
    """Pick the batch tile: >=2 blocks on the 'parallel' axis when B > 16 (v7x
    has 2 TensorCores/chip), 16-row granules (safe sublane granularity for the
    bf16 pre-activation blocks), capped at 128."""
    if B <= 16:
        return B
    # TODO(synk): on v6e with large B, a 256 cap fills the 256-wide MXU M dim.
    max_tile = 128
    half = _round_up(-(-B // 2), 16)
    return min(half, max_tile)


def _choose_t_chunk(T, b_tile, H):
    """Bound the streamed bf16 pre-activation chunk to ~6 MiB per pipeline
    buffer; the cap of 16 steps/chunk is a sweepable heuristic."""
    bytes_per_step = b_tile * 8 * H * 2          # bf16
    tc = max(1, (6 * 1024 * 1024) // bytes_per_step)
    return max(1, min(tc, T, 16))


def _vmem_limit_bytes():
    """Generation-dependent VMEM cap: ~3/4 of per-core VMEM (48 MiB on v7x's
    64 MiB, 96 MiB on v5e/v6e's 128 MiB), never above 112 MiB."""
    try:
        cap = int(pltpu.get_tpu_info().vmem_capacity_bytes)
    except Exception:
        cap = 64 * 1024 * 1024
    return int(min(cap * 3 // 4, 112 * 1024 * 1024))


def _bilstm_pool_kernel(len_ref, xp_ref, whh_ref, out_ref,
                        h_ref, c_ref, sum_ref, max_ref):
    """Fused bi-LSTM recurrence + online avg/max pooling, one (batch, time)
    grid block per call.

    len_ref: (Bt, 1)  int32 sequence lengths (>= 1).
    xp_ref : (Tc, Bt, 8H) bf16 precomputed x @ W_ih + b (bwd cols time-flipped).
    whh_ref: (2H, 8H) bf16 block-diagonal recurrent weights.
    out_ref: (Bt, 6H) f32 (written only on the last time block).
    h/c/sum/max_ref: (Bt, 2H) f32 VMEM carries persisting across time blocks.
    """
    t_blk = pl.program_id(1)
    n_t_blk = pl.num_programs(1)
    Tc, Bt, _ = xp_ref.shape
    H2 = whh_ref.shape[0]            # 2H
    H = H2 // 2
    T_total = Tc * n_t_blk           # padded total sequence length

    @pl.when(t_blk == 0)
    def _():
        h_ref[...] = jnp.zeros_like(h_ref)
        c_ref[...] = jnp.zeros_like(c_ref)
        sum_ref[...] = jnp.zeros_like(sum_ref)
        max_ref[...] = jnp.full_like(max_ref, jnp.finfo(jnp.float32).min)

    lens = len_ref[...]                                   # (Bt, 1) int32
    whh = whh_ref[...]                                    # hoisted weight load
    col2 = lax.broadcasted_iota(jnp.int32, (1, H2), 1)
    is_fwd2 = col2 < H                                    # fwd half of [h_f | h_b]

    # Lane-aligned column chunking of the gate math (bounds vreg live ranges).
    cw = H2
    for cand in (512, 256, 128):
        if H2 % cand == 0:
            cw = cand
            break
    n_cc = H2 // cw

    t0 = t_blk * Tc

    def step(tl, carry):
        h, c, acc_sum, acc_max = carry
        t = t0 + tl                                       # fwd time index
        rt = T_total - 1 - t                              # bwd time index
        # Single pre-activation slab per step (bwd columns pre-flipped in time),
        # plus one small recurrent matmul: bf16 operands, f32 accumulation.
        z = xp_ref[tl].astype(jnp.float32) + jnp.dot(
            h.astype(jnp.bfloat16), whh, preferred_element_type=jnp.float32)

        c_cols, h_cols = [], []
        for k in range(n_cc):
            a = k * cw
            zi = z[:, 0 * H2 + a: 0 * H2 + a + cw]
            zf = z[:, 1 * H2 + a: 1 * H2 + a + cw]
            zg = z[:, 2 * H2 + a: 2 * H2 + a + cw]
            zo = z[:, 3 * H2 + a: 3 * H2 + a + cw]
            ck = _sigmoid(zf) * c[:, a:a + cw] + _sigmoid(zi) * jnp.tanh(zg)
            hk = _sigmoid(zo) * jnp.tanh(ck)
            c_cols.append(ck)
            h_cols.append(hk)
        c_new = c_cols[0] if n_cc == 1 else jnp.concatenate(c_cols, axis=1)
        h_new = h_cols[0] if n_cc == 1 else jnp.concatenate(h_cols, axis=1)

        step_idx = jnp.where(is_fwd2, t, rt)              # (1, 2H)
        valid = step_idx < lens                           # (Bt, 2H)
        h = jnp.where(valid, h_new, h)
        c = jnp.where(valid, c_new, c)
        acc_sum = acc_sum + jnp.where(valid, h_new, 0.0)
        acc_max = jnp.where(valid, jnp.maximum(acc_max, h_new), acc_max)
        return h, c, acc_sum, acc_max

    carry0 = (h_ref[...], c_ref[...], sum_ref[...], max_ref[...])
    unroll = True if Tc <= 16 else 4
    h, c, acc_sum, acc_max = lax.fori_loop(0, Tc, step, carry0, unroll=unroll)
    h_ref[...] = h
    c_ref[...] = c
    sum_ref[...] = acc_sum
    max_ref[...] = acc_max

    @pl.when(t_blk == n_t_blk - 1)
    def _():
        avg = acc_sum / lens.astype(jnp.float32)          # exact divide
        out_ref[:, 0:H] = h[:, H:]                        # hidden_state[-1] (bwd)
        out_ref[:, H:2 * H] = h[:, :H]                    # hidden_state[-2] (fwd)
        out_ref[:, 2 * H:4 * H] = avg                     # [avg_f | avg_b]
        out_ref[:, 4 * H:6 * H] = acc_max                 # [max_f | max_b]


def _interleave_gate_cols(w_f, w_b, hidden):
    """(R, 4H),(R, 4H) in PyTorch [i,f,g,o] order -> (R, 8H) gate-major layout."""
    r = w_f.shape[0]
    wf = w_f.reshape(r, 4, hidden)
    wb = w_b.reshape(r, 4, hidden)
    return jnp.stack([wf, wb], axis=2).reshape(r, 8 * hidden)


def text_module_forward(text, text_len, params, max_len, *, b_tile=None, t_chunk=None):
    """Equivalent of TextModule.forward(text, text_len) -> (B, 6H)."""
    emb_table = params["embedding"]                     # (V, E)
    B, T = text.shape
    assert T == max_len
    H = params["whh_f"].shape[0]
    G = 8 * H

    # TODO(synk): embedding lookup stays an XLA gather; an in-kernel DMA row
    # gather (scalar-prefetched token ids) would avoid one HBM round trip.
    x = emb_table[text]                                 # (B, T, E)

    # One-time weight re-layout into gate-major / direction-minor order.
    wih_cat = _interleave_gate_cols(params["wih_f"], params["wih_b"], H)   # (E, 8H)
    b_cat = _interleave_gate_cols(params["b_f"], params["b_b"], H)         # (1, 8H)
    whh_cat = jnp.concatenate(                                             # (2H, 8H)
        [_interleave_gate_cols(params["whh_f"], jnp.zeros_like(params["whh_b"]), H),
         _interleave_gate_cols(jnp.zeros_like(params["whh_f"]), params["whh_b"], H)],
        axis=0)

    # Hoisted input projection: ONE bf16 GEMM over all timesteps & directions.
    E = emb_table.shape[1]
    x_tm = jnp.transpose(x, (1, 0, 2)).astype(jnp.bfloat16)               # (T, B, E)
    xp = jnp.dot(x_tm.reshape(T * B, E), wih_cat.astype(jnp.bfloat16),
                 preferred_element_type=jnp.float32)
    xp = (xp + b_cat).reshape(T, B, G)                                    # f32

    lens = text_len.astype(jnp.int32).reshape(B, 1)

    # --- tiling (batch "parallel", time "arbitrary") ---
    if b_tile is None:
        b_tile = _choose_b_tile(B)
    b_pad = _round_up(B, b_tile)
    if t_chunk is None:
        t_chunk = _choose_t_chunk(T, b_tile, H)
    T_pad = _round_up(T, t_chunk)

    if b_pad != B:
        xp = jnp.pad(xp, ((0, 0), (0, b_pad - B), (0, 0)))
        lens = jnp.pad(lens, ((0, b_pad - B), (0, 0)), constant_values=1)
    if T_pad != T:
        xp = jnp.pad(xp, ((0, T_pad - T), (0, 0), (0, 0)))

    # Pre-flip the bwd-direction gate columns along (padded) time so the kernel
    # streams a single slab per step. Must happen AFTER time padding so the
    # kernel's rt = T_pad-1-t indexing matches.
    is_fwd_col = ((np.arange(G) // H) % 2 == 0)
    xp = jnp.where(is_fwd_col[None, None, :], xp, xp[::-1])

    # Store/stream the pre-activations in bf16 (halves HBM->VMEM DMA bytes).
    xp = xp.astype(jnp.bfloat16)

    n_b = b_pad // b_tile
    n_t = T_pad // t_chunk

    out = pl.pallas_call(
        _bilstm_pool_kernel,
        out_shape=jax.ShapeDtypeStruct((b_pad, 6 * H), jnp.float32),
        grid=(n_b, n_t),
        in_specs=[
            pl.BlockSpec((b_tile, 1), lambda b, t: (b, 0)),               # lengths
            # TODO(synk): sweep pipeline_mode buffering depth (2-3) on this spec.
            pl.BlockSpec((t_chunk, b_tile, G), lambda b, t: (t, b, 0)),   # xp chunk
            pl.BlockSpec((2 * H, G), lambda b, t: (0, 0)),                # recurrent W
        ],
        out_specs=pl.BlockSpec((b_tile, 6 * H), lambda b, t: (b, 0)),
        scratch_shapes=[
            pltpu.VMEM((b_tile, 2 * H), jnp.float32),   # h carry
            pltpu.VMEM((b_tile, 2 * H), jnp.float32),   # c carry
            pltpu.VMEM((b_tile, 2 * H), jnp.float32),   # sum-pool carry
            pltpu.VMEM((b_tile, 2 * H), jnp.float32),   # max-pool carry
        ],
        compiler_params=pltpu.CompilerParams(
            dimension_semantics=("parallel", "arbitrary"),
            vmem_limit_bytes=_vmem_limit_bytes(),
        ),
    )(lens, xp, whh_cat.astype(jnp.bfloat16))
    return out[:B]


def _reference(text, text_len, params):
    """Pure NumPy re-implementation of the PyTorch forward for validation."""
    emb = np.asarray(params["embedding"])
    wih_f = np.asarray(params["wih_f"]); whh_f = np.asarray(params["whh_f"])
    b_f = np.asarray(params["b_f"])[0]
    wih_b = np.asarray(params["wih_b"]); whh_b = np.asarray(params["whh_b"])
    b_b = np.asarray(params["b_b"])[0]
    x = emb[np.asarray(text)]                            # (B, T, E)
    B, T, _ = x.shape
    H = wih_f.shape[1] // 4

    def sig(v):
        return 1.0 / (1.0 + np.exp(-v))

    def run(xb, L, wih, whh, b, reverse):
        h = np.zeros(H); c = np.zeros(H)
        outs = np.zeros((T, H))
        steps = range(L - 1, -1, -1) if reverse else range(L)
        for t in steps:
            z = xb[t] @ wih + h @ whh + b
            i = sig(z[0:H]); f = sig(z[H:2 * H])
            g = np.tanh(z[2 * H:3 * H]); o = sig(z[3 * H:4 * H])
            c = f * c + i * g
            h = o * np.tanh(c)
            outs[t] = h
        return outs, h

    out = np.zeros((B, 6 * H), np.float32)
    for bi in range(B):
        L = int(text_len[bi])
        of, hf = run(x[bi], L, wih_f, whh_f, b_f, reverse=False)
        ob, hb = run(x[bi], L, wih_b, whh_b, b_b, reverse=True)
        avg_f = of.sum(0) / L
        avg_b = ob.sum(0) / L
        max_f = of[:L].max(0)
        max_b = ob[:L].max(0)
        out[bi] = np.concatenate([hb, hf, avg_f, avg_b, max_f, max_b])
    return out


if __name__ == "__main__":
    # Small shapes, but large enough to exercise 2 batch blocks x 2 time chunks.
    V, E, H, B, T = 64, 32, 32, 32, 32
    key = jax.random.PRNGKey(0)
    keys = jax.random.split(key, 9)
    s = 1.0 / np.sqrt(H)                                 # PyTorch LSTM init scale

    def uni(k, shape):
        return jax.random.uniform(k, shape, jnp.float32, -s, s)

    params = dict(
        embedding=jax.random.normal(keys[0], (V, E), jnp.float32),
        wih_f=uni(keys[1], (E, 4 * H)),                  # W_ih_l0^T (gate order i,f,g,o)
        whh_f=uni(keys[2], (H, 4 * H)),                  # W_hh_l0^T
        b_f=uni(keys[3], (1, 4 * H)),                    # b_ih_l0 + b_hh_l0
        wih_b=uni(keys[4], (E, 4 * H)),                  # reverse direction
        whh_b=uni(keys[5], (H, 4 * H)),
        b_b=uni(keys[6], (1, 4 * H)),
    )
    text = jax.random.randint(keys[7], (B, T), 0, V, jnp.int32)
    text_len = jax.random.randint(keys[8], (B,), 1, T + 1, jnp.int32)
    text_len = text_len.at[0].set(T).at[1].set(1)        # edge cases: full / len-1

    fwd = jax.jit(text_module_forward, static_argnames=("max_len",))
    out = jax.block_until_ready(fwd(text, text_len, params, max_len=T))

    ref = _reference(np.asarray(text), np.asarray(text_len), params)
    # bf16 pre-activations + bf16 recurrent matmul operands vs exact float64
    # NumPy reference -> tolerance reflects bf16 rounding through the recurrence.
    np.testing.assert_allclose(np.asarray(out), ref, atol=2e-2, rtol=2e-2)
    print("KERNEL_OK")
</pallas_src>

<mosaic_0001>
module attributes {stable_mosaic.version = 11 : i64} {
  func.func @_bilstm_pool_kernel(%arg0: i32, %arg1: i32, %arg2: memref<16x1xi32, #tpu.memory_space<vmem>>, %arg3: memref<16x16x256xbf16, #tpu.memory_space<vmem>>, %arg4: memref<64x256xbf16, #tpu.memory_space<vmem>>, %arg5: memref<16x192xf32, #tpu.memory_space<vmem>>, %arg6: memref<16x64xf32, #tpu.memory_space<vmem>>, %arg7: memref<16x64xf32, #tpu.memory_space<vmem>>, %arg8: memref<16x64xf32, #tpu.memory_space<vmem>>, %arg9: memref<16x64xf32, #tpu.memory_space<vmem>>) attributes {dimension_semantics = [#tpu.dimension_semantics<parallel>, #tpu.dimension_semantics<arbitrary>], iteration_bounds = array<i64: 2, 2>, scalar_prefetch = 0 : i64, scratch_operands = 4 : i64, tpu.core_type = #tpu.core_type<tc>, window_params = [{transform_indices = @transform_0, window_bounds = array<i64: 16, 1>}, {transform_indices = @transform_1, window_bounds = array<i64: 16, 16, 256>}, {pipeline_mode = #tpu.pipeline_mode<synchronous>, transform_indices = @transform_2, window_bounds = array<i64: 64, 256>}, {transform_indices = @transform_3, window_bounds = array<i64: 16, 192>}]} {
    %c0_i32 = arith.constant 0 : i32
    %0 = arith.cmpi eq, %arg1, %c0_i32 : i32
    %1 = arith.extui %0 : i1 to i32
    %c0_i32_0 = arith.constant 0 : i32
    %2 = arith.cmpi ne, %1, %c0_i32_0 : i32
    scf.if %2 {
      %cst_246 = arith.constant 0.000000e+00 : f32
      %868 = vector.broadcast %cst_246 : f32 to vector<16x64xf32>
      %c0_247 = arith.constant 0 : index
      %c0_248 = arith.constant 0 : index
      %869 = vector.load %arg6[%c0_247, %c0_248] : memref<16x64xf32, #tpu.memory_space<vmem>>, vector<16x64xf32>
      tpu.vector_store %arg6[%c0_247, %c0_248], %868 {strides = array<i32>} : memref<16x64xf32, #tpu.memory_space<vmem>>, vector<16x64xf32>,
      %cst_249 = arith.constant 0.000000e+00 : f32
      %870 = vector.broadcast %cst_249 : f32 to vector<16x64xf32>
      %c0_250 = arith.constant 0 : index
      %c0_251 = arith.constant 0 : index
      %871 = vector.load %arg7[%c0_250, %c0_251] : memref<16x64xf32, #tpu.memory_space<vmem>>, vector<16x64xf32>
      tpu.vector_store %arg7[%c0_250, %c0_251], %870 {strides = array<i32>} : memref<16x64xf32, #tpu.memory_space<vmem>>, vector<16x64xf32>,
      %cst_252 = arith.constant 0.000000e+00 : f32
      %872 = vector.broadcast %cst_252 : f32 to vector<16x64xf32>
      %c0_253 = arith.constant 0 : index
      %c0_254 = arith.constant 0 : index
      %873 = vector.load %arg8[%c0_253, %c0_254] : memref<16x64xf32, #tpu.memory_space<vmem>>, vector<16x64xf32>
      tpu.vector_store %arg8[%c0_253, %c0_254], %872 {strides = array<i32>} : memref<16x64xf32, #tpu.memory_space<vmem>>, vector<16x64xf32>,
      %cst_255 = arith.constant -3.40282347E+38 : f32
      %874 = vector.broadcast %cst_255 : f32 to vector<16x64xf32>
      %c0_256 = arith.constant 0 : index
      %c0_257 = arith.constant 0 : index
      %875 = vector.load %arg9[%c0_256, %c0_257] : memref<16x64xf32, #tpu.memory_space<vmem>>, vector<16x64xf32>
      tpu.vector_store %arg9[%c0_256, %c0_257], %874 {strides = array<i32>} : memref<16x64xf32, #tpu.memory_space<vmem>>, vector<16x64xf32>,
    } else {
    }
    %c0 = arith.constant 0 : index
    %c0_1 = arith.constant 0 : index
    %3 = vector.load %arg2[%c0, %c0_1] : memref<16x1xi32, #tpu.memory_space<vmem>>, vector<16x1xi32>
    %c0_2 = arith.constant 0 : index
    %c0_3 = arith.constant 0 : index
    %4 = vector.load %arg4[%c0_2, %c0_3] : memref<64x256xbf16, #tpu.memory_space<vmem>>, vector<64x256xbf16>
    %5 = tpu.iota {dimensions = array<i32: 1>} : vector<1x64xi32>
    %c32_i32 = arith.constant 32 : i32
    %6 = vector.broadcast %c32_i32 : i32 to vector<1x64xi32>
    %7 = arith.cmpi slt, %5, %6 : vector<1x64xi32>
    %c16_i32 = arith.constant 16 : i32
    %8 = arith.muli %arg1, %c16_i32 : i32
    %c0_4 = arith.constant 0 : index
    %c0_5 = arith.constant 0 : index
    %9 = vector.load %arg6[%c0_4, %c0_5] : memref<16x64xf32, #tpu.memory_space<vmem>>, vector<16x64xf32>
    %c0_6 = arith.constant 0 : index
    %c0_7 = arith.constant 0 : index
    %10 = vector.load %arg7[%c0_6, %c0_7] : memref<16x64xf32, #tpu.memory_space<vmem>>, vector<16x64xf32>
    %c0_8 = arith.constant 0 : index
    %c0_9 = arith.constant 0 : index
    %11 = vector.load %arg8[%c0_8, %c0_9] : memref<16x64xf32, #tpu.memory_space<vmem>>, vector<16x64xf32>
    %c0_10 = arith.constant 0 : index
    %c0_11 = arith.constant 0 : index
    %12 = vector.load %arg9[%c0_10, %c0_11] : memref<16x64xf32, #tpu.memory_space<vmem>>, vector<16x64xf32>
    %c0_i32_12 = arith.constant 0 : i32
    %13 = arith.addi %8, %c0_i32_12 : i32
    %c31_i32 = arith.constant 31 : i32
    %14 = arith.subi %c31_i32, %13 : i32
    %15 = arith.index_cast %c0_i32_12 : i32 to index
    %c0_13 = arith.constant 0 : index
    %c0_14 = arith.constant 0 : index
    %16 = vector.load %arg3[%15, %c0_13, %c0_14] : memref<16x16x256xbf16, #tpu.memory_space<vmem>>, vector<1x16x256xbf16>
    %17 = vector.shape_cast %16 : vector<1x16x256xbf16> to vector<16x256xbf16>
    %18 = arith.extf %17 : vector<16x256xbf16> to vector<16x256xf32>
    %19 = arith.truncf %9 : vector<16x64xf32> to vector<16x64xbf16>
    %cst = arith.constant dense<0.000000e+00> : vector<16x256xf32>
    %20 = tpu.matmul %19, %4, %cst {dimension_numbers = #tpu.dot_dimension_numbers<[1], [0], [0], [1], [0, 0, 1, 1], [], []>} : vector<16x64xbf16>, vector<64x256xbf16>, vector<16x256xf32> -> vector<16x256xf32>
    %21 = arith.addf %18, %20 : vector<16x256xf32>
    %22 = vector.extract_strided_slice %21 {offsets = [0, 0], sizes = [16, 64], strides = [1, 1]} : vector<16x256xf32> to vector<16x64xf32>
    %23 = vector.extract_strided_slice %21 {offsets = [0, 64], sizes = [16, 64], strides = [1, 1]} : vector<16x256xf32> to vector<16x64xf32>
    %24 = vector.extract_strided_slice %21 {offsets = [0, 128], sizes = [16, 64], strides = [1, 1]} : vector<16x256xf32> to vector<16x64xf32>
    %25 = vector.extract_strided_slice %21 {offsets = [0, 192], sizes = [16, 64], strides = [1, 1]} : vector<16x256xf32> to vector<16x64xf32>
    %cst_15 = arith.constant 5.000000e-01 : f32
    %26 = vector.broadcast %cst_15 : f32 to vector<16x64xf32>
    %27 = arith.mulf %26, %23 : vector<16x64xf32>
    %28 = math.tanh %27 : vector<16x64xf32>
    %cst_16 = arith.constant 1.000000e+00 : f32
    %29 = vector.broadcast %cst_16 : f32 to vector<16x64xf32>
    %30 = arith.addf %28, %29 : vector<16x64xf32>
    %cst_17 = arith.constant 5.000000e-01 : f32
    %31 = vector.broadcast %cst_17 : f32 to vector<16x64xf32>
    %32 = arith.mulf %31, %30 : vector<16x64xf32>
    %33 = arith.mulf %32, %10 : vector<16x64xf32>
    %cst_18 = arith.constant 5.000000e-01 : f32
    %34 = vector.broadcast %cst_18 : f32 to vector<16x64xf32>
    %35 = arith.mulf %34, %22 : vector<16x64xf32>
    %36 = math.tanh %35 : vector<16x64xf32>
    %cst_19 = arith.constant 1.000000e+00 : f32
    %37 = vector.broadcast %cst_19 : f32 to vector<16x64xf32>
    %38 = arith.addf %36, %37 : vector<16x64xf32>
    %cst_20 = arith.constant 5.000000e-01 : f32
    %39 = vector.broadcast %cst_20 : f32 to vector<16x64xf32>
    %40 = arith.mulf %39, %38 : vector<16x64xf32>
    %41 = math.tanh %24 : vector<16x64xf32>
    %42 = arith.mulf %40, %41 : vector<16x64xf32>
    %43 = arith.addf %33, %42 : vector<16x64xf32>
    %cst_21 = arith.constant 5.000000e-01 : f32
    %44 = vector.broadcast %cst_21 : f32 to vector<16x64xf32>
    %45 = arith.mulf %44, %25 : vector<16x64xf32>
    %46 = math.tanh %45 : vector<16x64xf32>
    %cst_22 = arith.constant 1.000000e+00 : f32
    %47 = vector.broadcast %cst_22 : f32 to vector<16x64xf32>
    %48 = arith.addf %46, %47 : vector<16x64xf32>
    %cst_23 = arith.constant 5.000000e-01 : f32
    %49 = vector.broadcast %cst_23 : f32 to vector<16x64xf32>
    %50 = arith.mulf %49, %48 : vector<16x64xf32>
    %51 = math.tanh %43 : vector<16x64xf32>
    %52 = arith.mulf %50, %51 : vector<16x64xf32>
    %53 = vector.broadcast %13 : i32 to vector<1x64xi32>
    %54 = vector.broadcast %14 : i32 to vector<1x64xi32>
    %55 = arith.select %7, %53, %54 : vector<1x64xi1>, vector<1x64xi32>
    %56 = vector.broadcast %55 : vector<1x64xi32> to vector<16x64xi32>
    %57 = vector.broadcast %3 : vector<16x1xi32> to vector<16x64xi32>
    %58 = arith.cmpi slt, %56, %57 : vector<16x64xi32>
    %59 = arith.select %58, %52, %9 : vector<16x64xi1>, vector<16x64xf32>
    %60 = arith.select %58, %43, %10 : vector<16x64xi1>, vector<16x64xf32>
    %cst_24 = arith.constant 0.000000e+00 : f32
    %61 = vector.broadcast %cst_24 : f32 to vector<16x64xf32>
    %62 = arith.select %58, %52, %61 : vector<16x64xi1>, vector<16x64xf32>
    %63 = arith.addf %11, %62 : vector<16x64xf32>
    %64 = arith.maximumf %12, %52 : vector<16x64xf32>
    %65 = arith.select %58, %64, %12 : vector<16x64xi1>, vector<16x64xf32>
    %c1_i32 = arith.constant 1 : i32
    %66 = arith.addi %8, %c1_i32 : i32
    %c31_i32_25 = arith.constant 31 : i32
    %67 = arith.subi %c31_i32_25, %66 : i32
    %68 = arith.index_cast %c1_i32 : i32 to index
    %c0_26 = arith.constant 0 : index
    %c0_27 = arith.constant 0 : index
    %69 = vector.load %arg3[%68, %c0_26, %c0_27] : memref<16x16x256xbf16, #tpu.memory_space<vmem>>, vector<1x16x256xbf16>
    %70 = vector.shape_cast %69 : vector<1x16x256xbf16> to vector<16x256xbf16>
    %71 = arith.extf %70 : vector<16x256xbf16> to vector<16x256xf32>
    %72 = arith.truncf %59 : vector<16x64xf32> to vector<16x64xbf16>
    %cst_28 = arith.constant dense<0.000000e+00> : vector<16x256xf32>
    %73 = tpu.matmul %72, %4, %cst_28 {dimension_numbers = #tpu.dot_dimension_numbers<[1], [0], [0], [1], [0, 0, 1, 1], [], []>} : vector<16x64xbf16>, vector<64x256xbf16>, vector<16x256xf32> -> vector<16x256xf32>
    %74 = arith.addf %71, %73 : vector<16x256xf32>
    %75 = vector.extract_strided_slice %74 {offsets = [0, 0], sizes = [16, 64], strides = [1, 1]} : vector<16x256xf32> to vector<16x64xf32>
    %76 = vector.extract_strided_slice %74 {offsets = [0, 64], sizes = [16, 64], strides = [1, 1]} : vector<16x256xf32> to vector<16x64xf32>
    %77 = vector.extract_strided_slice %74 {offsets = [0, 128], sizes = [16, 64], strides = [1, 1]} : vector<16x256xf32> to vector<16x64xf32>
    %78 = vector.extract_strided_slice %74 {offsets = [0, 192], sizes = [16, 64], strides = [1, 1]} : vector<16x256xf32> to vector<16x64xf32>
    %cst_29 = arith.constant 5.000000e-01 : f32
    %79 = vector.broadcast %cst_29 : f32 to vector<16x64xf32>
    %80 = arith.mulf %79, %76 : vector<16x64xf32>
    %81 = math.tanh %80 : vector<16x64xf32>
    %cst_30 = arith.constant 1.000000e+00 : f32
    %82 = vector.broadcast %cst_30 : f32 to vector<16x64xf32>
    %83 = arith.addf %81, %82 : vector<16x64xf32>
    %cst_31 = arith.constant 5.000000e-01 : f32
    %84 = vector.broadcast %cst_31 : f32 to vector<16x64xf32>
    %85 = arith.mulf %84, %83 : vector<16x64xf32>
    %86 = arith.mulf %85, %60 : vector<16x64xf32>
    %cst_32 = arith.constant 5.000000e-01 : f32
    %87 = vector.broadcast %cst_32 : f32 to vector<16x64xf32>
    %88 = arith.mulf %87, %75 : vector<16x64xf32>
    %89 = math.tanh %88 : vector<16x64xf32>
    %cst_33 = arith.constant 1.000000e+00 : f32
    %90 = vector.broadcast %cst_33 : f32 to vector<16x64xf32>
    %91 = arith.addf %89, %90 : vector<16x64xf32>
    %cst_34 = arith.constant 5.000000e-01 : f32
    %92 = vector.broadcast %cst_34 : f32 to vector<16x64xf32>
    %93 = arith.mulf %92, %91 : vector<16x64xf32>
    %94 = math.tanh %77 : vector<16x64xf32>
    %95 = arith.mulf %93, %94 : vector<16x64xf32>
    %96 = arith.addf %86, %95 : vector<16x64xf32>
    %cst_35 = arith.constant 5.000000e-01 : f32
    %97 = vector.broadcast %cst_35 : f32 to vector<16x64xf32>
    %98 = arith.mulf %97, %78 : vector<16x64xf32>
    %99 = math.tanh %98 : vector<16x64xf32>
    %cst_36 = arith.constant 1.000000e+00 : f32
    %100 = vector.broadcast %cst_36 : f32 to vector<16x64xf32>
    %101 = arith.addf %99, %100 : vector<16x64xf32>
    %cst_37 = arith.constant 5.000000e-01 : f32
    %102 = vector.broadcast %cst_37 : f32 to vector<16x64xf32>
    %103 = arith.mulf %102, %101 : vector<16x64xf32>
    %104 = math.tanh %96 : vector<16x64xf32>
    %105 = arith.mulf %103, %104 : vector<16x64xf32>
    %106 = vector.broadcast %66 : i32 to vector<1x64xi32>
    %107 = vector.broadcast %67 : i32 to vector<1x64xi32>
    %108 = arith.select %7, %106, %107 : vector<1x64xi1>, vector<1x64xi32>
    %109 = vector.broadcast %108 : vector<1x64xi32> to vector<16x64xi32>
    %110 = vector.broadcast %3 : vector<16x1xi32> to vector<16x64xi32>
    %111 = arith.cmpi slt, %109, %110 : vector<16x64xi32>
    %112 = arith.select %111, %105, %59 : vector<16x64xi1>, vector<16x64xf32>
    %113 = arith.select %111, %96, %60 : vector<16x64xi1>, vector<16x64xf32>
    %cst_38 = arith.constant 0.000000e+00 : f32
    %114 = vector.broadcast %cst_38 : f32 to vector<16x64xf32>
    %115 = arith.select %111, %105, %114 : vector<16x64xi1>, vector<16x64xf32>
    %116 = arith.addf %63, %115 : vector<16x64xf32>
    %117 = arith.maximumf %65, %105 : vector<16x64xf32>
    %118 = arith.select %111, %117, %65 : vector<16x64xi1>, vector<16x64xf32>
    %c2_i32 = arith.constant 2 : i32
    %119 = arith.addi %8, %c2_i32 : i32
    %c31_i32_39 = arith.constant 31 : i32
    %120 = arith.subi %c31_i32_39, %119 : i32
    %121 = arith.index_cast %c2_i32 : i32 to index
    %c0_40 = arith.constant 0 : index
    %c0_41 = arith.constant 0 : index
    %122 = vector.load %arg3[%121, %c0_40, %c0_41] : memref<16x16x256xbf16, #tpu.memory_space<vmem>>, vector<1x16x256xbf16>
    %123 = vector.shape_cast %122 : vector<1x16x256xbf16> to vector<16x256xbf16>
    %124 = arith.extf %123 : vector<16x256xbf16> to vector<16x256xf32>
    %125 = arith.truncf %112 : vector<16x64xf32> to vector<16x64xbf16>
    %cst_42 = arith.constant dense<0.000000e+00> : vector<16x256xf32>
    %126 = tpu.matmul %125, %4, %cst_42 {dimension_numbers = #tpu.dot_dimension_numbers<[1], [0], [0], [1], [0, 0, 1, 1], [], []>} : vector<16x64xbf16>, vector<64x256xbf16>, vector<16x256xf32> -> vector<16x256xf32>
    %127 = arith.addf %124, %126 : vector<16x256xf32>
    %128 = vector.extract_strided_slice %127 {offsets = [0, 0], sizes = [16, 64], strides = [1, 1]} : vector<16x256xf32> to vector<16x64xf32>
    %129 = vector.extract_strided_slice %127 {offsets = [0, 64], sizes = [16, 64], strides = [1, 1]} : vector<16x256xf32> to vector<16x64xf32>
    %130 = vector.extract_strided_slice %127 {offsets = [0, 128], sizes = [16, 64], strides = [1, 1]} : vector<16x256xf32> to vector<16x64xf32>
    %131 = vector.extract_strided_slice %127 {offsets = [0, 192], sizes = [16, 64], strides = [1, 1]} : vector<16x256xf32> to vector<16x64xf32>
    %cst_43 = arith.constant 5.000000e-01 : f32
    %132 = vector.broadcast %cst_43 : f32 to vector<16x64xf32>
    %133 = arith.mulf %132, %129 : vector<16x64xf32>
    %134 = math.tanh %133 : vector<16x64xf32>
    %cst_44 = arith.constant 1.000000e+00 : f32
    %135 = vector.broadcast %cst_44 : f32 to vector<16x64xf32>
    %136 = arith.addf %134, %135 : vector<16x64xf32>
    %cst_45 = arith.constant 5.000000e-01 : f32
    %137 = vector.broadcast %cst_45 : f32 to vector<16x64xf32>
    %138 = arith.mulf %137, %136 : vector<16x64xf32>
    %139 = arith.mulf %138, %113 : vector<16x64xf32>
    %cst_46 = arith.constant 5.000000e-01 : f32
    %140 = vector.broadcast %cst_46 : f32 to vector<16x64xf32>
    %141 = arith.mulf %140, %128 : vector<16x64xf32>
    %142 = math.tanh %141 : vector<16x64xf32>
    %cst_47 = arith.constant 1.000000e+00 : f32
    %143 = vector.broadcast %cst_47 : f32 to vector<16x64xf32>
    %144 = arith.addf %142, %143 : vector<16x64xf32>
    %cst_48 = arith.constant 5.000000e-01 : f32
    %145 = vector.broadcast %cst_48 : f32 to vector<16x64xf32>
    %146 = arith.mulf %145, %144 : vector<16x64xf32>
    %147 = math.tanh %130 : vector<16x64xf32>
    %148 = arith.mulf %146, %147 : vector<16x64xf32>
    %149 = arith.addf %139, %148 : vector<16x64xf32>
    %cst_49 = arith.constant 5.000000e-01 : f32
    %150 = vector.broadcast %cst_49 : f32 to vector<16x64xf32>
    %151 = arith.mulf %150, %131 : vector<16x64xf32>
    %152 = math.tanh %151 : vector<16x64xf32>
    %cst_50 = arith.constant 1.000000e+00 : f32
    %153 = vector.broadcast %cst_50 : f32 to vector<16x64xf32>
    %154 = arith.addf %152, %153 : vector<16x64xf32>
    %cst_51 = arith.constant 5.000000e-01 : f32
    %155 = vector.broadcast %cst_51 : f32 to vector<16x64xf32>
    %156 = arith.mulf %155, %154 : vector<16x64xf32>
    %157 = math.tanh %149 : vector<16x64xf32>
    %158 = arith.mulf %156, %157 : vector<16x64xf32>
    %159 = vector.broadcast %119 : i32 to vector<1x64xi32>
    %160 = vector.broadcast %120 : i32 to vector<1x64xi32>
    %161 = arith.select %7, %159, %160 : vector<1x64xi1>, vector<1x64xi32>
    %162 = vector.broadcast %161 : vector<1x64xi32> to vector<16x64xi32>
    %163 = vector.broadcast %3 : vector<16x1xi32> to vector<16x64xi32>
    %164 = arith.cmpi slt, %162, %163 : vector<16x64xi32>
    %165 = arith.select %164, %158, %112 : vector<16x64xi1>, vector<16x64xf32>
    %166 = arith.select %164, %149, %113 : vector<16x64xi1>, vector<16x64xf32>
    %cst_52 = arith.constant 0.000000e+00 : f32
    %167 = vector.broadcast %cst_52 : f32 to vector<16x64xf32>
    %168 = arith.select %164, %158, %167 : vector<16x64xi1>, vector<16x64xf32>
    %169 = arith.addf %116, %168 : vector<16x64xf32>
    %170 = arith.maximumf %118, %158 : vector<16x64xf32>
    %171 = arith.select %164, %170, %118 : vector<16x64xi1>, vector<16x64xf32>
    %c3_i32 = arith.constant 3 : i32
    %172 = arith.addi %8, %c3_i32 : i32
    %c31_i32_53 = arith.constant 31 : i32
    %173 = arith.subi %c31_i32_53, %172 : i32
    %174 = arith.index_cast %c3_i32 : i32 to index
    %c0_54 = arith.constant 0 : index
    %c0_55 = arith.constant 0 : index
    %175 = vector.load %arg3[%174, %c0_54, %c0_55] : memref<16x16x256xbf16, #tpu.memory_space<vmem>>, vector<1x16x256xbf16>
    %176 = vector.shape_cast %175 : vector<1x16x256xbf16> to vector<16x256xbf16>
    %177 = arith.extf %176 : vector<16x256xbf16> to vector<16x256xf32>
    %178 = arith.truncf %165 : vector<16x64xf32> to vector<16x64xbf16>
    %cst_56 = arith.constant dense<0.000000e+00> : vector<16x256xf32>
    %179 = tpu.matmul %178, %4, %cst_56 {dimension_numbers = #tpu.dot_dimension_numbers<[1], [0], [0], [1], [0, 0, 1, 1], [], []>} : vector<16x64xbf16>, vector<64x256xbf16>, vector<16x256xf32> -> vector<16x256xf32>
    %180 = arith.addf %177, %179 : vector<16x256xf32>
    %181 = vector.extract_strided_slice %180 {offsets = [0, 0], sizes = [16, 64], strides = [1, 1]} : vector<16x256xf32> to vector<16x64xf32>
    %182 = vector.extract_strided_slice %180 {offsets = [0, 64], sizes = [16, 64], strides = [1, 1]} : vector<16x256xf32> to vector<16x64xf32>
    %183 = vector.extract_strided_slice %180 {offsets = [0, 128], sizes = [16, 64], strides = [1, 1]} : vector<16x256xf32> to vector<16x64xf32>
    %184 = vector.extract_strided_slice %180 {offsets = [0, 192], sizes = [16, 64], strides = [1, 1]} : vector<16x256xf32> to vector<16x64xf32>
    %cst_57 = arith.constant 5.000000e-01 : f32
    %185 = vector.broadcast %cst_57 : f32 to vector<16x64xf32>
    %186 = arith.mulf %185, %182 : vector<16x64xf32>
    %187 = math.tanh %186 : vector<16x64xf32>
    %cst_58 = arith.constant 1.000000e+00 : f32
    %188 = vector.broadcast %cst_58 : f32 to vector<16x64xf32>
    %189 = arith.addf %187, %188 : vector<16x64xf32>
    %cst_59 = arith.constant 5.000000e-01 : f32
    %190 = vector.broadcast %cst_59 : f32 to vector<16x64xf32>
    %191 = arith.mulf %190, %189 : vector<16x64xf32>
    %192 = arith.mulf %191, %166 : vector<16x64xf32>
    %cst_60 = arith.constant 5.000000e-01 : f32
    %193 = vector.broadcast %cst_60 : f32 to vector<16x64xf32>
    %194 = arith.mulf %193, %181 : vector<16x64xf32>
    %195 = math.tanh %194 : vector<16x64xf32>
    %cst_61 = arith.constant 1.000000e+00 : f32
    %196 = vector.broadcast %cst_61 : f32 to vector<16x64xf32>
    %197 = arith.addf %195, %196 : vector<16x64xf32>
    %cst_62 = arith.constant 5.000000e-01 : f32
    %198 = vector.broadcast %cst_62 : f32 to vector<16x64xf32>
    %199 = arith.mulf %198, %197 : vector<16x64xf32>
    %200 = math.tanh %183 : vector<16x64xf32>
    %201 = arith.mulf %199, %200 : vector<16x64xf32>
    %202 = arith.addf %192, %201 : vector<16x64xf32>
    %cst_63 = arith.constant 5.000000e-01 : f32
    %203 = vector.broadcast %cst_63 : f32 to vector<16x64xf32>
    %204 = arith.mulf %203, %184 : vector<16x64xf32>
    %205 = math.tanh %204 : vector<16x64xf32>
    %cst_64 = arith.constant 1.000000e+00 : f32
    %206 = vector.broadcast %cst_64 : f32 to vector<16x64xf32>
    %207 = arith.addf %205, %206 : vector<16x64xf32>
    %cst_65 = arith.constant 5.000000e-01 : f32
    %208 = vector.broadcast %cst_65 : f32 to vector<16x64xf32>
    %209 = arith.mulf %208, %207 : vector<16x64xf32>
    %210 = math.tanh %202 : vector<16x64xf32>
    %211 = arith.mulf %209, %210 : vector<16x64xf32>
    %212 = vector.broadcast %172 : i32 to vector<1x64xi32>
    %213 = vector.broadcast %173 : i32 to vector<1x64xi32>
    %214 = arith.select %7, %212, %213 : vector<1x64xi1>, vector<1x64xi32>
    %215 = vector.broadcast %214 : vector<1x64xi32> to vector<16x64xi32>
    %216 = vector.broadcast %3 : vector<16x1xi32> to vector<16x64xi32>
    %217 = arith.cmpi slt, %215, %216 : vector<16x64xi32>
    %218 = arith.select %217, %211, %165 : vector<16x64xi1>, vector<16x64xf32>
    %219 = arith.select %217, %202, %166 : vector<16x64xi1>, vector<16x64xf32>
    %cst_66 = arith.constant 0.000000e+00 : f32
    %220 = vector.broadcast %cst_66 : f32 to vector<16x64xf32>
    %221 = arith.select %217, %211, %220 : vector<16x64xi1>, vector<16x64xf32>
    %222 = arith.addf %169, %221 : vector<16x64xf32>
    %223 = arith.maximumf %171, %211 : vector<16x64xf32>
    %224 = arith.select %217, %223, %171 : vector<16x64xi1>, vector<16x64xf32>
    %c4_i32 = arith.constant 4 : i32
    %225 = arith.addi %8, %c4_i32 : i32
    %c31_i32_67 = arith.constant 31 : i32
    %226 = arith.subi %c31_i32_67, %225 : i32
    %227 = arith.index_cast %c4_i32 : i32 to index
    %c0_68 = arith.constant 0 : index
    %c0_69 = arith.constant 0 : index
    %228 = vector.load %arg3[%227, %c0_68, %c0_69] : memref<16x16x256xbf16, #tpu.memory_space<vmem>>, vector<1x16x256xbf16>
    %229 = vector.shape_cast %228 : vector<1x16x256xbf16> to vector<16x256xbf16>
    %230 = arith.extf %229 : vector<16x256xbf16> to vector<16x256xf32>
    %231 = arith.truncf %218 : vector<16x64xf32> to vector<16x64xbf16>
    %cst_70 = arith.constant dense<0.000000e+00> : vector<16x256xf32>
    %232 = tpu.matmul %231, %4, %cst_70 {dimension_numbers = #tpu.dot_dimension_numbers<[1], [0], [0], [1], [0, 0, 1, 1], [], []>} : vector<16x64xbf16>, vector<64x256xbf16>, vector<16x256xf32> -> vector<16x256xf32>
    %233 = arith.addf %230, %232 : vector<16x256xf32>
    %234 = vector.extract_strided_slice %233 {offsets = [0, 0], sizes = [16, 64], strides = [1, 1]} : vector<16x256xf32> to vector<16x64xf32>
    %235 = vector.extract_strided_slice %233 {offsets = [0, 64], sizes = [16, 64], strides = [1, 1]} : vector<16x256xf32> to vector<16x64xf32>
    %236 = vector.extract_strided_slice %233 {offsets = [0, 128], sizes = [16, 64], strides = [1, 1]} : vector<16x256xf32> to vector<16x64xf32>
    %237 = vector.extract_strided_slice %233 {offsets = [0, 192], sizes = [16, 64], strides = [1, 1]} : vector<16x256xf32> to vector<16x64xf32>
    %cst_71 = arith.constant 5.000000e-01 : f32
    %238 = vector.broadcast %cst_71 : f32 to vector<16x64xf32>
    %239 = arith.mulf %238, %235 : vector<16x64xf32>
    %240 = math.tanh %239 : vector<16x64xf32>
    %cst_72 = arith.constant 1.000000e+00 : f32
    %241 = vector.broadcast %cst_72 : f32 to vector<16x64xf32>
    %242 = arith.addf %240, %241 : vector<16x64xf32>
    %cst_73 = arith.constant 5.000000e-01 : f32
    %243 = vector.broadcast %cst_73 : f32 to vector<16x64xf32>
    %244 = arith.mulf %243, %242 : vector<16x64xf32>
    %245 = arith.mulf %244, %219 : vector<16x64xf32>
    %cst_74 = arith.constant 5.000000e-01 : f32
    %246 = vector.broadcast %cst_74 : f32 to vector<16x64xf32>
    %247 = arith.mulf %246, %234 : vector<16x64xf32>
    %248 = math.tanh %247 : vector<16x64xf32>
    %cst_75 = arith.constant 1.000000e+00 : f32
    %249 = vector.broadcast %cst_75 : f32 to vector<16x64xf32>
    %250 = arith.addf %248, %249 : vector<16x64xf32>
    %cst_76 = arith.constant 5.000000e-01 : f32
    %251 = vector.broadcast %cst_76 : f32 to vector<16x64xf32>
    %252 = arith.mulf %251, %250 : vector<16x64xf32>
    %253 = math.tanh %236 : vector<16x64xf32>
    %254 = arith.mulf %252, %253 : vector<16x64xf32>
    %255 = arith.addf %245, %254 : vector<16x64xf32>
    %cst_77 = arith.constant 5.000000e-01 : f32
    %256 = vector.broadcast %cst_77 : f32 to vector<16x64xf32>
    %257 = arith.mulf %256, %237 : vector<16x64xf32>
    %258 = math.tanh %257 : vector<16x64xf32>
    %cst_78 = arith.constant 1.000000e+00 : f32
    %259 = vector.broadcast %cst_78 : f32 to vector<16x64xf32>
    %260 = arith.addf %258, %259 : vector<16x64xf32>
    %cst_79 = arith.constant 5.000000e-01 : f32
    %261 = vector.broadcast %cst_79 : f32 to vector<16x64xf32>
    %262 = arith.mulf %261, %260 : vector<16x64xf32>
    %263 = math.tanh %255 : vector<16x64xf32>
    %264 = arith.mulf %262, %263 : vector<16x64xf32>
    %265 = vector.broadcast %225 : i32 to vector<1x64xi32>
    %266 = vector.broadcast %226 : i32 to vector<1x64xi32>
    %267 = arith.select %7, %265, %266 : vector<1x64xi1>, vector<1x64xi32>
    %268 = vector.broadcast %267 : vector<1x64xi32> to vector<16x64xi32>
    %269 = vector.broadcast %3 : vector<16x1xi32> to vector<16x64xi32>
    %270 = arith.cmpi slt, %268, %269 : vector<16x64xi32>
    %271 = arith.select %270, %264, %218 : vector<16x64xi1>, vector<16x64xf32>
    %272 = arith.select %270, %255, %219 : vector<16x64xi1>, vector<16x64xf32>
    %cst_80 = arith.constant 0.000000e+00 : f32
    %273 = vector.broadcast %cst_80 : f32 to vector<16x64xf32>
    %274 = arith.select %270, %264, %273 : vector<16x64xi1>, vector<16x64xf32>
    %275 = arith.addf %222, %274 : vector<16x64xf32>
    %276 = arith.maximumf %224, %264 : vector<16x64xf32>
    %277 = arith.select %270, %276, %224 : vector<16x64xi1>, vector<16x64xf32>
    %c5_i32 = arith.constant 5 : i32
    %278 = arith.addi %8, %c5_i32 : i32
    %c31_i32_81 = arith.constant 31 : i32
    %279 = arith.subi %c31_i32_81, %278 : i32
    %280 = arith.index_cast %c5_i32 : i32 to index
    %c0_82 = arith.constant 0 : index
    %c0_83 = arith.constant 0 : index
    %281 = vector.load %arg3[%280, %c0_82, %c0_83] : memref<16x16x256xbf16, #tpu.memory_space<vmem>>, vector<1x16x256xbf16>
    %282 = vector.shape_cast %281 : vector<1x16x256xbf16> to vector<16x256xbf16>
    %283 = arith.extf %282 : vector<16x256xbf16> to vector<16x256xf32>
    %284 = arith.truncf %271 : vector<16x64xf32> to vector<16x64xbf16>
    %cst_84 = arith.constant dense<0.000000e+00> : vector<16x256xf32>
    %285 = tpu.matmul %284, %4, %cst_84 {dimension_numbers = #tpu.dot_dimension_numbers<[1], [0], [0], [1], [0, 0, 1, 1], [], []>} : vector<16x64xbf16>, vector<64x256xbf16>, vector<16x256xf32> -> vector<16x256xf32>
    %286 = arith.addf %283, %285 : vector<16x256xf32>
    %287 = vector.extract_strided_slice %286 {offsets = [0, 0], sizes = [16, 64], strides = [1, 1]} : vector<16x256xf32> to vector<16x64xf32>
    %288 = vector.extract_strided_slice %286 {offsets = [0, 64], sizes = [16, 64], strides = [1, 1]} : vector<16x256xf32> to vector<16x64xf32>
    %289 = vector.extract_strided_slice %286 {offsets = [0, 128], sizes = [16, 64], strides = [1, 1]} : vector<16x256xf32> to vector<16x64xf32>
    %290 = vector.extract_strided_slice %286 {offsets = [0, 192], sizes = [16, 64], strides = [1, 1]} : vector<16x256xf32> to vector<16x64xf32>
    %cst_85 = arith.constant 5.000000e-01 : f32
    %291 = vector.broadcast %cst_85 : f32 to vector<16x64xf32>
    %292 = arith.mulf %291, %288 : vector<16x64xf32>
    %293 = math.tanh %292 : vector<16x64xf32>
    %cst_86 = arith.constant 1.000000e+00 : f32
    %294 = vector.broadcast %cst_86 : f32 to vector<16x64xf32>
    %295 = arith.addf %293, %294 : vector<16x64xf32>
    %cst_87 = arith.constant 5.000000e-01 : f32
    %296 = vector.broadcast %cst_87 : f32 to vector<16x64xf32>
    %297 = arith.mulf %296, %295 : vector<16x64xf32>
    %298 = arith.mulf %297, %272 : vector<16x64xf32>
    %cst_88 = arith.constant 5.000000e-01 : f32
    %299 = vector.broadcast %cst_88 : f32 to vector<16x64xf32>
    %300 = arith.mulf %299, %287 : vector<16x64xf32>
    %301 = math.tanh %300 : vector<16x64xf32>
    %cst_89 = arith.constant 1.000000e+00 : f32
    %302 = vector.broadcast %cst_89 : f32 to vector<16x64xf32>
    %303 = arith.addf %301, %302 : vector<16x64xf32>
    %cst_90 = arith.constant 5.000000e-01 : f32
    %304 = vector.broadcast %cst_90 : f32 to vector<16x64xf32>
    %305 = arith.mulf %304, %303 : vector<16x64xf32>
    %306 = math.tanh %289 : vector<16x64xf32>
    %307 = arith.mulf %305, %306 : vector<16x64xf32>
    %308 = arith.addf %298, %307 : vector<16x64xf32>
    %cst_91 = arith.constant 5.000000e-01 : f32
    %309 = vector.broadcast %cst_91 : f32 to vector<16x64xf32>
    %310 = arith.mulf %309, %290 : vector<16x64xf32>
    %311 = math.tanh %310 : vector<16x64xf32>
    %cst_92 = arith.constant 1.000000e+00 : f32
    %312 = vector.broadcast %cst_92 : f32 to vector<16x64xf32>
    %313 = arith.addf %311, %312 : vector<16x64xf32>
    %cst_93 = arith.constant 5.000000e-01 : f32
    %314 = vector.broadcast %cst_93 : f32 to vector<16x64xf32>
    %315 = arith.mulf %314, %313 : vector<16x64xf32>
    %316 = math.tanh %308 : vector<16x64xf32>
    %317 = arith.mulf %315, %316 : vector<16x64xf32>
    %318 = vector.broadcast %278 : i32 to vector<1x64xi32>
    %319 = vector.broadcast %279 : i32 to vector<1x64xi32>
    %320 = arith.select %7, %318, %319 : vector<1x64xi1>, vector<1x64xi32>
    %321 = vector.broadcast %320 : vector<1x64xi32> to vector<16x64xi32>
    %322 = vector.broadcast %3 : vector<16x1xi32> to vector<16x64xi32>
    %323 = arith.cmpi slt, %321, %322 : vector<16x64xi32>
    %324 = arith.select %323, %317, %271 : vector<16x64xi1>, vector<16x64xf32>
    %325 = arith.select %323, %308, %272 : vector<16x64xi1>, vector<16x64xf32>
    %cst_94 = arith.constant 0.000000e+00 : f32
    %326 = vector.broadcast %cst_94 : f32 to vector<16x64xf32>
    %327 = arith.select %323, %317, %326 : vector<16x64xi1>, vector<16x64xf32>
    %328 = arith.addf %275, %327 : vector<16x64xf32>
    %329 = arith.maximumf %277, %317 : vector<16x64xf32>
    %330 = arith.select %323, %329, %277 : vector<16x64xi1>, vector<16x64xf32>
    %c6_i32 = arith.constant 6 : i32
    %331 = arith.addi %8, %c6_i32 : i32
    %c31_i32_95 = arith.constant 31 : i32
    %332 = arith.subi %c31_i32_95, %331 : i32
    %333 = arith.index_cast %c6_i32 : i32 to index
    %c0_96 = arith.constant 0 : index
    %c0_97 = arith.constant 0 : index
    %334 = vector.load %arg3[%333, %c0_96, %c0_97] : memref<16x16x256xbf16, #tpu.memory_space<vmem>>, vector<1x16x256xbf16>
    %335 = vector.shape_cast %334 : vector<1x16x256xbf16> to vector<16x256xbf16>
    %336 = arith.extf %335 : vector<16x256xbf16> to vector<16x256xf32>
    %337 = arith.truncf %324 : vector<16x64xf32> to vector<16x64xbf16>
    %cst_98 = arith.constant dense<0.000000e+00> : vector<16x256xf32>
    %338 = tpu.matmul %337, %4, %cst_98 {dimension_numbers = #tpu.dot_dimension_numbers<[1], [0], [0], [1], [0, 0, 1, 1], [], []>} : vector<16x64xbf16>, vector<64x256xbf16>, vector<16x256xf32> -> vector<16x256xf32>
    %339 = arith.addf %336, %338 : vector<16x256xf32>
    %340 = vector.extract_strided_slice %339 {offsets = [0, 0], sizes = [16, 64], strides = [1, 1]} : vector<16x256xf32> to vector<16x64xf32>
    %341 = vector.extract_strided_slice %339 {offsets = [0, 64], sizes = [16, 64], strides = [1, 1]} : vector<16x256xf32> to vector<16x64xf32>
    %342 = vector.extract_strided_slice %339 {offsets = [0, 128], sizes = [16, 64], strides = [1, 1]} : vector<16x256xf32> to vector<16x64xf32>
    %343 = vector.extract_strided_slice %339 {offsets = [0, 192], sizes = [16, 64], strides = [1, 1]} : vector<16x256xf32> to vector<16x64xf32>
    %cst_99 = arith.constant 5.000000e-01 : f32
    %344 = vector.broadcast %cst_99 : f32 to vector<16x64xf32>
    %345 = arith.mulf %344, %341 : vector<16x64xf32>
    %346 = math.tanh %345 : vector<16x64xf32>
    %cst_100 = arith.constant 1.000000e+00 : f32
    %347 = vector.broadcast %cst_100 : f32 to vector<16x64xf32>
    %348 = arith.addf %346, %347 : vector<16x64xf32>
    %cst_101 = arith.constant 5.000000e-01 : f32
    %349 = vector.broadcast %cst_101 : f32 to vector<16x64xf32>
    %350 = arith.mulf %349, %348 : vector<16x64xf32>
    %351 = arith.mulf %350, %325 : vector<16x64xf32>
    %cst_102 = arith.constant 5.000000e-01 : f32
    %352 = vector.broadcast %cst_102 : f32 to vector<16x64xf32>
    %353 = arith.mulf %352, %340 : vector<16x64xf32>
    %354 = math.tanh %353 : vector<16x64xf32>
    %cst_103 = arith.constant 1.000000e+00 : f32
    %355 = vector.broadcast %cst_103 : f32 to vector<16x64xf32>
    %356 = arith.addf %354, %355 : vector<16x64xf32>
    %cst_104 = arith.constant 5.000000e-01 : f32
    %357 = vector.broadcast %cst_104 : f32 to vector<16x64xf32>
    %358 = arith.mulf %357, %356 : vector<16x64xf32>
    %359 = math.tanh %342 : vector<16x64xf32>
    %360 = arith.mulf %358, %359 : vector<16x64xf32>
    %361 = arith.addf %351, %360 : vector<16x64xf32>
    %cst_105 = arith.constant 5.000000e-01 : f32
    %362 = vector.broadcast %cst_105 : f32 to vector<16x64xf32>
    %363 = arith.mulf %362, %343 : vector<16x64xf32>
    %364 = math.tanh %363 : vector<16x64xf32>
    %cst_106 = arith.constant 1.000000e+00 : f32
    %365 = vector.broadcast %cst_106 : f32 to vector<16x64xf32>
    %366 = arith.addf %364, %365 : vector<16x64xf32>
    %cst_107 = arith.constant 5.000000e-01 : f32
    %367 = vector.broadcast %cst_107 : f32 to vector<16x64xf32>
    %368 = arith.mulf %367, %366 : vector<16x64xf32>
    %369 = math.tanh %361 : vector<16x64xf32>
    %370 = arith.mulf %368, %369 : vector<16x64xf32>
    %371 = vector.broadcast %331 : i32 to vector<1x64xi32>
    %372 = vector.broadcast %332 : i32 to vector<1x64xi32>
    %373 = arith.select %7, %371, %372 : vector<1x64xi1>, vector<1x64xi32>
    %374 = vector.broadcast %373 : vector<1x64xi32> to vector<16x64xi32>
    %375 = vector.broadcast %3 : vector<16x1xi32> to vector<16x64xi32>
    %376 = arith.cmpi slt, %374, %375 : vector<16x64xi32>
    %377 = arith.select %376, %370, %324 : vector<16x64xi1>, vector<16x64xf32>
    %378 = arith.select %376, %361, %325 : vector<16x64xi1>, vector<16x64xf32>
    %cst_108 = arith.constant 0.000000e+00 : f32
    %379 = vector.broadcast %cst_108 : f32 to vector<16x64xf32>
    %380 = arith.select %376, %370, %379 : vector<16x64xi1>, vector<16x64xf32>
    %381 = arith.addf %328, %380 : vector<16x64xf32>
    %382 = arith.maximumf %330, %370 : vector<16x64xf32>
    %383 = arith.select %376, %382, %330 : vector<16x64xi1>, vector<16x64xf32>
    %c7_i32 = arith.constant 7 : i32
    %384 = arith.addi %8, %c7_i32 : i32
    %c31_i32_109 = arith.constant 31 : i32
    %385 = arith.subi %c31_i32_109, %384 : i32
    %386 = arith.index_cast %c7_i32 : i32 to index
    %c0_110 = arith.constant 0 : index
    %c0_111 = arith.constant 0 : index
    %387 = vector.load %arg3[%386, %c0_110, %c0_111] : memref<16x16x256xbf16, #tpu.memory_space<vmem>>, vector<1x16x256xbf16>
    %388 = vector.shape_cast %387 : vector<1x16x256xbf16> to vector<16x256xbf16>
    %389 = arith.extf %388 : vector<16x256xbf16> to vector<16x256xf32>
    %390 = arith.truncf %377 : vector<16x64xf32> to vector<16x64xbf16>
    %cst_112 = arith.constant dense<0.000000e+00> : vector<16x256xf32>
    %391 = tpu.matmul %390, %4, %cst_112 {dimension_numbers = #tpu.dot_dimension_numbers<[1], [0], [0], [1], [0, 0, 1, 1], [], []>} : vector<16x64xbf16>, vector<64x256xbf16>, vector<16x256xf32> -> vector<16x256xf32>
    %392 = arith.addf %389, %391 : vector<16x256xf32>
    %393 = vector.extract_strided_slice %392 {offsets = [0, 0], sizes = [16, 64], strides = [1, 1]} : vector<16x256xf32> to vector<16x64xf32>
    %394 = vector.extract_strided_slice %392 {offsets = [0, 64], sizes = [16, 64], strides = [1, 1]} : vector<16x256xf32> to vector<16x64xf32>
    %395 = vector.extract_strided_slice %392 {offsets = [0, 128], sizes = [16, 64], strides = [1, 1]} : vector<16x256xf32> to vector<16x64xf32>
    %396 = vector.extract_strided_slice %392 {offsets = [0, 192], sizes = [16, 64], strides = [1, 1]} : vector<16x256xf32> to vector<16x64xf32>
    %cst_113 = arith.constant 5.000000e-01 : f32
    %397 = vector.broadcast %cst_113 : f32 to vector<16x64xf32>
    %398 = arith.mulf %397, %394 : vector<16x64xf32>
    %399 = math.tanh %398 : vector<16x64xf32>
    %cst_114 = arith.constant 1.000000e+00 : f32
    %400 = vector.broadcast %cst_114 : f32 to vector<16x64xf32>
    %401 = arith.addf %399, %400 : vector<16x64xf32>
    %cst_115 = arith.constant 5.000000e-01 : f32
    %402 = vector.broadcast %cst_115 : f32 to vector<16x64xf32>
    %403 = arith.mulf %402, %401 : vector<16x64xf32>
    %404 = arith.mulf %403, %378 : vector<16x64xf32>
    %cst_116 = arith.constant 5.000000e-01 : f32
    %405 = vector.broadcast %cst_116 : f32 to vector<16x64xf32>
    %406 = arith.mulf %405, %393 : vector<16x64xf32>
    %407 = math.tanh %406 : vector<16x64xf32>
    %cst_117 = arith.constant 1.000000e+00 : f32
    %408 = vector.broadcast %cst_117 : f32 to vector<16x64xf32>
    %409 = arith.addf %407, %408 : vector<16x64xf32>
    %cst_118 = arith.constant 5.000000e-01 : f32
    %410 = vector.broadcast %cst_118 : f32 to vector<16x64xf32>
    %411 = arith.mulf %410, %409 : vector<16x64xf32>
    %412 = math.tanh %395 : vector<16x64xf32>
    %413 = arith.mulf %411, %412 : vector<16x64xf32>
    %414 = arith.addf %404, %413 : vector<16x64xf32>
    %cst_119 = arith.constant 5.000000e-01 : f32
    %415 = vector.broadcast %cst_119 : f32 to vector<16x64xf32>
    %416 = arith.mulf %415, %396 : vector<16x64xf32>
    %417 = math.tanh %416 : vector<16x64xf32>
    %cst_120 = arith.constant 1.000000e+00 : f32
    %418 = vector.broadcast %cst_120 : f32 to vector<16x64xf32>
    %419 = arith.addf %417, %418 : vector<16x64xf32>
    %cst_121 = arith.constant 5.000000e-01 : f32
    %420 = vector.broadcast %cst_121 : f32 to vector<16x64xf32>
    %421 = arith.mulf %420, %419 : vector<16x64xf32>
    %422 = math.tanh %414 : vector<16x64xf32>
    %423 = arith.mulf %421, %422 : vector<16x64xf32>
    %424 = vector.broadcast %384 : i32 to vector<1x64xi32>
    %425 = vector.broadcast %385 : i32 to vector<1x64xi32>
    %426 = arith.select %7, %424, %425 : vector<1x64xi1>, vector<1x64xi32>
    %427 = vector.broadcast %426 : vector<1x64xi32> to vector<16x64xi32>
    %428 = vector.broadcast %3 : vector<16x1xi32> to vector<16x64xi32>
    %429 = arith.cmpi slt, %427, %428 : vector<16x64xi32>
    %430 = arith.select %429, %423, %377 : vector<16x64xi1>, vector<16x64xf32>
    %431 = arith.select %429, %414, %378 : vector<16x64xi1>, vector<16x64xf32>
    %cst_122 = arith.constant 0.000000e+00 : f32
    %432 = vector.broadcast %cst_122 : f32 to vector<16x64xf32>
    %433 = arith.select %429, %423, %432 : vector<16x64xi1>, vector<16x64xf32>
    %434 = arith.addf %381, %433 : vector<16x64xf32>
    %435 = arith.maximumf %383, %423 : vector<16x64xf32>
    %436 = arith.select %429, %435, %383 : vector<16x64xi1>, vector<16x64xf32>
    %c8_i32 = arith.constant 8 : i32
    %437 = arith.addi %8, %c8_i32 : i32
    %c31_i32_123 = arith.constant 31 : i32
    %438 = arith.subi %c31_i32_123, %437 : i32
    %439 = arith.index_cast %c8_i32 : i32 to index
    %c0_124 = arith.constant 0 : index
    %c0_125 = arith.constant 0 : index
    %440 = vector.load %arg3[%439, %c0_124, %c0_125] : memref<16x16x256xbf16, #tpu.memory_space<vmem>>, vector<1x16x256xbf16>
    %441 = vector.shape_cast %440 : vector<1x16x256xbf16> to vector<16x256xbf16>
    %442 = arith.extf %441 : vector<16x256xbf16> to vector<16x256xf32>
    %443 = arith.truncf %430 : vector<16x64xf32> to vector<16x64xbf16>
    %cst_126 = arith.constant dense<0.000000e+00> : vector<16x256xf32>
    %444 = tpu.matmul %443, %4, %cst_126 {dimension_numbers = #tpu.dot_dimension_numbers<[1], [0], [0], [1], [0, 0, 1, 1], [], []>} : vector<16x64xbf16>, vector<64x256xbf16>, vector<16x256xf32> -> vector<16x256xf32>
    %445 = arith.addf %442, %444 : vector<16x256xf32>
    %446 = vector.extract_strided_slice %445 {offsets = [0, 0], sizes = [16, 64], strides = [1, 1]} : vector<16x256xf32> to vector<16x64xf32>
    %447 = vector.extract_strided_slice %445 {offsets = [0, 64], sizes = [16, 64], strides = [1, 1]} : vector<16x256xf32> to vector<16x64xf32>
    %448 = vector.extract_strided_slice %445 {offsets = [0, 128], sizes = [16, 64], strides = [1, 1]} : vector<16x256xf32> to vector<16x64xf32>
    %449 = vector.extract_strided_slice %445 {offsets = [0, 192], sizes = [16, 64], strides = [1, 1]} : vector<16x256xf32> to vector<16x64xf32>
    %cst_127 = arith.constant 5.000000e-01 : f32
    %450 = vector.broadcast %cst_127 : f32 to vector<16x64xf32>
    %451 = arith.mulf %450, %447 : vector<16x64xf32>
    %452 = math.tanh %451 : vector<16x64xf32>
    %cst_128 = arith.constant 1.000000e+00 : f32
    %453 = vector.broadcast %cst_128 : f32 to vector<16x64xf32>
    %454 = arith.addf %452, %453 : vector<16x64xf32>
    %cst_129 = arith.constant 5.000000e-01 : f32
    %455 = vector.broadcast %cst_129 : f32 to vector<16x64xf32>
    %456 = arith.mulf %455, %454 : vector<16x64xf32>
    %457 = arith.mulf %456, %431 : vector<16x64xf32>
    %cst_130 = arith.constant 5.000000e-01 : f32
    %458 = vector.broadcast %cst_130 : f32 to vector<16x64xf32>
    %459 = arith.mulf %458, %446 : vector<16x64xf32>
    %460 = math.tanh %459 : vector<16x64xf32>
    %cst_131 = arith.constant 1.000000e+00 : f32
    %461 = vector.broadcast %cst_131 : f32 to vector<16x64xf32>
    %462 = arith.addf %460, %461 : vector<16x64xf32>
    %cst_132 = arith.constant 5.000000e-01 : f32
    %463 = vector.broadcast %cst_132 : f32 to vector<16x64xf32>
    %464 = arith.mulf %463, %462 : vector<16x64xf32>
    %465 = math.tanh %448 : vector<16x64xf32>
    %466 = arith.mulf %464, %465 : vector<16x64xf32>
    %467 = arith.addf %457, %466 : vector<16x64xf32>
    %cst_133 = arith.constant 5.000000e-01 : f32
    %468 = vector.broadcast %cst_133 : f32 to vector<16x64xf32>
    %469 = arith.mulf %468, %449 : vector<16x64xf32>
    %470 = math.tanh %469 : vector<16x64xf32>
    %cst_134 = arith.constant 1.000000e+00 : f32
    %471 = vector.broadcast %cst_134 : f32 to vector<16x64xf32>
    %472 = arith.addf %470, %471 : vector<16x64xf32>
    %cst_135 = arith.constant 5.000000e-01 : f32
    %473 = vector.broadcast %cst_135 : f32 to vector<16x64xf32>
    %474 = arith.mulf %473, %472 : vector<16x64xf32>
    %475 = math.tanh %467 : vector<16x64xf32>
    %476 = arith.mulf %474, %475 : vector<16x64xf32>
    %477 = vector.broadcast %437 : i32 to vector<1x64xi32>
    %478 = vector.broadcast %438 : i32 to vector<1x64xi32>
    %479 = arith.select %7, %477, %478 : vector<1x64xi1>, vector<1x64xi32>
    %480 = vector.broadcast %479 : vector<1x64xi32> to vector<16x64xi32>
    %481 = vector.broadcast %3 : vector<16x1xi32> to vector<16x64xi32>
    %482 = arith.cmpi slt, %480, %481 : vector<16x64xi32>
    %483 = arith.select %482, %476, %430 : vector<16x64xi1>, vector<16x64xf32>
    %484 = arith.select %482, %467, %431 : vector<16x64xi1>, vector<16x64xf32>
    %cst_136 = arith.constant 0.000000e+00 : f32
    %485 = vector.broadcast %cst_136 : f32 to vector<16x64xf32>
    %486 = arith.select %482, %476, %485 : vector<16x64xi1>, vector<16x64xf32>
    %487 = arith.addf %434, %486 : vector<16x64xf32>
    %488 = arith.maximumf %436, %476 : vector<16x64xf32>
    %489 = arith.select %482, %488, %436 : vector<16x64xi1>, vector<16x64xf32>
    %c9_i32 = arith.constant 9 : i32
    %490 = arith.addi %8, %c9_i32 : i32
    %c31_i32_137 = arith.constant 31 : i32
    %491 = arith.subi %c31_i32_137, %490 : i32
    %492 = arith.index_cast %c9_i32 : i32 to index
    %c0_138 = arith.constant 0 : index
    %c0_139 = arith.constant 0 : index
    %493 = vector.load %arg3[%492, %c0_138, %c0_139] : memref<16x16x256xbf16, #tpu.memory_space<vmem>>, vector<1x16x256xbf16>
    %494 = vector.shape_cast %493 : vector<1x16x256xbf16> to vector<16x256xbf16>
    %495 = arith.extf %494 : vector<16x256xbf16> to vector<16x256xf32>
    %496 = arith.truncf %483 : vector<16x64xf32> to vector<16x64xbf16>
    %cst_140 = arith.constant dense<0.000000e+00> : vector<16x256xf32>
    %497 = tpu.matmul %496, %4, %cst_140 {dimension_numbers = #tpu.dot_dimension_numbers<[1], [0], [0], [1], [0, 0, 1, 1], [], []>} : vector<16x64xbf16>, vector<64x256xbf16>, vector<16x256xf32> -> vector<16x256xf32>
    %498 = arith.addf %495, %497 : vector<16x256xf32>
    %499 = vector.extract_strided_slice %498 {offsets = [0, 0], sizes = [16, 64], strides = [1, 1]} : vector<16x256xf32> to vector<16x64xf32>
    %500 = vector.extract_strided_slice %498 {offsets = [0, 64], sizes = [16, 64], strides = [1, 1]} : vector<16x256xf32> to vector<16x64xf32>
    %501 = vector.extract_strided_slice %498 {offsets = [0, 128], sizes = [16, 64], strides = [1, 1]} : vector<16x256xf32> to vector<16x64xf32>
    %502 = vector.extract_strided_slice %498 {offsets = [0, 192], sizes = [16, 64], strides = [1, 1]} : vector<16x256xf32> to vector<16x64xf32>
    %cst_141 = arith.constant 5.000000e-01 : f32
    %503 = vector.broadcast %cst_141 : f32 to vector<16x64xf32>
    %504 = arith.mulf %503, %500 : vector<16x64xf32>
    %505 = math.tanh %504 : vector<16x64xf32>
    %cst_142 = arith.constant 1.000000e+00 : f32
    %506 = vector.broadcast %cst_142 : f32 to vector<16x64xf32>
    %507 = arith.addf %505, %506 : vector<16x64xf32>
    %cst_143 = arith.constant 5.000000e-01 : f32
    %508 = vector.broadcast %cst_143 : f32 to vector<16x64xf32>
    %509 = arith.mulf %508, %507 : vector<16x64xf32>
    %510 = arith.mulf %509, %484 : vector<16x64xf32>
    %cst_144 = arith.constant 5.000000e-01 : f32
    %511 = vector.broadcast %cst_144 : f32 to vector<16x64xf32>
    %512 = arith.mulf %511, %499 : vector<16x64xf32>
    %513 = math.tanh %512 : vector<16x64xf32>
    %cst_145 = arith.constant 1.000000e+00 : f32
    %514 = vector.broadcast %cst_145 : f32 to vector<16x64xf32>
    %515 = arith.addf %513, %514 : vector<16x64xf32>
    %cst_146 = arith.constant 5.000000e-01 : f32
    %516 = vector.broadcast %cst_146 : f32 to vector<16x64xf32>
    %517 = arith.mulf %516, %515 : vector<16x64xf32>
    %518 = math.tanh %501 : vector<16x64xf32>
    %519 = arith.mulf %517, %518 : vector<16x64xf32>
    %520 = arith.addf %510, %519 : vector<16x64xf32>
    %cst_147 = arith.constant 5.000000e-01 : f32
    %521 = vector.broadcast %cst_147 : f32 to vector<16x64xf32>
    %522 = arith.mulf %521, %502 : vector<16x64xf32>
    %523 = math.tanh %522 : vector<16x64xf32>
    %cst_148 = arith.constant 1.000000e+00 : f32
    %524 = vector.broadcast %cst_148 : f32 to vector<16x64xf32>
    %525 = arith.addf %523, %524 : vector<16x64xf32>
    %cst_149 = arith.constant 5.000000e-01 : f32
    %526 = vector.broadcast %cst_149 : f32 to vector<16x64xf32>
    %527 = arith.mulf %526, %525 : vector<16x64xf32>
    %528 = math.tanh %520 : vector<16x64xf32>
    %529 = arith.mulf %527, %528 : vector<16x64xf32>
    %530 = vector.broadcast %490 : i32 to vector<1x64xi32>
    %531 = vector.broadcast %491 : i32 to vector<1x64xi32>
    %532 = arith.select %7, %530, %531 : vector<1x64xi1>, vector<1x64xi32>
    %533 = vector.broadcast %532 : vector<1x64xi32> to vector<16x64xi32>
    %534 = vector.broadcast %3 : vector<16x1xi32> to vector<16x64xi32>
    %535 = arith.cmpi slt, %533, %534 : vector<16x64xi32>
    %536 = arith.select %535, %529, %483 : vector<16x64xi1>, vector<16x64xf32>
    %537 = arith.select %535, %520, %484 : vector<16x64xi1>, vector<16x64xf32>
    %cst_150 = arith.constant 0.000000e+00 : f32
    %538 = vector.broadcast %cst_150 : f32 to vector<16x64xf32>
    %539 = arith.select %535, %529, %538 : vector<16x64xi1>, vector<16x64xf32>
    %540 = arith.addf %487, %539 : vector<16x64xf32>
    %541 = arith.maximumf %489, %529 : vector<16x64xf32>
    %542 = arith.select %535, %541, %489 : vector<16x64xi1>, vector<16x64xf32>
    %c10_i32 = arith.constant 10 : i32
    %543 = arith.addi %8, %c10_i32 : i32
    %c31_i32_151 = arith.constant 31 : i32
    %544 = arith.subi %c31_i32_151, %543 : i32
    %545 = arith.index_cast %c10_i32 : i32 to index
    %c0_152 = arith.constant 0 : index
    %c0_153 = arith.constant 0 : index
    %546 = vector.load %arg3[%545, %c0_152, %c0_153] : memref<16x16x256xbf16, #tpu.memory_space<vmem>>, vector<1x16x256xbf16>
    %547 = vector.shape_cast %546 : vector<1x16x256xbf16> to vector<16x256xbf16>
    %548 = arith.extf %547 : vector<16x256xbf16> to vector<16x256xf32>
    %549 = arith.truncf %536 : vector<16x64xf32> to vector<16x64xbf16>
    %cst_154 = arith.constant dense<0.000000e+00> : vector<16x256xf32>
    %550 = tpu.matmul %549, %4, %cst_154 {dimension_numbers = #tpu.dot_dimension_numbers<[1], [0], [0], [1], [0, 0, 1, 1], [], []>} : vector<16x64xbf16>, vector<64x256xbf16>, vector<16x256xf32> -> vector<16x256xf32>
    %551 = arith.addf %548, %550 : vector<16x256xf32>
    %552 = vector.extract_strided_slice %551 {offsets = [0, 0], sizes = [16, 64], strides = [1, 1]} : vector<16x256xf32> to vector<16x64xf32>
    %553 = vector.extract_strided_slice %551 {offsets = [0, 64], sizes = [16, 64], strides = [1, 1]} : vector<16x256xf32> to vector<16x64xf32>
    %554 = vector.extract_strided_slice %551 {offsets = [0, 128], sizes = [16, 64], strides = [1, 1]} : vector<16x256xf32> to vector<16x64xf32>
    %555 = vector.extract_strided_slice %551 {offsets = [0, 192], sizes = [16, 64], strides = [1, 1]} : vector<16x256xf32> to vector<16x64xf32>
    %cst_155 = arith.constant 5.000000e-01 : f32
    %556 = vector.broadcast %cst_155 : f32 to vector<16x64xf32>
    %557 = arith.mulf %556, %553 : vector<16x64xf32>
    %558 = math.tanh %557 : vector<16x64xf32>
    %cst_156 = arith.constant 1.000000e+00 : f32
    %559 = vector.broadcast %cst_156 : f32 to vector<16x64xf32>
    %560 = arith.addf %558, %559 : vector<16x64xf32>
    %cst_157 = arith.constant 5.000000e-01 : f32
    %561 = vector.broadcast %cst_157 : f32 to vector<16x64xf32>
    %562 = arith.mulf %561, %560 : vector<16x64xf32>
    %563 = arith.mulf %562, %537 : vector<16x64xf32>
    %cst_158 = arith.constant 5.000000e-01 : f32
    %564 = vector.broadcast %cst_158 : f32 to vector<16x64xf32>
    %565 = arith.mulf %564, %552 : vector<16x64xf32>
    %566 = math.tanh %565 : vector<16x64xf32>
    %cst_159 = arith.constant 1.000000e+00 : f32
    %567 = vector.broadcast %cst_159 : f32 to vector<16x64xf32>
    %568 = arith.addf %566, %567 : vector<16x64xf32>
    %cst_160 = arith.constant 5.000000e-01 : f32
    %569 = vector.broadcast %cst_160 : f32 to vector<16x64xf32>
    %570 = arith.mulf %569, %568 : vector<16x64xf32>
    %571 = math.tanh %554 : vector<16x64xf32>
    %572 = arith.mulf %570, %571 : vector<16x64xf32>
    %573 = arith.addf %563, %572 : vector<16x64xf32>
    %cst_161 = arith.constant 5.000000e-01 : f32
    %574 = vector.broadcast %cst_161 : f32 to vector<16x64xf32>
    %575 = arith.mulf %574, %555 : vector<16x64xf32>
    %576 = math.tanh %575 : vector<16x64xf32>
    %cst_162 = arith.constant 1.000000e+00 : f32
    %577 = vector.broadcast %cst_162 : f32 to vector<16x64xf32>
    %578 = arith.addf %576, %577 : vector<16x64xf32>
    %cst_163 = arith.constant 5.000000e-01 : f32
    %579 = vector.broadcast %cst_163 : f32 to vector<16x64xf32>
    %580 = arith.mulf %579, %578 : vector<16x64xf32>
    %581 = math.tanh %573 : vector<16x64xf32>
    %582 = arith.mulf %580, %581 : vector<16x64xf32>
    %583 = vector.broadcast %543 : i32 to vector<1x64xi32>
    %584 = vector.broadcast %544 : i32 to vector<1x64xi32>
    %585 = arith.select %7, %583, %584 : vector<1x64xi1>, vector<1x64xi32>
    %586 = vector.broadcast %585 : vector<1x64xi32> to vector<16x64xi32>
    %587 = vector.broadcast %3 : vector<16x1xi32> to vector<16x64xi32>
    %588 = arith.cmpi slt, %586, %587 : vector<16x64xi32>
    %589 = arith.select %588, %582, %536 : vector<16x64xi1>, vector<16x64xf32>
    %590 = arith.select %588, %573, %537 : vector<16x64xi1>, vector<16x64xf32>
    %cst_164 = arith.constant 0.000000e+00 : f32
    %591 = vector.broadcast %cst_164 : f32 to vector<16x64xf32>
    %592 = arith.select %588, %582, %591 : vector<16x64xi1>, vector<16x64xf32>
    %593 = arith.addf %540, %592 : vector<16x64xf32>
    %594 = arith.maximumf %542, %582 : vector<16x64xf32>
    %595 = arith.select %588, %594, %542 : vector<16x64xi1>, vector<16x64xf32>
    %c11_i32 = arith.constant 11 : i32
    %596 = arith.addi %8, %c11_i32 : i32
    %c31_i32_165 = arith.constant 31 : i32
    %597 = arith.subi %c31_i32_165, %596 : i32
    %598 = arith.index_cast %c11_i32 : i32 to index
    %c0_166 = arith.constant 0 : index
    %c0_167 = arith.constant 0 : index
    %599 = vector.load %arg3[%598, %c0_166, %c0_167] : memref<16x16x256xbf16, #tpu.memory_space<vmem>>, vector<1x16x256xbf16>
    %600 = vector.shape_cast %599 : vector<1x16x256xbf16> to vector<16x256xbf16>
    %601 = arith.extf %600 : vector<16x256xbf16> to vector<16x256xf32>
    %602 = arith.truncf %589 : vector<16x64xf32> to vector<16x64xbf16>
    %cst_168 = arith.constant dense<0.000000e+00> : vector<16x256xf32>
    %603 = tpu.matmul %602, %4, %cst_168 {dimension_numbers = #tpu.dot_dimension_numbers<[1], [0], [0], [1], [0, 0, 1, 1], [], []>} : vector<16x64xbf16>, vector<64x256xbf16>, vector<16x256xf32> -> vector<16x256xf32>
    %604 = arith.addf %601, %603 : vector<16x256xf32>
    %605 = vector.extract_strided_slice %604 {offsets = [0, 0], sizes = [16, 64], strides = [1, 1]} : vector<16x256xf32> to vector<16x64xf32>
    %606 = vector.extract_strided_slice %604 {offsets = [0, 64], sizes = [16, 64], strides = [1, 1]} : vector<16x256xf32> to vector<16x64xf32>
    %607 = vector.extract_strided_slice %604 {offsets = [0, 128], sizes = [16, 64], strides = [1, 1]} : vector<16x256xf32> to vector<16x64xf32>
    %608 = vector.extract_strided_slice %604 {offsets = [0, 192], sizes = [16, 64], strides = [1, 1]} : vector<16x256xf32> to vector<16x64xf32>
    %cst_169 = arith.constant 5.000000e-01 : f32
    %609 = vector.broadcast %cst_169 : f32 to vector<16x64xf32>
    %610 = arith.mulf %609, %606 : vector<16x64xf32>
    %611 = math.tanh %610 : vector<16x64xf32>
    %cst_170 = arith.constant 1.000000e+00 : f32
    %612 = vector.broadcast %cst_170 : f32 to vector<16x64xf32>
    %613 = arith.addf %611, %612 : vector<16x64xf32>
    %cst_171 = arith.constant 5.000000e-01 : f32
    %614 = vector.broadcast %cst_171 : f32 to vector<16x64xf32>
    %615 = arith.mulf %614, %613 : vector<16x64xf32>
    %616 = arith.mulf %615, %590 : vector<16x64xf32>
    %cst_172 = arith.constant 5.000000e-01 : f32
    %617 = vector.broadcast %cst_172 : f32 to vector<16x64xf32>
    %618 = arith.mulf %617, %605 : vector<16x64xf32>
    %619 = math.tanh %618 : vector<16x64xf32>
    %cst_173 = arith.constant 1.000000e+00 : f32
    %620 = vector.broadcast %cst_173 : f32 to vector<16x64xf32>
    %621 = arith.addf %619, %620 : vector<16x64xf32>
    %cst_174 = arith.constant 5.000000e-01 : f32
    %622 = vector.broadcast %cst_174 : f32 to vector<16x64xf32>
    %623 = arith.mulf %622, %621 : vector<16x64xf32>
    %624 = math.tanh %607 : vector<16x64xf32>
    %625 = arith.mulf %623, %624 : vector<16x64xf32>
    %626 = arith.addf %616, %625 : vector<16x64xf32>
    %cst_175 = arith.constant 5.000000e-01 : f32
    %627 = vector.broadcast %cst_175 : f32 to vector<16x64xf32>
    %628 = arith.mulf %627, %608 : vector<16x64xf32>
    %629 = math.tanh %628 : vector<16x64xf32>
    %cst_176 = arith.constant 1.000000e+00 : f32
    %630 = vector.broadcast %cst_176 : f32 to vector<16x64xf32>
    %631 = arith.addf %629, %630 : vector<16x64xf32>
    %cst_177 = arith.constant 5.000000e-01 : f32
    %632 = vector.broadcast %cst_177 : f32 to vector<16x64xf32>
    %633 = arith.mulf %632, %631 : vector<16x64xf32>
    %634 = math.tanh %626 : vector<16x64xf32>
    %635 = arith.mulf %633, %634 : vector<16x64xf32>
    %636 = vector.broadcast %596 : i32 to vector<1x64xi32>
    %637 = vector.broadcast %597 : i32 to vector<1x64xi32>
    %638 = arith.select %7, %636, %637 : vector<1x64xi1>, vector<1x64xi32>
    %639 = vector.broadcast %638 : vector<1x64xi32> to vector<16x64xi32>
    %640 = vector.broadcast %3 : vector<16x1xi32> to vector<16x64xi32>
    %641 = arith.cmpi slt, %639, %640 : vector<16x64xi32>
    %642 = arith.select %641, %635, %589 : vector<16x64xi1>, vector<16x64xf32>
    %643 = arith.select %641, %626, %590 : vector<16x64xi1>, vector<16x64xf32>
    %cst_178 = arith.constant 0.000000e+00 : f32
    %644 = vector.broadcast %cst_178 : f32 to vector<16x64xf32>
    %645 = arith.select %641, %635, %644 : vector<16x64xi1>, vector<16x64xf32>
    %646 = arith.addf %593, %645 : vector<16x64xf32>
    %647 = arith.maximumf %595, %635 : vector<16x64xf32>
    %648 = arith.select %641, %647, %595 : vector<16x64xi1>, vector<16x64xf32>
    %c12_i32 = arith.constant 12 : i32
    %649 = arith.addi %8, %c12_i32 : i32
    %c31_i32_179 = arith.constant 31 : i32
    %650 = arith.subi %c31_i32_179, %649 : i32
    %651 = arith.index_cast %c12_i32 : i32 to index
    %c0_180 = arith.constant 0 : index
    %c0_181 = arith.constant 0 : index
    %652 = vector.load %arg3[%651, %c0_180, %c0_181] : memref<16x16x256xbf16, #tpu.memory_space<vmem>>, vector<1x16x256xbf16>
    %653 = vector.shape_cast %652 : vector<1x16x256xbf16> to vector<16x256xbf16>
    %654 = arith.extf %653 : vector<16x256xbf16> to vector<16x256xf32>
    %655 = arith.truncf %642 : vector<16x64xf32> to vector<16x64xbf16>
    %cst_182 = arith.constant dense<0.000000e+00> : vector<16x256xf32>
    %656 = tpu.matmul %655, %4, %cst_182 {dimension_numbers = #tpu.dot_dimension_numbers<[1], [0], [0], [1], [0, 0, 1, 1], [], []>} : vector<16x64xbf16>, vector<64x256xbf16>, vector<16x256xf32> -> vector<16x256xf32>
    %657 = arith.addf %654, %656 : vector<16x256xf32>
    %658 = vector.extract_strided_slice %657 {offsets = [0, 0], sizes = [16, 64], strides = [1, 1]} : vector<16x256xf32> to vector<16x64xf32>
    %659 = vector.extract_strided_slice %657 {offsets = [0, 64], sizes = [16, 64], strides = [1, 1]} : vector<16x256xf32> to vector<16x64xf32>
    %660 = vector.extract_strided_slice %657 {offsets = [0, 128], sizes = [16, 64], strides = [1, 1]} : vector<16x256xf32> to vector<16x64xf32>
    %661 = vector.extract_strided_slice %657 {offsets = [0, 192], sizes = [16, 64], strides = [1, 1]} : vector<16x256xf32> to vector<16x64xf32>
    %cst_183 = arith.constant 5.000000e-01 : f32
    %662 = vector.broadcast %cst_183 : f32 to vector<16x64xf32>
    %663 = arith.mulf %662, %659 : vector<16x64xf32>
    %664 = math.tanh %663 : vector<16x64xf32>
    %cst_184 = arith.constant 1.000000e+00 : f32
    %665 = vector.broadcast %cst_184 : f32 to vector<16x64xf32>
    %666 = arith.addf %664, %665 : vector<16x64xf32>
    %cst_185 = arith.constant 5.000000e-01 : f32
    %667 = vector.broadcast %cst_185 : f32 to vector<16x64xf32>
    %668 = arith.mulf %667, %666 : vector<16x64xf32>
    %669 = arith.mulf %668, %643 : vector<16x64xf32>
    %cst_186 = arith.constant 5.000000e-01 : f32
    %670 = vector.broadcast %cst_186 : f32 to vector<16x64xf32>
    %671 = arith.mulf %670, %658 : vector<16x64xf32>
    %672 = math.tanh %671 : vector<16x64xf32>
    %cst_187 = arith.constant 1.000000e+00 : f32
    %673 = vector.broadcast %cst_187 : f32 to vector<16x64xf32>
    %674 = arith.addf %672, %673 : vector<16x64xf32>
    %cst_188 = arith.constant 5.000000e-01 : f32
    %675 = vector.broadcast %cst_188 : f32 to vector<16x64xf32>
    %676 = arith.mulf %675, %674 : vector<16x64xf32>
    %677 = math.tanh %660 : vector<16x64xf32>
    %678 = arith.mulf %676, %677 : vector<16x64xf32>
    %679 = arith.addf %669, %678 : vector<16x64xf32>
    %cst_189 = arith.constant 5.000000e-01 : f32
    %680 = vector.broadcast %cst_189 : f32 to vector<16x64xf32>
    %681 = arith.mulf %680, %661 : vector<16x64xf32>
    %682 = math.tanh %681 : vector<16x64xf32>
    %cst_190 = arith.constant 1.000000e+00 : f32
    %683 = vector.broadcast %cst_190 : f32 to vector<16x64xf32>
    %684 = arith.addf %682, %683 : vector<16x64xf32>
    %cst_191 = arith.constant 5.000000e-01 : f32
    %685 = vector.broadcast %cst_191 : f32 to vector<16x64xf32>
    %686 = arith.mulf %685, %684 : vector<16x64xf32>
    %687 = math.tanh %679 : vector<16x64xf32>
    %688 = arith.mulf %686, %687 : vector<16x64xf32>
    %689 = vector.broadcast %649 : i32 to vector<1x64xi32>
    %690 = vector.broadcast %650 : i32 to vector<1x64xi32>
    %691 = arith.select %7, %689, %690 : vector<1x64xi1>, vector<1x64xi32>
    %692 = vector.broadcast %691 : vector<1x64xi32> to vector<16x64xi32>
    %693 = vector.broadcast %3 : vector<16x1xi32> to vector<16x64xi32>
    %694 = arith.cmpi slt, %692, %693 : vector<16x64xi32>
    %695 = arith.select %694, %688, %642 : vector<16x64xi1>, vector<16x64xf32>
    %696 = arith.select %694, %679, %643 : vector<16x64xi1>, vector<16x64xf32>
    %cst_192 = arith.constant 0.000000e+00 : f32
    %697 = vector.broadcast %cst_192 : f32 to vector<16x64xf32>
    %698 = arith.select %694, %688, %697 : vector<16x64xi1>, vector<16x64xf32>
    %699 = arith.addf %646, %698 : vector<16x64xf32>
    %700 = arith.maximumf %648, %688 : vector<16x64xf32>
    %701 = arith.select %694, %700, %648 : vector<16x64xi1>, vector<16x64xf32>
    %c13_i32 = arith.constant 13 : i32
    %702 = arith.addi %8, %c13_i32 : i32
    %c31_i32_193 = arith.constant 31 : i32
    %703 = arith.subi %c31_i32_193, %702 : i32
    %704 = arith.index_cast %c13_i32 : i32 to index
    %c0_194 = arith.constant 0 : index
    %c0_195 = arith.constant 0 : index
    %705 = vector.load %arg3[%704, %c0_194, %c0_195] : memref<16x16x256xbf16, #tpu.memory_space<vmem>>, vector<1x16x256xbf16>
    %706 = vector.shape_cast %705 : vector<1x16x256xbf16> to vector<16x256xbf16>
    %707 = arith.extf %706 : vector<16x256xbf16> to vector<16x256xf32>
    %708 = arith.truncf %695 : vector<16x64xf32> to vector<16x64xbf16>
    %cst_196 = arith.constant dense<0.000000e+00> : vector<16x256xf32>
    %709 = tpu.matmul %708, %4, %cst_196 {dimension_numbers = #tpu.dot_dimension_numbers<[1], [0], [0], [1], [0, 0, 1, 1], [], []>} : vector<16x64xbf16>, vector<64x256xbf16>, vector<16x256xf32> -> vector<16x256xf32>
    %710 = arith.addf %707, %709 : vector<16x256xf32>
    %711 = vector.extract_strided_slice %710 {offsets = [0, 0], sizes = [16, 64], strides = [1, 1]} : vector<16x256xf32> to vector<16x64xf32>
    %712 = vector.extract_strided_slice %710 {offsets = [0, 64], sizes = [16, 64], strides = [1, 1]} : vector<16x256xf32> to vector<16x64xf32>
    %713 = vector.extract_strided_slice %710 {offsets = [0, 128], sizes = [16, 64], strides = [1, 1]} : vector<16x256xf32> to vector<16x64xf32>
    %714 = vector.extract_strided_slice %710 {offsets = [0, 192], sizes = [16, 64], strides = [1, 1]} : vector<16x256xf32> to vector<16x64xf32>
    %cst_197 = arith.constant 5.000000e-01 : f32
    %715 = vector.broadcast %cst_197 : f32 to vector<16x64xf32>
    %716 = arith.mulf %715, %712 : vector<16x64xf32>
    %717 = math.tanh %716 : vector<16x64xf32>
    %cst_198 = arith.constant 1.000000e+00 : f32
    %718 = vector.broadcast %cst_198 : f32 to vector<16x64xf32>
    %719 = arith.addf %717, %718 : vector<16x64xf32>
    %cst_199 = arith.constant 5.000000e-01 : f32
    %720 = vector.broadcast %cst_199 : f32 to vector<16x64xf32>
    %721 = arith.mulf %720, %719 : vector<16x64xf32>
    %722 = arith.mulf %721, %696 : vector<16x64xf32>
    %cst_200 = arith.constant 5.000000e-01 : f32
    %723 = vector.broadcast %cst_200 : f32 to vector<16x64xf32>
    %724 = arith.mulf %723, %711 : vector<16x64xf32>
    %725 = math.tanh %724 : vector<16x64xf32>
    %cst_201 = arith.constant 1.000000e+00 : f32
    %726 = vector.broadcast %cst_201 : f32 to vector<16x64xf32>
    %727 = arith.addf %725, %726 : vector<16x64xf32>
    %cst_202 = arith.constant 5.000000e-01 : f32
    %728 = vector.broadcast %cst_202 : f32 to vector<16x64xf32>
    %729 = arith.mulf %728, %727 : vector<16x64xf32>
    %730 = math.tanh %713 : vector<16x64xf32>
    %731 = arith.mulf %729, %730 : vector<16x64xf32>
    %732 = arith.addf %722, %731 : vector<16x64xf32>
    %cst_203 = arith.constant 5.000000e-01 : f32
    %733 = vector.broadcast %cst_203 : f32 to vector<16x64xf32>
    %734 = arith.mulf %733, %714 : vector<16x64xf32>
    %735 = math.tanh %734 : vector<16x64xf32>
    %cst_204 = arith.constant 1.000000e+00 : f32
    %736 = vector.broadcast %cst_204 : f32 to vector<16x64xf32>
    %737 = arith.addf %735, %736 : vector<16x64xf32>
    %cst_205 = arith.constant 5.000000e-01 : f32
    %738 = vector.broadcast %cst_205 : f32 to vector<16x64xf32>
    %739 = arith.mulf %738, %737 : vector<16x64xf32>
    %740 = math.tanh %732 : vector<16x64xf32>
    %741 = arith.mulf %739, %740 : vector<16x64xf32>
    %742 = vector.broadcast %702 : i32 to vector<1x64xi32>
    %743 = vector.broadcast %703 : i32 to vector<1x64xi32>
    %744 = arith.select %7, %742, %743 : vector<1x64xi1>, vector<1x64xi32>
    %745 = vector.broadcast %744 : vector<1x64xi32> to vector<16x64xi32>
    %746 = vector.broadcast %3 : vector<16x1xi32> to vector<16x64xi32>
    %747 = arith.cmpi slt, %745, %746 : vector<16x64xi32>
    %748 = arith.select %747, %741, %695 : vector<16x64xi1>, vector<16x64xf32>
    %749 = arith.select %747, %732, %696 : vector<16x64xi1>, vector<16x64xf32>
    %cst_206 = arith.constant 0.000000e+00 : f32
    %750 = vector.broadcast %cst_206 : f32 to vector<16x64xf32>
    %751 = arith.select %747, %741, %750 : vector<16x64xi1>, vector<16x64xf32>
    %752 = arith.addf %699, %751 : vector<16x64xf32>
    %753 = arith.maximumf %701, %741 : vector<16x64xf32>
    %754 = arith.select %747, %753, %701 : vector<16x64xi1>, vector<16x64xf32>
    %c14_i32 = arith.constant 14 : i32
    %755 = arith.addi %8, %c14_i32 : i32
    %c31_i32_207 = arith.constant 31 : i32
    %756 = arith.subi %c31_i32_207, %755 : i32
    %757 = arith.index_cast %c14_i32 : i32 to index
    %c0_208 = arith.constant 0 : index
    %c0_209 = arith.constant 0 : index
    %758 = vector.load %arg3[%757, %c0_208, %c0_209] : memref<16x16x256xbf16, #tpu.memory_space<vmem>>, vector<1x16x256xbf16>
    %759 = vector.shape_cast %758 : vector<1x16x256xbf16> to vector<16x256xbf16>
    %760 = arith.extf %759 : vector<16x256xbf16> to vector<16x256xf32>
    %761 = arith.truncf %748 : vector<16x64xf32> to vector<16x64xbf16>
    %cst_210 = arith.constant dense<0.000000e+00> : vector<16x256xf32>
    %762 = tpu.matmul %761, %4, %cst_210 {dimension_numbers = #tpu.dot_dimension_numbers<[1], [0], [0], [1], [0, 0, 1, 1], [], []>} : vector<16x64xbf16>, vector<64x256xbf16>, vector<16x256xf32> -> vector<16x256xf32>
    %763 = arith.addf %760, %762 : vector<16x256xf32>
    %764 = vector.extract_strided_slice %763 {offsets = [0, 0], sizes = [16, 64], strides = [1, 1]} : vector<16x256xf32> to vector<16x64xf32>
    %765 = vector.extract_strided_slice %763 {offsets = [0, 64], sizes = [16, 64], strides = [1, 1]} : vector<16x256xf32> to vector<16x64xf32>
    %766 = vector.extract_strided_slice %763 {offsets = [0, 128], sizes = [16, 64], strides = [1, 1]} : vector<16x256xf32> to vector<16x64xf32>
    %767 = vector.extract_strided_slice %763 {offsets = [0, 192], sizes = [16, 64], strides = [1, 1]} : vector<16x256xf32> to vector<16x64xf32>
    %cst_211 = arith.constant 5.000000e-01 : f32
    %768 = vector.broadcast %cst_211 : f32 to vector<16x64xf32>
    %769 = arith.mulf %768, %765 : vector<16x64xf32>
    %770 = math.tanh %769 : vector<16x64xf32>
    %cst_212 = arith.constant 1.000000e+00 : f32
    %771 = vector.broadcast %cst_212 : f32 to vector<16x64xf32>
    %772 = arith.addf %770, %771 : vector<16x64xf32>
    %cst_213 = arith.constant 5.000000e-01 : f32
    %773 = vector.broadcast %cst_213 : f32 to vector<16x64xf32>
    %774 = arith.mulf %773, %772 : vector<16x64xf32>
    %775 = arith.mulf %774, %749 : vector<16x64xf32>
    %cst_214 = arith.constant 5.000000e-01 : f32
    %776 = vector.broadcast %cst_214 : f32 to vector<16x64xf32>
    %777 = arith.mulf %776, %764 : vector<16x64xf32>
    %778 = math.tanh %777 : vector<16x64xf32>
    %cst_215 = arith.constant 1.000000e+00 : f32
    %779 = vector.broadcast %cst_215 : f32 to vector<16x64xf32>
    %780 = arith.addf %778, %779 : vector<16x64xf32>
    %cst_216 = arith.constant 5.000000e-01 : f32
    %781 = vector.broadcast %cst_216 : f32 to vector<16x64xf32>
    %782 = arith.mulf %781, %780 : vector<16x64xf32>
    %783 = math.tanh %766 : vector<16x64xf32>
    %784 = arith.mulf %782, %783 : vector<16x64xf32>
    %785 = arith.addf %775, %784 : vector<16x64xf32>
    %cst_217 = arith.constant 5.000000e-01 : f32
    %786 = vector.broadcast %cst_217 : f32 to vector<16x64xf32>
    %787 = arith.mulf %786, %767 : vector<16x64xf32>
    %788 = math.tanh %787 : vector<16x64xf32>
    %cst_218 = arith.constant 1.000000e+00 : f32
    %789 = vector.broadcast %cst_218 : f32 to vector<16x64xf32>
    %790 = arith.addf %788, %789 : vector<16x64xf32>
    %cst_219 = arith.constant 5.000000e-01 : f32
    %791 = vector.broadcast %cst_219 : f32 to vector<16x64xf32>
    %792 = arith.mulf %791, %790 : vector<16x64xf32>
    %793 = math.tanh %785 : vector<16x64xf32>
    %794 = arith.mulf %792, %793 : vector<16x64xf32>
    %795 = vector.broadcast %755 : i32 to vector<1x64xi32>
    %796 = vector.broadcast %756 : i32 to vector<1x64xi32>
    %797 = arith.select %7, %795, %796 : vector<1x64xi1>, vector<1x64xi32>
    %798 = vector.broadcast %797 : vector<1x64xi32> to vector<16x64xi32>
    %799 = vector.broadcast %3 : vector<16x1xi32> to vector<16x64xi32>
    %800 = arith.cmpi slt, %798, %799 : vector<16x64xi32>
    %801 = arith.select %800, %794, %748 : vector<16x64xi1>, vector<16x64xf32>
    %802 = arith.select %800, %785, %749 : vector<16x64xi1>, vector<16x64xf32>
    %cst_220 = arith.constant 0.000000e+00 : f32
    %803 = vector.broadcast %cst_220 : f32 to vector<16x64xf32>
    %804 = arith.select %800, %794, %803 : vector<16x64xi1>, vector<16x64xf32>
    %805 = arith.addf %752, %804 : vector<16x64xf32>
    %806 = arith.maximumf %754, %794 : vector<16x64xf32>
    %807 = arith.select %800, %806, %754 : vector<16x64xi1>, vector<16x64xf32>
    %c15_i32 = arith.constant 15 : i32
    %808 = arith.addi %8, %c15_i32 : i32
    %c31_i32_221 = arith.constant 31 : i32
    %809 = arith.subi %c31_i32_221, %808 : i32
    %810 = arith.index_cast %c15_i32 : i32 to index
    %c0_222 = arith.constant 0 : index
    %c0_223 = arith.constant 0 : index
    %811 = vector.load %arg3[%810, %c0_222, %c0_223] : memref<16x16x256xbf16, #tpu.memory_space<vmem>>, vector<1x16x256xbf16>
    %812 = vector.shape_cast %811 : vector<1x16x256xbf16> to vector<16x256xbf16>
    %813 = arith.extf %812 : vector<16x256xbf16> to vector<16x256xf32>
    %814 = arith.truncf %801 : vector<16x64xf32> to vector<16x64xbf16>
    %cst_224 = arith.constant dense<0.000000e+00> : vector<16x256xf32>
    %815 = tpu.matmul %814, %4, %cst_224 {dimension_numbers = #tpu.dot_dimension_numbers<[1], [0], [0], [1], [0, 0, 1, 1], [], []>} : vector<16x64xbf16>, vector<64x256xbf16>, vector<16x256xf32> -> vector<16x256xf32>
    %816 = arith.addf %813, %815 : vector<16x256xf32>
    %817 = vector.extract_strided_slice %816 {offsets = [0, 0], sizes = [16, 64], strides = [1, 1]} : vector<16x256xf32> to vector<16x64xf32>
    %818 = vector.extract_strided_slice %816 {offsets = [0, 64], sizes = [16, 64], strides = [1, 1]} : vector<16x256xf32> to vector<16x64xf32>
    %819 = vector.extract_strided_slice %816 {offsets = [0, 128], sizes = [16, 64], strides = [1, 1]} : vector<16x256xf32> to vector<16x64xf32>
    %820 = vector.extract_strided_slice %816 {offsets = [0, 192], sizes = [16, 64], strides = [1, 1]} : vector<16x256xf32> to vector<16x64xf32>
    %cst_225 = arith.constant 5.000000e-01 : f32
    %821 = vector.broadcast %cst_225 : f32 to vector<16x64xf32>
    %822 = arith.mulf %821, %818 : vector<16x64xf32>
    %823 = math.tanh %822 : vector<16x64xf32>
    %cst_226 = arith.constant 1.000000e+00 : f32
    %824 = vector.broadcast %cst_226 : f32 to vector<16x64xf32>
    %825 = arith.addf %823, %824 : vector<16x64xf32>
    %cst_227 = arith.constant 5.000000e-01 : f32
    %826 = vector.broadcast %cst_227 : f32 to vector<16x64xf32>
    %827 = arith.mulf %826, %825 : vector<16x64xf32>
    %828 = arith.mulf %827, %802 : vector<16x64xf32>
    %cst_228 = arith.constant 5.000000e-01 : f32
    %829 = vector.broadcast %cst_228 : f32 to vector<16x64xf32>
    %830 = arith.mulf %829, %817 : vector<16x64xf32>
    %831 = math.tanh %830 : vector<16x64xf32>
    %cst_229 = arith.constant 1.000000e+00 : f32
    %832 = vector.broadcast %cst_229 : f32 to vector<16x64xf32>
    %833 = arith.addf %831, %832 : vector<16x64xf32>
    %cst_230 = arith.constant 5.000000e-01 : f32
    %834 = vector.broadcast %cst_230 : f32 to vector<16x64xf32>
    %835 = arith.mulf %834, %833 : vector<16x64xf32>
    %836 = math.tanh %819 : vector<16x64xf32>
    %837 = arith.mulf %835, %836 : vector<16x64xf32>
    %838 = arith.addf %828, %837 : vector<16x64xf32>
    %cst_231 = arith.constant 5.000000e-01 : f32
    %839 = vector.broadcast %cst_231 : f32 to vector<16x64xf32>
    %840 = arith.mulf %839, %820 : vector<16x64xf32>
    %841 = math.tanh %840 : vector<16x64xf32>
    %cst_232 = arith.constant 1.000000e+00 : f32
    %842 = vector.broadcast %cst_232 : f32 to vector<16x64xf32>
    %843 = arith.addf %841, %842 : vector<16x64xf32>
    %cst_233 = arith.constant 5.000000e-01 : f32
    %844 = vector.broadcast %cst_233 : f32 to vector<16x64xf32>
    %845 = arith.mulf %844, %843 : vector<16x64xf32>
    %846 = math.tanh %838 : vector<16x64xf32>
    %847 = arith.mulf %845, %846 : vector<16x64xf32>
    %848 = vector.broadcast %808 : i32 to vector<1x64xi32>
    %849 = vector.broadcast %809 : i32 to vector<1x64xi32>
    %850 = arith.select %7, %848, %849 : vector<1x64xi1>, vector<1x64xi32>
    %851 = vector.broadcast %850 : vector<1x64xi32> to vector<16x64xi32>
    %852 = vector.broadcast %3 : vector<16x1xi32> to vector<16x64xi32>
    %853 = arith.cmpi slt, %851, %852 : vector<16x64xi32>
    %854 = arith.select %853, %847, %801 : vector<16x64xi1>, vector<16x64xf32>
    %855 = arith.select %853, %838, %802 : vector<16x64xi1>, vector<16x64xf32>
    %cst_234 = arith.constant 0.000000e+00 : f32
    %856 = vector.broadcast %cst_234 : f32 to vector<16x64xf32>
    %857 = arith.select %853, %847, %856 : vector<16x64xi1>, vector<16x64xf32>
    %858 = arith.addf %805, %857 : vector<16x64xf32>
    %859 = arith.maximumf %807, %847 : vector<16x64xf32>
    %860 = arith.select %853, %859, %807 : vector<16x64xi1>, vector<16x64xf32>
    %c16_i32_235 = arith.constant 16 : i32
    %c0_236 = arith.constant 0 : index
    %c0_237 = arith.constant 0 : index
    %861 = vector.load %arg6[%c0_236, %c0_237] : memref<16x64xf32, #tpu.memory_space<vmem>>, vector<16x64xf32>
    tpu.vector_store %arg6[%c0_236, %c0_237], %854 {strides = array<i32>} : memref<16x64xf32, #tpu.memory_space<vmem>>, vector<16x64xf32>,
    %c0_238 = arith.constant 0 : index
    %c0_239 = arith.constant 0 : index
    %862 = vector.load %arg7[%c0_238, %c0_239] : memref<16x64xf32, #tpu.memory_space<vmem>>, vector<16x64xf32>
    tpu.vector_store %arg7[%c0_238, %c0_239], %855 {strides = array<i32>} : memref<16x64xf32, #tpu.memory_space<vmem>>, vector<16x64xf32>,
    %c0_240 = arith.constant 0 : index
    %c0_241 = arith.constant 0 : index
    %863 = vector.load %arg8[%c0_240, %c0_241] : memref<16x64xf32, #tpu.memory_space<vmem>>, vector<16x64xf32>
    tpu.vector_store %arg8[%c0_240, %c0_241], %858 {strides = array<i32>} : memref<16x64xf32, #tpu.memory_space<vmem>>, vector<16x64xf32>,
    %c0_242 = arith.constant 0 : index
    %c0_243 = arith.constant 0 : index
    %864 = vector.load %arg9[%c0_242, %c0_243] : memref<16x64xf32, #tpu.memory_space<vmem>>, vector<16x64xf32>
    tpu.vector_store %arg9[%c0_242, %c0_243], %860 {strides = array<i32>} : memref<16x64xf32, #tpu.memory_space<vmem>>, vector<16x64xf32>,
    %c1_i32_244 = arith.constant 1 : i32
    %865 = arith.cmpi eq, %arg1, %c1_i32_244 : i32
    %866 = arith.extui %865 : i1 to i32
    %c0_i32_245 = arith.constant 0 : i32
    %867 = arith.cmpi ne, %866, %c0_i32_245 : i32
    scf.if %867 {
      %868 = arith.sitofp %3 : vector<16x1xi32> to vector<16x1xf32>
      %869 = vector.broadcast %868 : vector<16x1xf32> to vector<16x64xf32>
      %870 = arith.divf %858, %869 : vector<16x64xf32>
      %871 = vector.extract_strided_slice %854 {offsets = [0, 32], sizes = [16, 32], strides = [1, 1]} : vector<16x64xf32> to vector<16x32xf32>
      %c0_246 = arith.constant 0 : index
      %c0_247 = arith.constant 0 : index
      %872 = vector.load %arg5[%c0_246, %c0_247] : memref<16x192xf32, #tpu.memory_space<vmem>>, vector<16x32xf32>
      tpu.vector_store %arg5[%c0_246, %c0_247], %871 {strides = array<i32>} : memref<16x192xf32, #tpu.memory_space<vmem>>, vector<16x32xf32>,
      %873 = vector.extract_strided_slice %854 {offsets = [0, 0], sizes = [16, 32], strides = [1, 1]} : vector<16x64xf32> to vector<16x32xf32>
      %c0_248 = arith.constant 0 : index
      %c32 = arith.constant 32 : index
      %874 = vector.load %arg5[%c0_248, %c32] : memref<16x192xf32, #tpu.memory_space<vmem>>, vector<16x32xf32>
      tpu.vector_store %arg5[%c0_248, %c32], %873 {strides = array<i32>} : memref<16x192xf32, #tpu.memory_space<vmem>>, vector<16x32xf32>,
      %c0_249 = arith.constant 0 : index
      %c64 = arith.constant 64 : index
      %875 = vector.load %arg5[%c0_249, %c64] : memref<16x192xf32, #tpu.memory_space<vmem>>, vector<16x64xf32>
      tpu.vector_store %arg5[%c0_249, %c64], %870 {strides = array<i32>} : memref<16x192xf32, #tpu.memory_space<vmem>>, vector<16x64xf32>,
      %c0_250 = arith.constant 0 : index
      %c128 = arith.constant 128 : index
      %876 = vector.load %arg5[%c0_250, %c128] : memref<16x192xf32, #tpu.memory_space<vmem>>, vector<16x64xf32>
      tpu.vector_store %arg5[%c0_250, %c128], %860 {strides = array<i32>} : memref<16x192xf32, #tpu.memory_space<vmem>>, vector<16x64xf32>,
    } else {
    }
    return
  }
  func.func @transform_0(%arg0: i32, %arg1: i32) -> (i32, i32) {
    %c0_i32 = arith.constant 0 : i32
    %c0_i32_0 = arith.constant 0 : i32
    return %arg0, %c0_i32 : i32, i32
  }
  func.func @transform_1(%arg0: i32, %arg1: i32) -> (i32, i32, i32) {
    %c0_i32 = arith.constant 0 : i32
    %c0_i32_0 = arith.constant 0 : i32
    return %arg1, %arg0, %c0_i32 : i32, i32, i32
  }
  func.func @transform_2(%arg0: i32, %arg1: i32) -> (i32, i32) {
    %c0_i32 = arith.constant 0 : i32
    %c0_i32_0 = arith.constant 0 : i32
    %c0_i32_1 = arith.constant 0 : i32
    return %c0_i32, %c0_i32_0 : i32, i32
  }
  func.func @transform_3(%arg0: i32, %arg1: i32) -> (i32, i32) {
    %c0_i32 = arith.constant 0 : i32
    %c0_i32_0 = arith.constant 0 : i32
    return %arg0, %c0_i32 : i32, i32
  }
}

</mosaic_0001>

<bundles_post_ra>
// kernel: text_module_forward.1
= control target key start
LH: loop header
LB: loop body
LE: loop exit
PB: predicated region body
PF: predicated region fallthrough
CT: control target
= control target key end

     0   :  { %s4751_s0 = inlined_call_operand.vmem [shape: s32[32,1], index: 0, kind: input, shape index: {}]   ;;  %s4752_s1 = inlined_call_operand.vmem [shape: bf16[32,32,256], index: 1, kind: input, shape index: {}]   ;;  %s4753_s2 = inlined_call_operand.vmem [shape: bf16[64,256], index: 2, kind: input, shape index: {}]   ;;  %s4754_s3 = inlined_call_operand.hbm [shape: f32[32,192], index: 3, kind: output, shape index: {}]  }
   0x1   :  { %4758 = sst [smem:[#allocation10_spill]] %s4751_s0 }
   0x2   :  { %8 = vsyncpa [#allocation8], 0 }
   0x3   :  { %10 = vsyncpa [#allocation8 + $0x1], 0  ;;  %s3235_s12 = smov 0   ;;  %s3237_s13 = smov 0  }
   0x4   :  { %s3239_s14 = smov 0   ;;  %s3241_s15 = smov 0  }
   0x5   :  { %s3243_s16 = smov 0   ;;  %s3245_s17 = smov 0  }
   0x6   :  { %s3247_s18 = smov 0   ;;  %s3249_s19 = smov 0  }
   0x7   :  { %s3251_s20 = smov 0   ;;  %s3253_s21 = smov 0  }
   0x8 LB: > { %s2603_s22 = sadd.s32 4294967295, %s3203_s21   ;;  %s2604_s23 = sadd.s32 4294967294, %s3203_s21   ;;  %s3203_s21 = sphi %s3253_s21, %s16_s21   ;;  %s3199_s20 = sphi %s3251_s20, %s4781_s20   ;;  %s3195_s19 = sphi %s3249_s19, %s4780_s19   ;;  %s3191_s18 = sphi %s3247_s18, %s4779_s18   ;;  %s3187_s17 = sphi %s3245_s17, %s4778_s17   ;;  %s3183_s16 = sphi %s3243_s16, %s4777_s16   ;;  %s3179_s15 = sphi %s3241_s15, %s4776_s15   ;;  %s3175_s14 = sphi %s3239_s14, %s4775_s14   ;;  %s3171_s13 = sphi %s3237_s13, %s4774_s13   ;;  %s3167_s12 = sphi %s3235_s12, %s4773_s12  }
   0x9   : > { %s25_s24 = sadd.s32 1, %s3195_s19  ;;  %s28_s25 = sadd.s32 1, %s3199_s20 }
   0xa   : > { %p26_p0 = scmp.ge.s32.totalorder %s25_s24, 2  ;;  %s63_s26 = sadd.s32 1, %s3183_s16 }
   0xb   : > { %p70_p1 = scmp.ne.s32.totalorder %s3183_s16, %s3179_s15  ;;  %p71_p2 = scmp.eq.s32.totalorder %s3203_s21, 0 }
   0xc   : > { %s4783_s24 = smov (%p26_p0, %s25_s24), 0  ;;  %s4785_s25 = smov (!%p26_p0, %s28_s25), %s3199_s20 }
   0xd   : > { %s58_s27 = ssub.s32 %s3195_s19, %s4783_s24  ;;  %p3298_p3 = por %p71_p2, %p70_p1 }
   0xe   : > { %p30_p4 = scmp.ge.s32.totalorder %s4785_s25, 2  ;;  %s110_s29 = sadd.s32 1, %s3175_s14 }
   0xf   : > { %p120_p5 = scmp.ne.s32.totalorder %s3175_s14, %s3171_s13  ;;  %p121_p6 = scmp.eq.s32.totalorder %s2603_s22, 3 }
  0x10   : > { %s4787_s25 = smov (%p30_p4, %s4785_s25), 0  ;;  %p126_p8 = scmp.ne.s32.totalorder %s3171_s13, %s3167_s12 }
  0x11   : > { %p3307_p7 = por %p121_p6, %p120_p5  ;;  %s59_s4 = ssub.s32 %s3199_s20, %s4787_s25 }
  0x12   : > { %p127_p9 = scmp.eq.s32.totalorder %s2604_s23, 3  ;;  %s60_s5 = sor.u32 %s59_s4, %s58_s27 }
  0x13   : > { %p108_p10 = scmp.eq.s32.totalorder %s59_s4, 0  ;;  %p61_p11 = scmp.eq.s32.totalorder %s60_s5, 0 }
  0x14   : > { %p3315_p12 = por %p127_p9, %p126_p8  ;;  %p2606_p13 = scmp.ge.s32.totalorder %s3203_s21, 4 }
  0x15   : > { %s3320_s7 = scalar_select %p108_p10, %s3175_s14, %s110_s29  }
  0x16   : > { %s3323_s8 = scalar_select %p61_p11, %s3183_s16, %s63_s26  }
  0x17   : > { %146 = sbr.rel (%p2606_p13) target bundleno = 67 (0x43), region = 20 }
  0x1c   : > { %158 = sbr.rel (!%p3298_p3) target bundleno = 67 (0x43), region = 28  ;;  %s160_s9 = sand.u32 (%p3298_p3), 1, %s3183_s16  }
  0x1d   : > { %s2721_s10 = sshll.u32 (%p3298_p3), %s3199_s20, 2  ;;  %s2607_s11 = sshll.u32 (%p3298_p3), %s160_s9, 8 }
  0x1e   : > { %s2722_s22 = sshll.u32 (%p3298_p3), %s3195_s19, 7  ;;  %s3339_s28 = scalar_lea.vmem (%p3298_p3), [#allocation6], %s2607_s11 }
  0x1f   : > { %s167_s23 = sadd.s32 (%p3298_p3), %s2722_s22, %s2721_s10 }
  0x20   : > { %s2612_s27 = sshll.u32 (%p3298_p3), %s167_s23, 2 }
  0x21   : > { %s3334_s26 = scalar_lea.vmem %s4752_s1, %s2612_s27 }
  0x22   : > { %v260_v0 = vld [vmem:[%s3334_s26] sm:$0xff]  ;;  %v262_v1 = vld [vmem:[%s3334_s26 + $0x8] sm:$0xff] }
  0x23   : > { %v264_v2 = vld [vmem:[%s3334_s26 + $0x20] sm:$0xff]  ;;  %261 = vst [vmem:[%s3339_s28] sm:$0xff] %v260_v0  ;;  %v266_v3 = vld [vmem:[%s3334_s26 + $0x28] sm:$0xff] }
  0x24   : > { %263 = vst [vmem:[%s3339_s28 + $0x8] sm:$0xff] %v262_v1  ;;  %v268_v4 = vld [vmem:[%s3334_s26 + $0x40] sm:$0xff]  ;;  %v270_v5 = vld [vmem:[%s3334_s26 + $0x48] sm:$0xff] }
  0x25   : > { %265 = vst [vmem:[%s3339_s28 + $0x10] sm:$0xff] %v264_v2  ;;  %v272_v6 = vld [vmem:[%s3334_s26 + $0x60] sm:$0xff]  ;;  %v274_v7 = vld [vmem:[%s3334_s26 + $0x68] sm:$0xff] }
  0x26   : > { %267 = vst [vmem:[%s3339_s28 + $0x18] sm:$0xff] %v266_v3  ;;  %v276_v8 = vld [vmem:[%s3334_s26 + $0x80] sm:$0xff]  ;;  %v278_v9 = vld [vmem:[%s3334_s26 + $0x88] sm:$0xff] }
  0x27   : > { %269 = vst [vmem:[%s3339_s28 + $0x20] sm:$0xff] %v268_v4  ;;  %v280_v10 = vld [vmem:[%s3334_s26 + $0xa0] sm:$0xff]  ;;  %v282_v11 = vld [vmem:[%s3334_s26 + $0xa8] sm:$0xff] }
  0x28   : > { %271 = vst [vmem:[%s3339_s28 + $0x28] sm:$0xff] %v270_v5  ;;  %v284_v12 = vld [vmem:[%s3334_s26 + $0xc0] sm:$0xff]  ;;  %v286_v13 = vld [vmem:[%s3334_s26 + $0xc8] sm:$0xff] }
  0x29   : > { %273 = vst [vmem:[%s3339_s28 + $0x30] sm:$0xff] %v272_v6  ;;  %v288_v14 = vld [vmem:[%s3334_s26 + $0xe0] sm:$0xff]  ;;  %v290_v15 = vld [vmem:[%s3334_s26 + $0xe8] sm:$0xff] }
  0x2a   : > { %275 = vst [vmem:[%s3339_s28 + $0x38] sm:$0xff] %v274_v7  ;;  %v292_v16 = vld [vmem:[%s3334_s26 + $0x100] sm:$0xff]  ;;  %v294_v17 = vld [vmem:[%s3334_s26 + $0x108] sm:$0xff] }
  0x2b   : > { %277 = vst [vmem:[%s3339_s28 + $0x40] sm:$0xff] %v276_v8  ;;  %v296_v18 = vld [vmem:[%s3334_s26 + $0x120] sm:$0xff]  ;;  %v298_v19 = vld [vmem:[%s3334_s26 + $0x128] sm:$0xff] }
  0x2c   : > { %279 = vst [vmem:[%s3339_s28 + $0x48] sm:$0xff] %v278_v9  ;;  %v300_v20 = vld [vmem:[%s3334_s26 + $0x140] sm:$0xff]  ;;  %v302_v21 = vld [vmem:[%s3334_s26 + $0x148] sm:$0xff] }
  0x2d   : > { %281 = vst [vmem:[%s3339_s28 + $0x50] sm:$0xff] %v280_v10  ;;  %v304_v22 = vld [vmem:[%s3334_s26 + $0x160] sm:$0xff]  ;;  %v306_v23 = vld [vmem:[%s3334_s26 + $0x168] sm:$0xff] }
  0x2e   : > { %283 = vst [vmem:[%s3339_s28 + $0x58] sm:$0xff] %v282_v11  ;;  %v308_v24 = vld [vmem:[%s3334_s26 + $0x180] sm:$0xff]  ;;  %v310_v25 = vld [vmem:[%s3334_s26 + $0x188] sm:$0xff] }
  0x2f   : > { %285 = vst [vmem:[%s3339_s28 + $0x60] sm:$0xff] %v284_v12  ;;  %v312_v26 = vld [vmem:[%s3334_s26 + $0x1a0] sm:$0xff]  ;;  %v314_v27 = vld [vmem:[%s3334_s26 + $0x1a8] sm:$0xff] }
  0x30   : > { %287 = vst [vmem:[%s3339_s28 + $0x68] sm:$0xff] %v286_v13  ;;  %v316_v28 = vld [vmem:[%s3334_s26 + $0x1c0] sm:$0xff]  ;;  %v318_v29 = vld [vmem:[%s3334_s26 + $0x1c8] sm:$0xff] }
  0x31   : > { %289 = vst [vmem:[%s3339_s28 + $0x70] sm:$0xff] %v288_v14  ;;  %v320_v30 = vld [vmem:[%s3334_s26 + $0x1e0] sm:$0xff]  ;;  %v322_v31 = vld [vmem:[%s3334_s26 + $0x1e8] sm:$0xff] }
  0x32   : > { %291 = vst [vmem:[%s3339_s28 + $0x78] sm:$0xff] %v290_v15 }
  0x33   : > { %293 = vst [vmem:[%s3339_s28 + $0x80] sm:$0xff] %v292_v16 }
  0x34   : > { %295 = vst [vmem:[%s3339_s28 + $0x88] sm:$0xff] %v294_v17 }
  0x35   : > { %297 = vst [vmem:[%s3339_s28 + $0x90] sm:$0xff] %v296_v18 }
  0x36   : > { %299 = vst [vmem:[%s3339_s28 + $0x98] sm:$0xff] %v298_v19 }
  0x37   : > { %301 = vst [vmem:[%s3339_s28 + $0xa0] sm:$0xff] %v300_v20 }
  0x38   : > { %303 = vst [vmem:[%s3339_s28 + $0xa8] sm:$0xff] %v302_v21 }
  0x39   : > { %305 = vst [vmem:[%s3339_s28 + $0xb0] sm:$0xff] %v304_v22 }
  0x3a   : > { %307 = vst [vmem:[%s3339_s28 + $0xb8] sm:$0xff] %v306_v23 }
  0x3b   : > { %309 = vst [vmem:[%s3339_s28 + $0xc0] sm:$0xff] %v308_v24 }
  0x3c   : > { %311 = vst [vmem:[%s3339_s28 + $0xc8] sm:$0xff] %v310_v25 }
  0x3d   : > { %313 = vst [vmem:[%s3339_s28 + $0xd0] sm:$0xff] %v312_v26 }
  0x3e   : > { %315 = vst [vmem:[%s3339_s28 + $0xd8] sm:$0xff] %v314_v27 }
  0x3f   : > { %317 = vst [vmem:[%s3339_s28 + $0xe0] sm:$0xff] %v316_v28 }
  0x40   : > { %319 = vst [vmem:[%s3339_s28 + $0xe8] sm:$0xff] %v318_v29 }
  0x41   : > { %321 = vst [vmem:[%s3339_s28 + $0xf0] sm:$0xff] %v320_v30 }
  0x42   : > { %323 = vst [vmem:[%s3339_s28 + $0xf8] sm:$0xff] %v322_v31 }
  0x43 PF: > { %p2613_p0 = scmp.ge.s32.totalorder %s3203_s21, 1  ;;  %p328_p1 = scmp.lt.s32.totalorder %s3203_s21, 5 }
  0x45   : > { %p329_p2 = pnand %p2613_p0, %p328_p1 }
  0x46   : > { %s335_s5 = sand.u32 (!%p329_p2), 1, %s3179_s15   ;;  %s4755_s9 = sand.u32 (!%p329_p2), 1, %s3171_s13  }
  0x47   : > { %332 = sbr.rel (%p329_p2) target bundleno = 6600 (0x19c8), region = 66  ;;  %s2614_s10 = sshll.u32 (!%p329_p2), %s335_s5, 8 }
  0x48   : > { %s2615_s11 = sshll.u32 (!%p329_p2), %s4755_s9, 5  ;;  %s2616_s22 = sshll.u32 (!%p329_p2), %s3191_s18, 1 }
  0x49   : > { %p364_p3 = scmp.lt.s32.totalorder (!%p329_p2), %s2616_s22, 3  ;;  %s4762_s0 = sld [smem:[#allocation10_spill]] (!%p329_p2) }
  0x4a   : > { %s3414_s26 = scalar_lea.vmem (!%p329_p2), [#allocation6], %s2614_s10  ;;  %s3416_s28 = scalar_lea.vmem (!%p329_p2), [#allocation7], %s2615_s11 }
  0x4b   : > { %p2618_p4 = scmp.ne.s32.totalorder (!%p329_p2), %s3187_s17, 0 }
  0x4c   : > { %s4789_s22 = smov (!%p364_p3, %s2616_s22), 3 }
  0x4d   : > { %s2617_s23 = sshll.u32 %s4789_s22, 3  ;;  %376 = sbr.rel (%p2618_p4) target bundleno = 91 (0x5b), region = 74 }
  0x4f   : > { %s3412_s29 = scalar_lea.vmem %s4762_s0, %s2617_s23 }
  0x52   : > { %vm377_vm0 = vcmask 523264   ;;  %v3205_v32 = vmov 0.0   ;;  %v3206_v33 = vmov -3.4028235e+38  }
  0x53   : > { %378 = vst.msk [vmem:[#allocation2] sm:$0xff] %vm377_vm0, %v3205_v32 }
  0x54   : > { %379 = vst.msk [vmem:[#allocation2 + $0x8] sm:$0xff] %vm377_vm0, %v3205_v32 }
  0x55   : > { %380 = vst.msk [vmem:[#allocation3] sm:$0xff] %vm377_vm0, %v3205_v32 }
  0x56   : > { %381 = vst.msk [vmem:[#allocation3 + $0x8] sm:$0xff] %vm377_vm0, %v3205_v32 }
  0x57   : > { %382 = vst.msk [vmem:[#allocation4] sm:$0xff] %vm377_vm0, %v3205_v32 }
  0x58   : > { %383 = vst.msk [vmem:[#allocation4 + $0x8] sm:$0xff] %vm377_vm0, %v3205_v32 }
  0x59   : > { %384 = vst.msk [vmem:[#allocation5] sm:$0xff] %vm377_vm0, %v3206_v33 }
  0x5a   : > { %385 = vst.msk [vmem:[#allocation5 + $0x8] sm:$0xff] %vm377_vm0, %v3206_v33 }
  0x5b PF: > { %v2646_v34 = vld [vmem:[%s4753_s2 + $0x30] sm:$0xf]  ;;  %v2730_v35 = vld [vmem:[%s4753_s2 + $0x34] sm:$0xf0]  ;;  %v2729_v36 = vld [vmem:[%s4753_s2 + $0x34] sm:$0xf] }
  0x5c   : > { %v3428_v37 = vor.u32 %v2730_v35, %v2646_v34  ;;  %v2648_v38 = vld [vmem:[%s4753_s2 + $0x38] sm:$0xf0]  ;;  %v2638_v39 = vld [vmem:[%s4753_s2 + $0x20] sm:$0xf]  ;;  %v2728_v40 = vld [vmem:[%s4753_s2 + $0x24] sm:$0xf0] }
  0x5d   : > { %v3439_v41 = vor.u32 %v2729_v36, %v2648_v38  ;;  %v2727_v42 = vld [vmem:[%s4753_s2 + $0x24] sm:$0xf]  ;;  %v2640_v43 = vld [vmem:[%s4753_s2 + $0x28] sm:$0xf0]  ;;  %v3448_v44 = vor.u32 %v2728_v40, %v2638_v39  ;;  %v2630_v46 = vld [vmem:[%s4753_s2 + $0x10] sm:$0xf] }
  0x5e   : > { %464 = vmatpush.bf16.msra.mxu0 %v3428_v37  ;;  %592 = vmatpush.bf16.msra.mxu2 %v3428_v37  ;;  %v3452_v45 = vor.u32 %v2727_v42, %v2640_v43  ;;  %v2726_v47 = vld [vmem:[%s4753_s2 + $0x14] sm:$0xf0]  ;;  %v2725_v48 = vld [vmem:[%s4753_s2 + $0x14] sm:$0xf]  ;;  %v2632_v49 = vld [vmem:[%s4753_s2 + $0x18] sm:$0xf0] }
  0x5f   : > { %478 = vmatpush.bf16.msra.mxu1 %v3439_v41  ;;  %606 = vmatpush.bf16.msra.mxu3 %v3439_v41  ;;  %v3467_v50 = vld [vmem:[#allocation3] sm:$0xff]  ;;  %v3470_v51 = vor.u32 %v2726_v47, %v2630_v46  ;;  %s4756_s22 = smov 64   ;;  %v3475_v52 = vor.u32 %v2725_v48, %v2632_v49  ;;  %v2622_v53 = vld [vmem:[%s4753_s2] sm:$0xf]  ;;  %v2724_v54 = vld [vmem:[%s4753_s2 + $0x4] sm:$0xf0] }
  0x60   : > { %502 = vrot.lane.b32.xlu0 %v3467_v50, %s4756_s22  ;;  %v2723_v55 = vld [vmem:[%s4753_s2 + $0x4] sm:$0xf]  ;;  %v2624_v56 = vld [vmem:[%s4753_s2 + $0x8] sm:$0xf0]  ;;  %v3492_v57 = vor.u32 %v2724_v54, %v2622_v53  ;;  %v3501_v61 = vld [vmem:[#allocation3 + $0x8] sm:$0xff]  ;;  %vm456_vm1 = vcmask 523264  }
  0x61   : > { %v3494_v58 = vld [vmem:[#allocation2] sm:$0xff]  ;;  %v3496_v59 = vld [vmem:[#allocation2 + $0x8] sm:$0xff]  ;;  %v3499_v60 = vor.u32 %v2723_v55, %v2624_v56  ;;  %v3208_v1 = vmov 0   ;;  %v396_v56 = vlaneseq  ;;  %p2714_p5 = scmp.ne.s32.totalorder %s3187_s17, 1 }
  0x62   : > { %465 = vmatpush.bf16.msra.mxu0 %v3448_v44  ;;  %593 = vmatpush.bf16.msra.mxu2 %v3448_v44  ;;  %v415_v62 = vpack.c.bf16 %v3496_v59, %v3494_v58  ;;  %v409_v63 = vld [vmem:[%s3414_s26] sm:$0xff]  ;;  %v3545_v7 = vld [vmem:[%s3412_s29 + $0x8] sm:$0xff] }
  0x63   : > { %479 = vmatpush.bf16.msra.mxu1 %v3452_v45  ;;  %607 = vmatpush.bf16.msra.mxu3 %v3452_v45  ;;  %v3541_v0 = vld [vmem:[%s3412_s29] sm:$0xff]  ;;  %v411_v2 = vunpack.c.l.bf16 %v409_v63  ;;  %v412_v3 = vunpack.c.h.bf16 %v409_v63  ;;  %v410_v8 = vld [vmem:[%s3414_s26 + $0x8] sm:$0xff]  ;;  %s3558_s29 = sshll.u32 %s3187_s17, 4  ;;  %s3211_s17 = smov (!%p2714_p5), 32  }
  0x64   : > { %2830 = vset.pattern.permute.xlu2 %v3208_v1  ;;  %2831 = vset.pattern.permute.xlu0 %v3208_v1  ;;  %v413_v11 = vunpack.c.l.bf16 %v410_v8  ;;  %v414_v14 = vunpack.c.h.bf16 %v410_v8  ;;  %s408_s11 = ssub.s32 31, %s3558_s29  ;;  %v536_v1 = vstv %s3558_s29  ;;  %s575_s23 = sadd.s32 1, %s3558_s29 }
  0x65   : > { %540 = vperm.xlu2 %2830, %v3541_v0   ;;  %s576_s0 = ssub.s32 30, %s3558_s29  ;;  %s697_s9 = sadd.s32 2, %s3558_s29 }
  0x66   : > { %466 = vmatpush.bf16.msra.mxu0 %v3470_v51  ;;  %594 = vmatpush.bf16.msra.mxu2 %v3470_v51  ;;  %s698_s27 = ssub.s32 29, %s3558_s29  ;;  %s819_s4 = sadd.s32 3, %s3558_s29  ;;  %v786_v8 = vstv %s697_s9 }
  0x67   : > { %480 = vmatpush.bf16.msra.mxu1 %v3475_v52  ;;  %608 = vmatpush.bf16.msra.mxu3 %v3475_v52  ;;  %s820_s15 = ssub.s32 28, %s3558_s29  ;;  %s941_s5 = sadd.s32 4, %s3558_s29 }
  0x68   : > { %504 = vrot.lane.b32.xlu0 %v3501_v61, %s4756_s22  ;;  %s942_s10 = ssub.s32 27, %s3558_s29  ;;  %s1186_s9 = ssub.s32 25, %s3558_s29 }
  0x6a   : > { %467 = vmatpush.bf16.msra.mxu0 %v3492_v57  ;;  %595 = vmatpush.bf16.msra.mxu2 %v3492_v57 }
  0x6b   : > { %481 = vmatpush.bf16.msra.mxu1 %v3499_v60  ;;  %609 = vmatpush.bf16.msra.mxu3 %v3499_v60 }
  0x6d   : > { %2652 = vmatmul.msk.bf16.vlgmr.msra.gmra.mxu0 %vm456_vm1, %v415_v62  ;;  %543 = vperm.xlu2 %2830, %v3545_v7  }
  0x6e   : > { %714 = vmatpush.bf16.msrb.mxu0 %v3428_v37  ;;  %2653 = vmatmul.msk.bf16.vlgmr.msra.gmra.mxu1 %vm456_vm1, %v415_v62  ;;  %v3560_v62 = vand.u32 127, %v396_v56 }
  0x6f   : > { %728 = vmatpush.bf16.msrb.mxu1 %v3439_v41  ;;  %836 = vmatpush.bf16.msrb.mxu2 %v3428_v37 }
  0x70   : > { %850 = vmatpush.bf16.msrb.mxu3 %v3439_v41  ;;  %vm398_vm2 = vcmp.lt.s32.totalorder %v3560_v62, 32 }
  0x72   : > { %715 = vmatpush.bf16.msrb.mxu0 %v3448_v44 }
  0x73   : > { %729 = vmatpush.bf16.msrb.mxu1 %v3452_v45  ;;  %837 = vmatpush.bf16.msrb.mxu2 %v3448_v44 }
  0x74   : > { %851 = vmatpush.bf16.msrb.mxu3 %v3452_v45 }
  0x76   : > { %716 = vmatpush.bf16.msrb.mxu0 %v3470_v51 }
  0x77   : > { %730 = vmatpush.bf16.msrb.mxu1 %v3475_v52  ;;  %838 = vmatpush.bf16.msrb.mxu2 %v3470_v51 }
  0x78   : > { %852 = vmatpush.bf16.msrb.mxu3 %v3475_v52 }
  0x7a   : > { %717 = vmatpush.bf16.msrb.mxu0 %v3492_v57 }
  0x7b   : > { %731 = vmatpush.bf16.msrb.mxu1 %v3499_v60  ;;  %839 = vmatpush.bf16.msrb.mxu2 %v3492_v57 }
  0x7c   : > { %853 = vmatpush.bf16.msrb.mxu3 %v3499_v60 }
  0x7e   : > { %958 = vmatpush.bf16.msra.mxu0 %v3428_v37 }
  0x7f   : > { %972 = vmatpush.bf16.msra.mxu1 %v3439_v41 }
  0x82   : > { %959 = vmatpush.bf16.msra.mxu0 %v3448_v44 }
  0x83   : > { %973 = vmatpush.bf16.msra.mxu1 %v3452_v45 }
  0x86   : > { %960 = vmatpush.bf16.msra.mxu0 %v3470_v51 }
  0x87   : > { %974 = vmatpush.bf16.msra.mxu1 %v3475_v52 }
  0x8a   : > { %961 = vmatpush.bf16.msra.mxu0 %v3492_v57 }
  0x8b   : > { %975 = vmatpush.bf16.msra.mxu1 %v3499_v60 }
  0xbf   : > { %v3555_v55 = vpop.permute.xlu2 %540 }
  0xc7   : > { %v3563_v63 = vpop.permute.xlu2 %543 }
  0xd2   : > { %v503_v29 = vpop.permute.xlu0 %502 }
  0xda   : > { %v505_v36 = vpop.permute.xlu0 %504 }
  0xea   : > { %v469_v4 = vpop.f32.mrf.mxu0 }
  0xeb   : > { %v488_v5 = vadd.f32 %v469_v4, %v411_v2  ;;  %v483_v6 = vpop.f32.mrf.mxu1  ;;  %v537_v2 = vstv %s408_s11  ;;  %s1063_s11 = sadd.s32 5, %s3558_s29 }
  0xec   : > { %v489_v10 = vadd.f32 %v483_v6, %v412_v3  ;;  %v3569_v3 = vsel %vm398_vm2, %v536_v1, %v537_v2  ;;  %v665_v6 = vstv %s576_s0  ;;  %s1185_s0 = sadd.s32 6, %s3558_s29 }
  0xed   : > { %v492_v9 = vmul.f32 0.5, %v488_v5  ;;  %vm545_vm3 = vcmp.lt.s32.totalorder %v3569_v3, %v3555_v55  ;;  %v664_v5 = vstv %s575_s23  ;;  %s1064_s23 = ssub.s32 26, %s3558_s29 }
  0xee   : > { %v524_v28 = vmul.f32 0.5, %v489_v10 }
  0xef   : > { %2832 = vtanh.f32 %v492_v9  ;;  %v787_v9 = vstv %s698_s27  ;;  %s1307_s27 = sadd.s32 7, %s3558_s29 }
  0xf0   : > { %2834 = vtanh.f32 %v489_v10 }
  0xf2   : > { %v471_v12 = vpop.f32.mrf.mxu0 }
  0xf3   : > { %v490_v13 = vadd.f32 %v471_v12, %v413_v11  ;;  %v485_v15 = vpop.f32.mrf.mxu1  ;;  %v3589_v11 = vsel %vm398_vm2, %v664_v5, %v665_v6  ;;  %v3593_v12 = vsel %vm398_vm2, %v786_v8, %v787_v9 }
  0xf4   : > { %v491_v20 = vadd.f32 %v485_v15, %v414_v14  ;;  %vm668_vm4 = vcmp.lt.s32.totalorder %v3589_v11, %v3563_v63  ;;  %vm790_vm5 = vcmp.lt.s32.totalorder %v3593_v12, %v3563_v63  ;;  %v1030_v14 = vstv %s941_s5  ;;  %s1430_s5 = ssub.s32 23, %s3558_s29 }
  0xf5   : > { %v2833_v16 = vpop.eup %2832  ;;  %v493_v17 = vmul.f32 0.5, %v490_v13  ;;  %v908_v13 = vstv %s819_s4  ;;  %v1031_v15 = vstv %s942_s10  ;;  %s1308_s4 = ssub.s32 24, %s3558_s29  ;;  %s1551_s10 = sadd.s32 9, %s3558_s29 }
  0xf6   : > { %v496_v18 = vadd.f32 1.0, %v2833_v16  ;;  %v2835_v19 = vpop.eup %2834  ;;  %v525_v30 = vmul.f32 0.5, %v491_v20 }
  0xf7   : > { %2836 = vtanh.f32 %v493_v17  ;;  %v3612_v17 = vsel %vm398_vm2, %v1030_v14, %v1031_v15 }
  0xf8   : > { %v498_v21 = vmul.f32 0.5, %v496_v18  ;;  %2838 = vtanh.f32 %v491_v20  ;;  %v1152_v18 = vstv %s1063_s11  ;;  %vm1034_vm7 = vcmp.lt.s32.totalorder %v3612_v17, %v3563_v63  ;;  %s1552_s11 = ssub.s32 22, %s3558_s29 }
  0xf9   : > { %2840 = vtanh.f32 %v524_v28  ;;  %v1519_v28 = vstv %s1430_s5  ;;  %s2040_s5 = ssub.s32 18, %s3558_s29 }
  0xfa   : > { %v512_v22 = vmul.f32 %v2835_v19, %v498_v21  ;;  %v508_v31 = vmul.f32 %v503_v29, %v498_v21  ;;  %2842 = vtanh.f32 %v525_v30  ;;  %v1153_v19 = vstv %s1064_s23  ;;  %s1673_s23 = sadd.s32 10, %s3558_s29 }
  0xfb   : > { %v3623_v20 = vsel %vm398_vm2, %v1152_v18, %v1153_v19  ;;  %v1274_v21 = vstv %s1185_s0  ;;  %v1640_v29 = vstv %s1551_s10  ;;  %s1795_s0 = sadd.s32 11, %s3558_s29  ;;  %s2162_s10 = ssub.s32 17, %s3558_s29 }
  0xfc   : > { %516 = vrot.lane.b32.xlu1 %v512_v22, %s4756_s22  ;;  %v1275_v22 = vstv %s1186_s9  ;;  %vm1156_vm8 = vcmp.lt.s32.totalorder %v3623_v20, %v3563_v63  ;;  %s1796_s9 = ssub.s32 20, %s3558_s29 }
  0xfd   : > { %v2837_v23 = vpop.eup %2836 }
  0xfe   : > { %v497_v24 = vadd.f32 1.0, %v2837_v23  ;;  %v2839_v26 = vpop.eup %2838  ;;  %v1396_v23 = vstv %s1307_s27  ;;  %s1917_s27 = sadd.s32 12, %s3558_s29 }
  0xff   : > { %v2841_v33 = vpop.eup %2840 }
 0x100   : > { %v499_v25 = vmul.f32 0.5, %v497_v24  ;;  %v528_v35 = vadd.f32 1.0, %v2841_v33  ;;  %v2843_v39 = vpop.eup %2842  ;;  %v3631_v24 = vsel %vm398_vm2, %v1274_v21, %v1275_v22 }
 0x101   : > { %v529_v48 = vadd.f32 1.0, %v2843_v39  ;;  %vm1278_vm9 = vcmp.lt.s32.totalorder %v3631_v24, %v3563_v63  ;;  %v2006_v39 = vstv %s1917_s27 }
 0x102   : > { %v513_v27 = vmul.f32 %v2839_v26, %v499_v25  ;;  %v509_v38 = vmul.f32 %v505_v36, %v499_v25  ;;  %v530_v40 = vmul.f32 0.5, %v528_v35  ;;  %v1397_v25 = vstv %s1308_s4  ;;  %s1918_s4 = ssub.s32 19, %s3558_s29 }
 0x103   : > { %v531_v49 = vmul.f32 0.5, %v529_v48  ;;  %v3639_v26 = vsel %vm398_vm2, %v1396_v23, %v1397_v25  ;;  %v1884_v36 = vstv %s1795_s0  ;;  %v2655_v23 = vld [vmem:[%s3414_s26 + $0x18] sm:$0xff]  ;;  %s3212_s0 = smov (!%p2714_p5), 64  }
 0x104   : > { %518 = vrot.lane.b32.xlu1 %v513_v27, %s4756_s22  ;;  %vm1400_vm10 = vcmp.lt.s32.totalorder %v3639_v26, %v3563_v63 }
 0x16e   : > { %v517_v32 = vpop.permute.xlu1 %516 }
 0x16f   : > { %v522_v34 = vadd.f32 %v517_v32, %v508_v31  ;;  %v1641_v31 = vstv %s1552_s11  ;;  %v1762_v32 = vstv %s1673_s23  ;;  %s2283_s11 = sadd.s32 15, %s3558_s29  ;;  %s2284_s23 = ssub.s32 16, %s3558_s29 }
 0x170   : > { %v2373_v1 = vstv %s2284_s23 }
 0x171   : > { %2844 = vtanh.f32 %v522_v34  ;;  %559 = vrot.lane.b32.xlu2 %v522_v34, %s4756_s22  ;;  %v3655_v34 = vsel %vm398_vm2, %v1640_v29, %v1641_v31 }
 0x172   : > { %vm1644_vm12 = vcmp.lt.s32.totalorder %v3655_v34, %v3563_v63 }
 0x176   : > { %v519_v42 = vpop.permute.xlu1 %518 }
 0x177   : > { %v2845_v43 = vpop.eup %2844  ;;  %v523_v46 = vadd.f32 %v519_v42, %v509_v38  ;;  %v1885_v38 = vstv %s1796_s9 }
 0x178   : > { %v534_v47 = vmul.f32 %v2845_v43, %v530_v40  ;;  %v2007_v40 = vstv %s1918_s4  ;;  %v3672_v42 = vsel %vm398_vm2, %v1884_v36, %v1885_v38 }
 0x179   : > { %2846 = vtanh.f32 %v523_v46  ;;  %v3676_v43 = vsel %vm398_vm2, %v2006_v39, %v2007_v40 }
 0x17a   : > { %549 = vrot.lane.b32.xlu0 %v534_v47, %s4756_s22  ;;  %v2129_v47 = vstv %s2040_s5 }
 0x17f   : > { %v2847_v53 = vpop.eup %2846 }
 0x180   : > { %v535_v54 = vmul.f32 %v2847_v53, %v531_v49  ;;  %v2251_v53 = vstv %s2162_s10 }
 0x182   : > { %561 = vrot.lane.b32.xlu0 %v523_v46, %s4756_s22  ;;  %551 = vrot.lane.b32.xlu1 %v535_v54, %s4756_s22  ;;  %v2372_v54 = vstv %s2283_s11 }
 0x183   : > { %v3697_v2 = vsel %vm398_vm2, %v2372_v54, %v2373_v1 }
 0x184   : > { %vm2376_vm15 = vcmp.lt.s32.totalorder %v3697_v2, %v3563_v63 }
 0x1cb   : > { %v560_v4 = vpop.permute.xlu2 %559 }
 0x1cc   : > { %v3585_v10 = vsel %vm545_vm3, %v560_v4, %v3467_v50  ;;  %v909_v50 = vstv %s820_s15  ;;  %s1429_s15 = sadd.s32 8, %s3558_s29  ;;  %v406_v4 = vld [vmem:[#allocation5] sm:$0xff] }
 0x1cd   : > { %630 = vrot.lane.b32.xlu1 %v3585_v10, %s4756_s22  ;;  %v3608_v16 = vsel %vm398_vm2, %v908_v13, %v909_v50  ;;  %s1674_s22 = ssub.s32 21, %s3558_s29  ;;  %v1518_v27 = vstv %s1429_s15  ;;  %s2039_s15 = sadd.s32 13, %s3558_s29 }
 0x1ce   : > { %vm912_vm6 = vcmp.lt.s32.totalorder %v3608_v16, %v3563_v63  ;;  %v3647_v30 = vsel %vm398_vm2, %v1518_v27, %v1519_v28  ;;  %v1763_v33 = vstv %s1674_s22  ;;  %s2161_s22 = sadd.s32 14, %s3558_s29  ;;  %v2128_v46 = vstv %s2039_s15  ;;  %s4763_s29 = smov 64  }
 0x1cf   : > { %vm1522_vm11 = vcmp.lt.s32.totalorder %v3647_v30, %v3563_v63  ;;  %v3659_v35 = vsel %vm398_vm2, %v1762_v32, %v1763_v33  ;;  %v3685_v48 = vsel %vm398_vm2, %v2128_v46, %v2129_v47  ;;  %v2250_v49 = vstv %s2161_s22 }
 0x1d0   : > { %vm1766_vm13 = vcmp.lt.s32.totalorder %v3659_v35, %v3563_v63  ;;  %vm2132_vm0 = vcmp.lt.s32.totalorder %v3685_v48, %v3563_v63  ;;  %v3691_v56 = vsel %vm398_vm2, %v2250_v49, %v2251_v53  ;;  %vm546_vm2 = vcmp.lt.s32.totalorder %v3569_v3, %v3563_v63 }
 0x1d1   : > { %vm2254_vm14 = vcmp.lt.s32.totalorder %v3691_v56, %v3563_v63  ;;  %v582_v28 = vunpack.c.l.bf16 %v2655_v23  ;;  %v583_v32 = vunpack.c.h.bf16 %v2655_v23 }
 0x1ec   : > { %v550_v5 = vpop.permute.xlu0 %549 }
 0x1ed   : > { %v3704_v6 = vsel %vm545_vm3, %v550_v5, 0.0  ;;  %v571_v8 = vmax.f32 %v406_v4, %v550_v5  ;;  %v3719_v50 = vsel %vm545_vm3, %v550_v5, %v3494_v58 }
 0x1ef   : > { %v3709_v9 = vsel %vm545_vm3, %v571_v8, %v406_v4  ;;  %vm667_vm3 = vcmp.lt.s32.totalorder %v3589_v11, %v3555_v55  ;;  %v2658_v11 = vld [vmem:[%s3414_s26 + $0x20] sm:$0xff] }
 0x1f4   : > { %v562_v13 = vpop.permute.xlu0 %561  ;;  %v3711_v62 = vpop.permute.xlu1 %551 }
 0x1f5   : > { %v3726_v14 = vsel %vm546_vm2, %v3711_v62, %v3496_v59  ;;  %v3732_v15 = vsel %vm546_vm2, %v562_v13, %v3501_v61  ;;  %v2654_v59 = vld [vmem:[%s3414_s26 + $0x10] sm:$0xff] }
 0x1f6   : > { %632 = vrot.lane.b32.xlu2 %v3732_v15, %s4763_s29  ;;  %v584_v58 = vpack.c.bf16 %v3726_v14, %v3719_v50  ;;  %v580_v61 = vunpack.c.l.bf16 %v2654_v59  ;;  %v581_v22 = vunpack.c.h.bf16 %v2654_v59 }
 0x1f8   : > { %2656 = vmatmul.msk.bf16.vlgmr.msra.gmra.mxu2 %vm456_vm1, %v584_v58  ;;  %2657 = vmatmul.msk.bf16.vlgmr.msra.gmra.mxu3 %vm456_vm1, %v584_v58 }
 0x1f9   : > { %1080 = vmatpush.bf16.msra.mxu2 %v3428_v37  ;;  %1094 = vmatpush.bf16.msra.mxu3 %v3439_v41 }
 0x1fd   : > { %1081 = vmatpush.bf16.msra.mxu2 %v3448_v44  ;;  %1095 = vmatpush.bf16.msra.mxu3 %v3452_v45 }
 0x201   : > { %1082 = vmatpush.bf16.msra.mxu2 %v3470_v51  ;;  %1096 = vmatpush.bf16.msra.mxu3 %v3475_v52 }
 0x205   : > { %1083 = vmatpush.bf16.msra.mxu2 %v3492_v57  ;;  %1097 = vmatpush.bf16.msra.mxu3 %v3499_v60 }
 0x23f   : > { %v631_v13 = vpop.permute.xlu1 %630 }
 0x27b   : > { %v597_v18 = vpop.f32.mrf.mxu2  ;;  %v611_v19 = vpop.f32.mrf.mxu3 }
 0x27c   : > { %v616_v21 = vadd.f32 %v597_v18, %v580_v61  ;;  %v617_v27 = vadd.f32 %v611_v19, %v581_v22  ;;  %v633_v22 = vpop.permute.xlu2 %632 }
 0x27e   : > { %v620_v25 = vmul.f32 0.5, %v616_v21  ;;  %v652_v8 = vmul.f32 0.5, %v617_v27 }
 0x280   : > { %2848 = vtanh.f32 %v620_v25 }
 0x281   : > { %2850 = vtanh.f32 %v617_v27 }
 0x283   : > { %v599_v29 = vpop.f32.mrf.mxu2  ;;  %v613_v33 = vpop.f32.mrf.mxu3 }
 0x284   : > { %v618_v31 = vadd.f32 %v599_v29, %v582_v28  ;;  %v619_v40 = vadd.f32 %v613_v33, %v583_v32 }
 0x286   : > { %v2849_v36 = vpop.eup %2848  ;;  %v621_v38 = vmul.f32 0.5, %v618_v31  ;;  %v653_v58 = vmul.f32 0.5, %v619_v40 }
 0x287   : > { %v624_v39 = vadd.f32 1.0, %v2849_v36  ;;  %v2851_v47 = vpop.eup %2850 }
 0x288   : > { %2852 = vtanh.f32 %v621_v38 }
 0x289   : > { %v626_v46 = vmul.f32 0.5, %v624_v39  ;;  %2854 = vtanh.f32 %v619_v40  ;;  %v404_v40 = vld [vmem:[#allocation4] sm:$0xff] }
 0x28a   : > { %2856 = vtanh.f32 %v652_v8 }
 0x28b   : > { %v640_v49 = vmul.f32 %v2851_v47, %v626_v46  ;;  %v636_v59 = vmul.f32 %v631_v13, %v626_v46  ;;  %2858 = vtanh.f32 %v653_v58  ;;  %v569_v46 = vadd.f32 %v3704_v6, %v404_v40  ;;  %v405_v58 = vld [vmem:[#allocation4 + $0x8] sm:$0xff] }
 0x28d   : > { %644 = vrot.lane.b32.xlu0 %v640_v49, %s4763_s29 }
 0x28e   : > { %v2853_v53 = vpop.eup %2852 }
 0x28f   : > { %v625_v54 = vadd.f32 1.0, %v2853_v53  ;;  %v2855_v4 = vpop.eup %2854 }
 0x290   : > { %v2857_v18 = vpop.eup %2856 }
 0x291   : > { %v627_v1 = vmul.f32 0.5, %v625_v54  ;;  %v656_v21 = vadd.f32 1.0, %v2857_v18  ;;  %v2859_v25 = vpop.eup %2858 }
 0x292   : > { %v657_v33 = vadd.f32 1.0, %v2859_v25 }
 0x293   : > { %v641_v5 = vmul.f32 %v2855_v4, %v627_v1  ;;  %v637_v23 = vmul.f32 %v633_v22, %v627_v1  ;;  %v658_v28 = vmul.f32 0.5, %v656_v21 }
 0x294   : > { %v659_v36 = vmul.f32 0.5, %v657_v33 }
 0x295   : > { %646 = vrot.lane.b32.xlu1 %v641_v5, %s4763_s29 }
 0x2ff   : > { %v645_v61 = vpop.permute.xlu0 %644 }
 0x300   : > { %v650_v19 = vadd.f32 %v645_v61, %v636_v59 }
 0x302   : > { %2860 = vtanh.f32 %v650_v19  ;;  %681 = vrot.lane.b32.xlu1 %v650_v19, %s4763_s29 }
 0x307   : > { %v647_v29 = vpop.permute.xlu1 %646 }
 0x308   : > { %v2861_v31 = vpop.eup %2860  ;;  %v651_v32 = vadd.f32 %v647_v29, %v637_v23  ;;  %v703_v29 = vunpack.c.h.bf16 %v2658_v11 }
 0x309   : > { %v662_v27 = vmul.f32 %v2861_v31, %v658_v28  ;;  %v2659_v31 = vld [vmem:[%s3414_s26 + $0x28] sm:$0xff] }
 0x30a   : > { %2862 = vtanh.f32 %v651_v32  ;;  %v704_v33 = vunpack.c.l.bf16 %v2659_v31 }
 0x30b   : > { %671 = vrot.lane.b32.xlu2 %v662_v27, %s4763_s29 }
 0x310   : > { %v2863_v38 = vpop.eup %2862 }
 0x311   : > { %v663_v39 = vmul.f32 %v2863_v38, %v659_v36 }
 0x313   : > { %683 = vrot.lane.b32.xlu2 %v651_v32, %s4763_s29  ;;  %673 = vrot.lane.b32.xlu0 %v663_v39, %s4763_s29  ;;  %v705_v39 = vunpack.c.h.bf16 %v2659_v31 }
 0x365   : > { %v672_v47 = vpop.permute.xlu2 %671 }
 0x366   : > { %v689_v49 = vsel %vm667_vm3, %v672_v47, 0.0  ;;  %v693_v53 = vmax.f32 %v3709_v9, %v672_v47 }
 0x367   : > { %v3763_v54 = vadd.f32 %v689_v49, %v569_v46 }
 0x368   : > { %v3769_v1 = vsel %vm667_vm3, %v693_v53, %v3709_v9  ;;  %v407_v9 = vld [vmem:[#allocation5 + $0x8] sm:$0xff] }
 0x369   : > { %v572_v13 = vmax.f32 %v407_v9, %v3711_v62 }
 0x36b   : > { %v574_v61 = vsel %vm546_vm2, %v572_v13, %v407_v9 }
 0x36d   : > { %v684_v4 = vpop.permute.xlu2 %683 }
 0x36e   : > { %v3775_v6 = vsel %vm668_vm4, %v684_v4, %v3732_v15  ;;  %v568_v15 = vsel %vm546_vm2, %v3711_v62, 0.0  ;;  %vm4764_vm2 = vcmp.lt.s32.totalorder %v3672_v42, %v3563_v63 }
 0x36f   : > { %754 = vrot.lane.b32.xlu1 %v3775_v6, %s4763_s29  ;;  %v570_v59 = vadd.f32 %v568_v15, %v405_v58 }
 0x374   : > { %v682_v5 = vpop.permute.xlu1 %681 }
 0x375   : > { %v3783_v8 = vsel %vm667_vm3, %v682_v5, %v3585_v10  ;;  %v3799_v10 = vsel %vm667_vm3, %v672_v47, %v3719_v50  ;;  %vm4765_vm3 = vmmov %vm4764_vm2 }
 0x376   : > { %752 = vrot.lane.b32.xlu0 %v3783_v8, %s4763_s29 }
 0x385   : > { %v674_v18 = vpop.permute.xlu0 %673 }
 0x386   : > { %v3805_v19 = vsel %vm668_vm4, %v674_v18, %v3726_v14  ;;  %v690_v62 = vsel %vm668_vm4, %v674_v18, 0.0  ;;  %v694_v3 = vmax.f32 %v574_v61, %v674_v18  ;;  %v702_v14 = vunpack.c.l.bf16 %v2658_v11 }
 0x387   : > { %v3810_v21 = vadd.f32 %v690_v62, %v570_v59  ;;  %v706_v22 = vpack.c.bf16 %v3805_v19, %v3799_v10 }
 0x388   : > { %v3817_v50 = vsel %vm668_vm4, %v694_v3, %v574_v61  ;;  %vm789_vm4 = vcmp.lt.s32.totalorder %v3593_v12, %v3555_v55 }
 0x389   : > { %2660 = vmatmul.msk.bf16.vlgmr.msrb.gmra.mxu0 %vm456_vm1, %v706_v22  ;;  %2661 = vmatmul.msk.bf16.vlgmr.msrb.gmra.mxu1 %vm456_vm1, %v706_v22 }
 0x38a   : > { %1202 = vmatpush.bf16.msrb.mxu0 %v3428_v37  ;;  %1216 = vmatpush.bf16.msrb.mxu1 %v3439_v41 }
 0x38e   : > { %1203 = vmatpush.bf16.msrb.mxu0 %v3448_v44  ;;  %1217 = vmatpush.bf16.msrb.mxu1 %v3452_v45 }
 0x392   : > { %1204 = vmatpush.bf16.msrb.mxu0 %v3470_v51  ;;  %1218 = vmatpush.bf16.msrb.mxu1 %v3475_v52 }
 0x396   : > { %1205 = vmatpush.bf16.msrb.mxu0 %v3492_v57  ;;  %1219 = vmatpush.bf16.msrb.mxu1 %v3499_v60 }
 0x3e8   : > { %v753_v62 = vpop.permute.xlu0 %752 }
 0x406   : > { %v719_v23 = vpop.f32.mrf.mxu0  ;;  %v733_v25 = vpop.f32.mrf.mxu1 }
 0x407   : > { %v738_v28 = vadd.f32 %v719_v23, %v702_v14  ;;  %v739_v27 = vadd.f32 %v733_v25, %v703_v29 }
 0x409   : > { %v742_v32 = vmul.f32 0.5, %v738_v28  ;;  %v774_v18 = vmul.f32 0.5, %v739_v27 }
 0x40b   : > { %2864 = vtanh.f32 %v742_v32  ;;  %v755_v32 = vpop.permute.xlu1 %754 }
 0x40c   : > { %2866 = vtanh.f32 %v739_v27 }
 0x40e   : > { %v721_v36 = vpop.f32.mrf.mxu0  ;;  %v735_v40 = vpop.f32.mrf.mxu1 }
 0x40f   : > { %v740_v38 = vadd.f32 %v721_v36, %v704_v33  ;;  %v741_v53 = vadd.f32 %v735_v40, %v705_v39 }
 0x411   : > { %v2865_v46 = vpop.eup %2864  ;;  %v743_v47 = vmul.f32 0.5, %v740_v38  ;;  %v775_v31 = vmul.f32 0.5, %v741_v53 }
 0x412   : > { %v746_v49 = vadd.f32 1.0, %v2865_v46  ;;  %v2867_v5 = vpop.eup %2866 }
 0x413   : > { %2868 = vtanh.f32 %v743_v47 }
 0x414   : > { %v748_v4 = vmul.f32 0.5, %v746_v49  ;;  %2870 = vtanh.f32 %v741_v53 }
 0x415   : > { %2872 = vtanh.f32 %v774_v18 }
 0x416   : > { %v762_v9 = vmul.f32 %v2867_v5, %v748_v4  ;;  %v758_v3 = vmul.f32 %v753_v62, %v748_v4 }
 0x418   : > { %766 = vrot.lane.b32.xlu2 %v762_v9, %s4763_s29 }
 0x419   : > { %v2869_v13 = vpop.eup %2868 }
 0x41a   : > { %v747_v58 = vadd.f32 1.0, %v2869_v13  ;;  %v2871_v59 = vpop.eup %2870 }
 0x41b   : > { %v2873_v11 = vpop.eup %2872 }
 0x41c   : > { %v749_v15 = vmul.f32 0.5, %v747_v58  ;;  %v778_v23 = vadd.f32 1.0, %v2873_v11 }
 0x41e   : > { %v763_v61 = vmul.f32 %v2871_v59, %v749_v15  ;;  %v780_v25 = vmul.f32 0.5, %v778_v23  ;;  %v759_v33 = vmul.f32 %v755_v32, %v749_v15  ;;  %v2663_v23 = vld [vmem:[%s3414_s26 + $0x38] sm:$0xff] }
 0x41f   : > { %v826_v12 = vunpack.c.l.bf16 %v2663_v23 }
 0x420   : > { %768 = vrot.lane.b32.xlu0 %v763_v61, %s4763_s29 }
 0x472   : > { %v767_v22 = vpop.permute.xlu2 %766 }
 0x473   : > { %v772_v14 = vadd.f32 %v767_v22, %v758_v3 }
 0x475   : > { %2874 = vtanh.f32 %v772_v14  ;;  %803 = vrot.lane.b32.xlu0 %v772_v14, %s4763_s29 }
 0x476   : > { %2876 = vtanh.f32 %v775_v31  ;;  %v827_v31 = vunpack.c.h.bf16 %v2663_v23 }
 0x47b   : > { %v2875_v28 = vpop.eup %2874 }
 0x47c   : > { %v784_v29 = vmul.f32 %v2875_v28, %v780_v25  ;;  %v2877_v36 = vpop.eup %2876 }
 0x47d   : > { %v779_v39 = vadd.f32 1.0, %v2877_v36 }
 0x47e   : > { %793 = vrot.lane.b32.xlu1 %v784_v29, %s4763_s29 }
 0x47f   : > { %v781_v40 = vmul.f32 0.5, %v779_v39 }
 0x492   : > { %v769_v27 = vpop.permute.xlu0 %768 }
 0x493   : > { %v773_v38 = vadd.f32 %v769_v27, %v759_v33 }
 0x495   : > { %2878 = vtanh.f32 %v773_v38  ;;  %805 = vrot.lane.b32.xlu1 %v773_v38, %s4763_s29 }
 0x49b   : > { %v2879_v46 = vpop.eup %2878 }
 0x49c   : > { %v785_v47 = vmul.f32 %v2879_v46, %v781_v40 }
 0x49e   : > { %795 = vrot.lane.b32.xlu2 %v785_v47, %s4763_s29 }
 0x4e7   : > { %v804_v49 = vpop.permute.xlu0 %803 }
 0x4e8   : > { %v3840_v53 = vsel %vm789_vm4, %v804_v49, %v3783_v8 }
 0x4e9   : > { %874 = vrot.lane.b32.xlu2 %v3840_v53, %s4763_s29 }
 0x4f0   : > { %v794_v4 = vpop.permute.xlu1 %793 }
 0x4f1   : > { %v811_v5 = vsel %vm789_vm4, %v794_v4, 0.0  ;;  %v815_v9 = vmax.f32 %v3769_v1, %v794_v4  ;;  %v3852_v59 = vsel %vm789_vm4, %v794_v4, %v3799_v10 }
 0x4f2   : > { %v3846_v13 = vadd.f32 %v811_v5, %v3763_v54 }
 0x4f3   : > { %v3849_v58 = vsel %vm789_vm4, %v815_v9, %v3769_v1  ;;  %vm4766_vm4 = vmmov %vm4764_vm2 }
 0x4f8   : > { %v796_v15 = vpop.permute.xlu2 %795 }
 0x4f9   : > { %v3858_v8 = vsel %vm790_vm5, %v796_v15, %v3805_v19  ;;  %v812_v61 = vsel %vm790_vm5, %v796_v15, 0.0  ;;  %v816_v54 = vmax.f32 %v3817_v50, %v796_v15 }
 0x4fa   : > { %v3865_v18 = vadd.f32 %v812_v61, %v3810_v21  ;;  %v828_v1 = vpack.c.bf16 %v3858_v8, %v3852_v59 }
 0x4fb   : > { %v3873_v10 = vsel %vm790_vm5, %v816_v54, %v3817_v50  ;;  %v2662_v50 = vld [vmem:[%s3414_s26 + $0x30] sm:$0xff] }
 0x4fc   : > { %2664 = vmatmul.msk.bf16.vlgmr.msrb.gmra.mxu2 %vm456_vm1, %v828_v1  ;;  %2665 = vmatmul.msk.bf16.vlgmr.msrb.gmra.mxu3 %vm456_vm1, %v828_v1  ;;  %v824_v62 = vunpack.c.l.bf16 %v2662_v50  ;;  %v825_v14 = vunpack.c.h.bf16 %v2662_v50 }
 0x4fd   : > { %1324 = vmatpush.bf16.msrb.mxu2 %v3428_v37  ;;  %1338 = vmatpush.bf16.msrb.mxu3 %v3439_v41 }
 0x501   : > { %1325 = vmatpush.bf16.msrb.mxu2 %v3448_v44  ;;  %1339 = vmatpush.bf16.msrb.mxu3 %v3452_v45 }
 0x505   : > { %1326 = vmatpush.bf16.msrb.mxu2 %v3470_v51  ;;  %1340 = vmatpush.bf16.msrb.mxu3 %v3475_v52 }
 0x507   : > { %v806_v19 = vpop.permute.xlu1 %805 }
 0x508   : > { %v3887_v21 = vsel %vm790_vm5, %v806_v19, %v3775_v6  ;;  %vm911_vm5 = vcmp.lt.s32.totalorder %v3608_v16, %v3555_v55 }
 0x509   : > { %876 = vrot.lane.b32.xlu0 %v3887_v21, %s4763_s29  ;;  %1327 = vmatpush.bf16.msrb.mxu2 %v3492_v57 }
 0x50a   : > { %1341 = vmatpush.bf16.msrb.mxu3 %v3499_v60 }
 0x543   : > { %v875_v61 = vpop.permute.xlu2 %874 }
 0x57b   : > { %v877_v54 = vpop.permute.xlu0 %876 }
 0x57f   : > { %v841_v3 = vpop.f32.mrf.mxu2  ;;  %v855_v22 = vpop.f32.mrf.mxu3 }
 0x580   : > { %v860_v11 = vadd.f32 %v841_v3, %v824_v62  ;;  %v861_v28 = vadd.f32 %v855_v22, %v825_v14 }
 0x582   : > { %v864_v25 = vmul.f32 0.5, %v860_v11  ;;  %v896_v22 = vmul.f32 0.5, %v861_v28 }
 0x584   : > { %2880 = vtanh.f32 %v864_v25 }
 0x585   : > { %2882 = vtanh.f32 %v861_v28 }
 0x587   : > { %v843_v6 = vpop.f32.mrf.mxu2  ;;  %v857_v32 = vpop.f32.mrf.mxu3 }
 0x588   : > { %v862_v29 = vadd.f32 %v843_v6, %v826_v12  ;;  %v863_v38 = vadd.f32 %v857_v32, %v827_v31 }
 0x58a   : > { %v2881_v33 = vpop.eup %2880  ;;  %v865_v27 = vmul.f32 0.5, %v862_v29  ;;  %v897_v15 = vmul.f32 0.5, %v863_v38 }
 0x58b   : > { %v868_v36 = vadd.f32 1.0, %v2881_v33  ;;  %v2883_v40 = vpop.eup %2882 }
 0x58c   : > { %2884 = vtanh.f32 %v865_v27 }
 0x58d   : > { %v870_v39 = vmul.f32 0.5, %v868_v36  ;;  %2886 = vtanh.f32 %v863_v38 }
 0x58e   : > { %2888 = vtanh.f32 %v897_v15 }
 0x58f   : > { %v884_v46 = vmul.f32 %v2883_v40, %v870_v39  ;;  %v880_v25 = vmul.f32 %v875_v61, %v870_v39 }
 0x591   : > { %888 = vrot.lane.b32.xlu1 %v884_v46, %s4763_s29 }
 0x592   : > { %v2885_v47 = vpop.eup %2884 }
 0x593   : > { %v869_v49 = vadd.f32 1.0, %v2885_v47  ;;  %v2887_v5 = vpop.eup %2886 }
 0x594   : > { %v2889_v50 = vpop.eup %2888 }
 0x595   : > { %v871_v4 = vmul.f32 0.5, %v869_v49  ;;  %v901_v3 = vadd.f32 1.0, %v2889_v50 }
 0x597   : > { %v885_v9 = vmul.f32 %v2887_v5, %v871_v4  ;;  %v881_v1 = vmul.f32 %v877_v54, %v871_v4  ;;  %v903_v11 = vmul.f32 0.5, %v901_v3 }
 0x599   : > { %890 = vrot.lane.b32.xlu2 %v885_v9, %s4763_s29 }
 0x5f3   : > { %v891_v19 = vpop.permute.xlu2 %890 }
 0x5f4   : > { %v895_v62 = vadd.f32 %v891_v19, %v881_v1  ;;  %v2667_v1 = vld [vmem:[%s3414_s26 + $0x48] sm:$0xff] }
 0x5f6   : > { %2890 = vtanh.f32 %v895_v62 }
 0x5f7   : > { %2892 = vtanh.f32 %v896_v22 }
 0x5fc   : > { %v2891_v14 = vpop.eup %2890 }
 0x5fd   : > { %v907_v23 = vmul.f32 %v2891_v14, %v903_v11  ;;  %v2893_v6 = vpop.eup %2892  ;;  %v949_v11 = vunpack.c.h.bf16 %v2667_v1 }
 0x5fe   : > { %v900_v31 = vadd.f32 1.0, %v2893_v6 }
 0x5ff   : > { %917 = vrot.lane.b32.xlu1 %v907_v23, %s4763_s29 }
 0x600   : > { %v902_v32 = vmul.f32 0.5, %v900_v31 }
 0x603   : > { %v889_v12 = vpop.permute.xlu1 %888 }
 0x604   : > { %v894_v29 = vadd.f32 %v889_v12, %v880_v25 }
 0x606   : > { %2894 = vtanh.f32 %v894_v29  ;;  %925 = vrot.lane.b32.xlu2 %v894_v29, %s4763_s29 }
 0x60c   : > { %v2895_v33 = vpop.eup %2894 }
 0x60d   : > { %v906_v27 = vmul.f32 %v2895_v33, %v902_v32 }
 0x60f   : > { %915 = vrot.lane.b32.xlu0 %v906_v27, %s4763_s29 }
 0x617   : > { %927 = vrot.lane.b32.xlu0 %v895_v62, %s4763_s29  ;;  %v948_v62 = vunpack.c.l.bf16 %v2667_v1 }
 0x660   : > { %v926_v28 = vpop.permute.xlu2 %925 }
 0x661   : > { %v3904_v36 = vsel %vm911_vm5, %v926_v28, %v3840_v53 }
 0x662   : > { %996 = vrot.lane.b32.xlu1 %v3904_v36, %s4763_s29 }
 0x671   : > { %v918_v38 = vpop.permute.xlu1 %917 }
 0x672   : > { %v934_v39 = vsel %vm912_vm6, %v918_v38, 0.0  ;;  %v938_v40 = vmax.f32 %v3873_v10, %v918_v38  ;;  %v3925_v49 = vsel %vm912_vm6, %v918_v38, %v3858_v8 }
 0x673   : > { %v3913_v46 = vadd.f32 %v934_v39, %v3865_v18 }
 0x674   : > { %v3919_v47 = vsel %vm912_vm6, %v938_v40, %v3873_v10 }
 0x681   : > { %v916_v53 = vpop.permute.xlu0 %915 }
 0x682   : > { %v3928_v4 = vsel %vm911_vm5, %v916_v53, %v3852_v59  ;;  %v933_v5 = vsel %vm911_vm5, %v916_v53, 0.0  ;;  %v937_v18 = vmax.f32 %v3849_v58, %v916_v53 }
 0x683   : > { %v3932_v9 = vadd.f32 %v933_v5, %v3846_v13  ;;  %v950_v10 = vpack.c.bf16 %v3925_v49, %v3928_v4 }
 0x684   : > { %v3937_v15 = vsel %vm911_vm5, %v937_v18, %v3849_v58  ;;  %v2666_v58 = vld [vmem:[%s3414_s26 + $0x40] sm:$0xff]  ;;  %vm4767_vm5 = vmmov %vm4764_vm2 }
 0x685   : > { %2668 = vmatmul.msk.bf16.vlgmr.msra.gmra.mxu0 %vm456_vm1, %v950_v10  ;;  %2669 = vmatmul.msk.bf16.vlgmr.msra.gmra.mxu1 %vm456_vm1, %v950_v10  ;;  %v946_v8 = vunpack.c.l.bf16 %v2666_v58  ;;  %v947_v54 = vunpack.c.h.bf16 %v2666_v58 }
 0x686   : > { %1446 = vmatpush.bf16.msra.mxu0 %v3428_v37  ;;  %1460 = vmatpush.bf16.msra.mxu1 %v3439_v41 }
 0x689   : > { %v928_v59 = vpop.permute.xlu0 %927 }
 0x68a   : > { %v3947_v13 = vsel %vm912_vm6, %v928_v59, %v3887_v21  ;;  %1447 = vmatpush.bf16.msra.mxu0 %v3448_v44  ;;  %1461 = vmatpush.bf16.msra.mxu1 %v3452_v45  ;;  %vm1033_vm6 = vcmp.lt.s32.totalorder %v3612_v17, %v3555_v55  ;;  %v2670_v17 = vld [vmem:[%s3414_s26 + $0x50] sm:$0xff] }
 0x68b   : > { %998 = vrot.lane.b32.xlu2 %v3947_v13, %s4763_s29 }
 0x68e   : > { %1448 = vmatpush.bf16.msra.mxu0 %v3470_v51  ;;  %1462 = vmatpush.bf16.msra.mxu1 %v3475_v52 }
 0x692   : > { %1449 = vmatpush.bf16.msra.mxu0 %v3492_v57  ;;  %1463 = vmatpush.bf16.msra.mxu1 %v3499_v60 }
 0x6d4   : > { %v997_v53 = vpop.permute.xlu1 %996 }
 0x702   : > { %v963_v16 = vpop.f32.mrf.mxu0  ;;  %v977_v21 = vpop.f32.mrf.mxu1 }
 0x703   : > { %v982_v61 = vadd.f32 %v963_v16, %v946_v8  ;;  %v983_v50 = vadd.f32 %v977_v21, %v947_v54  ;;  %v999_v16 = vpop.permute.xlu2 %998 }
 0x705   : > { %v986_v19 = vmul.f32 0.5, %v982_v61  ;;  %v1018_v40 = vmul.f32 0.5, %v983_v50 }
 0x707   : > { %2896 = vtanh.f32 %v986_v19 }
 0x708   : > { %2898 = vtanh.f32 %v983_v50 }
 0x70a   : > { %v965_v3 = vpop.f32.mrf.mxu0  ;;  %v979_v14 = vpop.f32.mrf.mxu1 }
 0x70b   : > { %v984_v22 = vadd.f32 %v965_v3, %v948_v62  ;;  %v985_v6 = vadd.f32 %v979_v14, %v949_v11 }
 0x70d   : > { %v2897_v23 = vpop.eup %2896  ;;  %v987_v25 = vmul.f32 0.5, %v984_v22  ;;  %v1019_v5 = vmul.f32 0.5, %v985_v6 }
 0x70e   : > { %v990_v12 = vadd.f32 1.0, %v2897_v23  ;;  %v2899_v31 = vpop.eup %2898 }
 0x70f   : > { %2900 = vtanh.f32 %v987_v25 }
 0x710   : > { %v992_v29 = vmul.f32 0.5, %v990_v12  ;;  %2902 = vtanh.f32 %v985_v6 }
 0x711   : > { %2904 = vtanh.f32 %v1018_v40 }
 0x712   : > { %v1006_v32 = vmul.f32 %v2899_v31, %v992_v29  ;;  %v1002_v18 = vmul.f32 %v997_v53, %v992_v29  ;;  %2906 = vtanh.f32 %v1019_v5  ;;  %v1069_v53 = vunpack.c.h.bf16 %v2670_v17  ;;  %v2671_v5 = vld [vmem:[%s3414_s26 + $0x58] sm:$0xff] }
 0x714   : > { %1010 = vrot.lane.b32.xlu0 %v1006_v32, %s4763_s29 }
 0x715   : > { %v2901_v33 = vpop.eup %2900 }
 0x716   : > { %v991_v27 = vadd.f32 1.0, %v2901_v33  ;;  %v2903_v38 = vpop.eup %2902 }
 0x717   : > { %v2905_v59 = vpop.eup %2904 }
 0x718   : > { %v993_v28 = vmul.f32 0.5, %v991_v27  ;;  %v1022_v8 = vadd.f32 1.0, %v2905_v59  ;;  %v2907_v61 = vpop.eup %2906  ;;  %v1070_v59 = vunpack.c.l.bf16 %v2671_v5 }
 0x719   : > { %v1023_v3 = vadd.f32 1.0, %v2907_v61 }
 0x71a   : > { %v1007_v39 = vmul.f32 %v2903_v38, %v993_v28  ;;  %v1003_v21 = vmul.f32 %v999_v16, %v993_v28  ;;  %v1024_v54 = vmul.f32 0.5, %v1022_v8  ;;  %v1071_v16 = vunpack.c.h.bf16 %v2671_v5 }
 0x71b   : > { %v1025_v22 = vmul.f32 0.5, %v1023_v3 }
 0x71c   : > { %1012 = vrot.lane.b32.xlu1 %v1007_v39, %s4763_s29 }
 0x786   : > { %v1011_v10 = vpop.permute.xlu0 %1010 }
 0x787   : > { %v1016_v58 = vadd.f32 %v1011_v10, %v1002_v18 }
 0x789   : > { %2908 = vtanh.f32 %v1016_v58  ;;  %1047 = vrot.lane.b32.xlu1 %v1016_v58, %s4763_s29 }
 0x78e   : > { %v1013_v1 = vpop.permute.xlu1 %1012 }
 0x78f   : > { %v2909_v19 = vpop.eup %2908  ;;  %v1017_v62 = vadd.f32 %v1013_v1, %v1003_v21 }
 0x790   : > { %v1028_v50 = vmul.f32 %v2909_v19, %v1024_v54 }
 0x791   : > { %2910 = vtanh.f32 %v1017_v62 }
 0x792   : > { %1037 = vrot.lane.b32.xlu2 %v1028_v50, %s4763_s29 }
 0x797   : > { %v2911_v11 = vpop.eup %2910 }
 0x798   : > { %v1029_v14 = vmul.f32 %v2911_v11, %v1025_v22 }
 0x79a   : > { %1049 = vrot.lane.b32.xlu2 %v1017_v62, %s4763_s29  ;;  %1039 = vrot.lane.b32.xlu0 %v1029_v14, %s4763_s29 }
 0x7ec   : > { %v1038_v23 = vpop.permute.xlu2 %1037 }
 0x7ed   : > { %v1055_v25 = vsel %vm1033_vm6, %v1038_v23, 0.0  ;;  %v1059_v12 = vmax.f32 %v3937_v15, %v1038_v23 }
 0x7ee   : > { %v3969_v6 = vadd.f32 %v1055_v25, %v3932_v9 }
 0x7ef   : > { %v3972_v29 = vsel %vm1033_vm6, %v1059_v12, %v3937_v15  ;;  %v3988_v15 = vsel %vm1033_vm6, %v1038_v23, %v3928_v4 }
 0x7f4   : > { %v1050_v31 = vpop.permute.xlu2 %1049 }
 0x7f5   : > { %v3978_v32 = vsel %vm1034_vm7, %v1050_v31, %v3947_v13 }
 0x7f6   : > { %1120 = vrot.lane.b32.xlu1 %v3978_v32, %s4763_s29 }
 0x7fb   : > { %v1048_v33 = vpop.permute.xlu1 %1047 }
 0x7fc   : > { %v3983_v27 = vsel %vm1033_vm6, %v1048_v33, %v3904_v36  ;;  %vm2009_vm6 = vcmp.lt.s32.totalorder %v3676_v43, %v3555_v55 }
 0x7fd   : > { %1118 = vrot.lane.b32.xlu0 %v3983_v27, %s4763_s29 }
 0x80c   : > { %v1040_v9 = vpop.permute.xlu0 %1039 }
 0x80d   : > { %v3994_v13 = vsel %vm1034_vm7, %v1040_v9, %v3925_v49  ;;  %v1056_v28 = vsel %vm1034_vm7, %v1040_v9, 0.0  ;;  %v1060_v36 = vmax.f32 %v3919_v47, %v1040_v9 }
 0x80e   : > { %v4001_v38 = vadd.f32 %v1056_v28, %v3913_v46  ;;  %v1072_v4 = vpack.c.bf16 %v3994_v13, %v3988_v15  ;;  %v1068_v46 = vunpack.c.l.bf16 %v2670_v17 }
 0x80f   : > { %v4009_v39 = vsel %vm1034_vm7, %v1060_v36, %v3919_v47  ;;  %vm1155_vm7 = vcmp.lt.s32.totalorder %v3623_v20, %v3555_v55 }
 0x810   : > { %2672 = vmatmul.msk.bf16.vlgmr.msra.gmra.mxu2 %vm456_vm1, %v1072_v4  ;;  %2673 = vmatmul.msk.bf16.vlgmr.msra.gmra.mxu3 %vm456_vm1, %v1072_v4 }
 0x811   : > { %1568 = vmatpush.bf16.msra.mxu2 %v3428_v37  ;;  %1582 = vmatpush.bf16.msra.mxu3 %v3439_v41 }
 0x815   : > { %1569 = vmatpush.bf16.msra.mxu2 %v3448_v44  ;;  %1583 = vmatpush.bf16.msra.mxu3 %v3452_v45 }
 0x819   : > { %1570 = vmatpush.bf16.msra.mxu2 %v3470_v51  ;;  %1584 = vmatpush.bf16.msra.mxu3 %v3475_v52 }
 0x81d   : > { %1571 = vmatpush.bf16.msra.mxu2 %v3492_v57  ;;  %1585 = vmatpush.bf16.msra.mxu3 %v3499_v60 }
 0x86f   : > { %v1119_v31 = vpop.permute.xlu0 %1118 }
 0x893   : > { %v1085_v47 = vpop.f32.mrf.mxu2  ;;  %v1099_v49 = vpop.f32.mrf.mxu3 }
 0x894   : > { %v1104_v40 = vadd.f32 %v1085_v47, %v1068_v46  ;;  %v1105_v10 = vadd.f32 %v1099_v49, %v1069_v53 }
 0x896   : > { %v1108_v18 = vmul.f32 0.5, %v1104_v40  ;;  %v1140_v12 = vmul.f32 0.5, %v1105_v10  ;;  %v1121_v40 = vpop.permute.xlu1 %1120 }
 0x898   : > { %2912 = vtanh.f32 %v1108_v18 }
 0x899   : > { %2914 = vtanh.f32 %v1105_v10 }
 0x89b   : > { %v1087_v58 = vpop.f32.mrf.mxu2  ;;  %v1101_v21 = vpop.f32.mrf.mxu3 }
 0x89c   : > { %v1106_v8 = vadd.f32 %v1087_v58, %v1070_v59  ;;  %v1107_v19 = vadd.f32 %v1101_v21, %v1071_v16 }
 0x89e   : > { %v2913_v61 = vpop.eup %2912  ;;  %v1109_v54 = vmul.f32 0.5, %v1106_v8  ;;  %v1141_v49 = vmul.f32 0.5, %v1107_v19 }
 0x89f   : > { %v1112_v1 = vadd.f32 1.0, %v2913_v61  ;;  %v2915_v50 = vpop.eup %2914 }
 0x8a0   : > { %2916 = vtanh.f32 %v1109_v54 }
 0x8a1   : > { %v1114_v62 = vmul.f32 0.5, %v1112_v1  ;;  %2918 = vtanh.f32 %v1107_v19 }
 0x8a2   : > { %2920 = vtanh.f32 %v1140_v12 }
 0x8a3   : > { %v1128_v3 = vmul.f32 %v2915_v50, %v1114_v62  ;;  %v1124_v33 = vmul.f32 %v1119_v31, %v1114_v62 }
 0x8a5   : > { %1132 = vrot.lane.b32.xlu2 %v1128_v3, %s4763_s29 }
 0x8a6   : > { %v2917_v22 = vpop.eup %2916 }
 0x8a7   : > { %v1113_v11 = vadd.f32 1.0, %v2917_v22  ;;  %v2919_v23 = vpop.eup %2918 }
 0x8a8   : > { %v2921_v28 = vpop.eup %2920 }
 0x8a9   : > { %v1115_v14 = vmul.f32 0.5, %v1113_v11  ;;  %v1144_v4 = vadd.f32 1.0, %v2921_v28 }
 0x8ab   : > { %v1129_v25 = vmul.f32 %v2919_v23, %v1115_v14  ;;  %v1146_v17 = vmul.f32 0.5, %v1144_v4  ;;  %v1125_v53 = vmul.f32 %v1121_v40, %v1115_v14 }
 0x8ad   : > { %1134 = vrot.lane.b32.xlu0 %v1129_v25, %s4763_s29 }
 0x8ff   : > { %v1133_v9 = vpop.permute.xlu2 %1132 }
 0x900   : > { %v1138_v36 = vadd.f32 %v1133_v9, %v1124_v33  ;;  %v2675_v9 = vld [vmem:[%s3414_s26 + $0x68] sm:$0xff] }
 0x901   : > { %v1192_v20 = vunpack.c.l.bf16 %v2675_v9 }
 0x902   : > { %2922 = vtanh.f32 %v1138_v36  ;;  %1169 = vrot.lane.b32.xlu0 %v1138_v36, %s4763_s29 }
 0x903   : > { %2924 = vtanh.f32 %v1141_v49 }
 0x908   : > { %v2923_v46 = vpop.eup %2922 }
 0x909   : > { %v1150_v47 = vmul.f32 %v2923_v46, %v1146_v17  ;;  %v2925_v18 = vpop.eup %2924  ;;  %v1193_v17 = vunpack.c.h.bf16 %v2675_v9 }
 0x90a   : > { %v1145_v59 = vadd.f32 1.0, %v2925_v18 }
 0x90b   : > { %1159 = vrot.lane.b32.xlu1 %v1150_v47, %s4763_s29 }
 0x90c   : > { %v1147_v58 = vmul.f32 0.5, %v1145_v59 }
 0x91f   : > { %v1135_v5 = vpop.permute.xlu0 %1134 }
 0x920   : > { %v1139_v10 = vadd.f32 %v1135_v5, %v1125_v53 }
 0x922   : > { %2926 = vtanh.f32 %v1139_v10  ;;  %1171 = vrot.lane.b32.xlu1 %v1139_v10, %s4763_s29 }
 0x928   : > { %v2927_v8 = vpop.eup %2926 }
 0x929   : > { %v1151_v16 = vmul.f32 %v2927_v8, %v1147_v58 }
 0x92b   : > { %1161 = vrot.lane.b32.xlu2 %v1151_v16, %s4763_s29 }
 0x974   : > { %v1170_v21 = vpop.permute.xlu0 %1169 }
 0x975   : > { %v4032_v61 = vsel %vm1155_vm7, %v1170_v21, %v3983_v27 }
 0x976   : > { %1240 = vrot.lane.b32.xlu2 %v4032_v61, %s4763_s29 }
 0x97d   : > { %v1160_v54 = vpop.permute.xlu1 %1159 }
 0x97e   : > { %v1177_v1 = vsel %vm1155_vm7, %v1160_v54, 0.0  ;;  %v1181_v19 = vmax.f32 %v3972_v29, %v1160_v54  ;;  %v4044_v22 = vsel %vm1155_vm7, %v1160_v54, %v3988_v15 }
 0x97f   : > { %v4038_v62 = vadd.f32 %v1177_v1, %v3969_v6 }
 0x980   : > { %v4041_v50 = vsel %vm1155_vm7, %v1181_v19, %v3972_v29  ;;  %vm4768_vm7 = vcmp.lt.s32.totalorder %v3676_v43, %v3563_v63 }
 0x985   : > { %v1162_v3 = vpop.permute.xlu2 %1161 }
 0x986   : > { %v4050_v27 = vsel %vm1156_vm8, %v1162_v3, %v3994_v13  ;;  %v1178_v11 = vsel %vm1156_vm8, %v1162_v3, 0.0  ;;  %v1182_v6 = vmax.f32 %v4009_v39, %v1162_v3 }
 0x987   : > { %v4057_v14 = vadd.f32 %v1178_v11, %v4001_v38  ;;  %v1194_v29 = vpack.c.bf16 %v4050_v27, %v4044_v22 }
 0x988   : > { %v4065_v15 = vsel %vm1156_vm8, %v1182_v6, %v4009_v39  ;;  %v2674_v39 = vld [vmem:[%s3414_s26 + $0x60] sm:$0xff] }
 0x989   : > { %2676 = vmatmul.msk.bf16.vlgmr.msrb.gmra.mxu0 %vm456_vm1, %v1194_v29  ;;  %2677 = vmatmul.msk.bf16.vlgmr.msrb.gmra.mxu1 %vm456_vm1, %v1194_v29  ;;  %v1190_v23 = vunpack.c.l.bf16 %v2674_v39  ;;  %v1191_v33 = vunpack.c.h.bf16 %v2674_v39 }
 0x98a   : > { %1690 = vmatpush.bf16.msrb.mxu0 %v3428_v37  ;;  %1704 = vmatpush.bf16.msrb.mxu1 %v3439_v41 }
 0x98e   : > { %1691 = vmatpush.bf16.msrb.mxu0 %v3448_v44  ;;  %1705 = vmatpush.bf16.msrb.mxu1 %v3452_v45 }
 0x992   : > { %1692 = vmatpush.bf16.msrb.mxu0 %v3470_v51  ;;  %1706 = vmatpush.bf16.msrb.mxu1 %v3475_v52 }
 0x994   : > { %v1172_v13 = vpop.permute.xlu1 %1171 }
 0x995   : > { %v4079_v38 = vsel %vm1156_vm8, %v1172_v13, %v3978_v32  ;;  %vm1277_vm8 = vcmp.lt.s32.totalorder %v3631_v24, %v3555_v55 }
 0x996   : > { %1242 = vrot.lane.b32.xlu0 %v4079_v38, %s4763_s29  ;;  %1693 = vmatpush.bf16.msrb.mxu0 %v3492_v57 }
 0x997   : > { %1707 = vmatpush.bf16.msrb.mxu1 %v3499_v60 }
 0x9d0   : > { %v1241_v1 = vpop.permute.xlu2 %1240 }
 0xa06   : > { %v1207_v25 = vpop.f32.mrf.mxu0  ;;  %v1221_v12 = vpop.f32.mrf.mxu1 }
 0xa07   : > { %v1226_v31 = vadd.f32 %v1207_v25, %v1190_v23  ;;  %v1227_v36 = vadd.f32 %v1221_v12, %v1191_v33 }
 0xa08   : > { %v1243_v19 = vpop.permute.xlu0 %1242 }
 0xa09   : > { %v1230_v28 = vmul.f32 0.5, %v1226_v31  ;;  %v1262_v39 = vmul.f32 0.5, %v1227_v36 }
 0xa0b   : > { %2928 = vtanh.f32 %v1230_v28 }
 0xa0c   : > { %2930 = vtanh.f32 %v1227_v36 }
 0xa0e   : > { %v1209_v32 = vpop.f32.mrf.mxu0  ;;  %v1223_v46 = vpop.f32.mrf.mxu1 }
 0xa0f   : > { %v1228_v4 = vadd.f32 %v1209_v32, %v1192_v20  ;;  %v1229_v53 = vadd.f32 %v1223_v46, %v1193_v17 }
 0xa11   : > { %v2929_v47 = vpop.eup %2928  ;;  %v1231_v49 = vmul.f32 0.5, %v1228_v4  ;;  %v1263_v54 = vmul.f32 0.5, %v1229_v53 }
 0xa12   : > { %v1234_v40 = vadd.f32 1.0, %v2929_v47  ;;  %v2931_v18 = vpop.eup %2930 }
 0xa13   : > { %2932 = vtanh.f32 %v1231_v49 }
 0xa14   : > { %v1236_v5 = vmul.f32 0.5, %v1234_v40  ;;  %2934 = vtanh.f32 %v1229_v53 }
 0xa15   : > { %2936 = vtanh.f32 %v1263_v54  ;;  %v2679_v54 = vld [vmem:[%s3414_s26 + $0x78] sm:$0xff] }
 0xa16   : > { %v1250_v10 = vmul.f32 %v2931_v18, %v1236_v5  ;;  %v1246_v31 = vmul.f32 %v1241_v1, %v1236_v5 }
 0xa18   : > { %1254 = vrot.lane.b32.xlu1 %v1250_v10, %s4763_s29 }
 0xa19   : > { %v2933_v59 = vpop.eup %2932 }
 0xa1a   : > { %v1235_v58 = vadd.f32 1.0, %v2933_v59  ;;  %v2935_v16 = vpop.eup %2934 }
 0xa1b   : > { %v2937_v6 = vpop.eup %2936 }
 0xa1c   : > { %v1237_v8 = vmul.f32 0.5, %v1235_v58  ;;  %v1267_v13 = vadd.f32 1.0, %v2937_v6 }
 0xa1e   : > { %v1251_v21 = vmul.f32 %v2935_v16, %v1237_v8  ;;  %v1247_v3 = vmul.f32 %v1243_v19, %v1237_v8  ;;  %v1269_v23 = vmul.f32 0.5, %v1267_v13 }
 0xa20   : > { %1256 = vrot.lane.b32.xlu2 %v1251_v21, %s4763_s29 }
 0xa7a   : > { %v1257_v11 = vpop.permute.xlu2 %1256 }
 0xa7b   : > { %v1261_v29 = vadd.f32 %v1257_v11, %v1247_v3  ;;  %v1314_v3 = vunpack.c.l.bf16 %v2679_v54 }
 0xa7d   : > { %2938 = vtanh.f32 %v1261_v29 }
 0xa7e   : > { %2940 = vtanh.f32 %v1262_v39 }
 0xa83   : > { %v2939_v25 = vpop.eup %2938 }
 0xa84   : > { %v1273_v12 = vmul.f32 %v2939_v25, %v1269_v23  ;;  %v2941_v9 = vpop.eup %2940 }
 0xa85   : > { %v1266_v20 = vadd.f32 1.0, %v2941_v9 }
 0xa86   : > { %1283 = vrot.lane.b32.xlu1 %v1273_v12, %s4763_s29 }
 0xa87   : > { %v1268_v32 = vmul.f32 0.5, %v1266_v20 }
 0xa8a   : > { %v1255_v33 = vpop.permute.xlu1 %1254 }
 0xa8b   : > { %v1260_v28 = vadd.f32 %v1255_v33, %v1246_v31 }
 0xa8d   : > { %2942 = vtanh.f32 %v1260_v28  ;;  %1291 = vrot.lane.b32.xlu2 %v1260_v28, %s4763_s29 }
 0xa93   : > { %v2943_v4 = vpop.eup %2942 }
 0xa94   : > { %v1272_v17 = vmul.f32 %v2943_v4, %v1268_v32 }
 0xa96   : > { %1281 = vrot.lane.b32.xlu0 %v1272_v17, %s4763_s29 }
 0xa9e   : > { %1293 = vrot.lane.b32.xlu0 %v1261_v29, %s4763_s29  ;;  %v1315_v29 = vunpack.c.h.bf16 %v2679_v54 }
 0xae7   : > { %v1292_v36 = vpop.permute.xlu2 %1291 }
 0xae8   : > { %v4096_v46 = vsel %vm1277_vm8, %v1292_v36, %v4032_v61 }
 0xae9   : > { %1362 = vrot.lane.b32.xlu1 %v4096_v46, %s4763_s29 }
 0xaf8   : > { %v1284_v47 = vpop.permute.xlu1 %1283 }
 0xaf9   : > { %v1300_v49 = vsel %vm1278_vm9, %v1284_v47, 0.0  ;;  %v1304_v40 = vmax.f32 %v4065_v15, %v1284_v47  ;;  %v4117_v18 = vsel %vm1278_vm9, %v1284_v47, %v4050_v27 }
 0xafa   : > { %v4105_v53 = vadd.f32 %v1300_v49, %v4057_v14 }
 0xafb   : > { %v4111_v5 = vsel %vm1278_vm9, %v1304_v40, %v4065_v15 }
 0xb08   : > { %v1282_v61 = vpop.permute.xlu0 %1281 }
 0xb09   : > { %v4120_v10 = vsel %vm1277_vm8, %v1282_v61, %v4044_v22  ;;  %v1299_v59 = vsel %vm1277_vm8, %v1282_v61, 0.0  ;;  %v1303_v14 = vmax.f32 %v4041_v50, %v1282_v61 }
 0xb0a   : > { %v4124_v58 = vadd.f32 %v1299_v59, %v4038_v62  ;;  %v1316_v15 = vpack.c.bf16 %v4117_v18, %v4120_v10 }
 0xb0b   : > { %v4129_v8 = vsel %vm1277_vm8, %v1303_v14, %v4041_v50  ;;  %v2678_v50 = vld [vmem:[%s3414_s26 + $0x70] sm:$0xff]  ;;  %vm4769_vm8 = vmmov %vm4768_vm7 }
 0xb0c   : > { %2680 = vmatmul.msk.bf16.vlgmr.msrb.gmra.mxu2 %vm456_vm1, %v1316_v15  ;;  %2681 = vmatmul.msk.bf16.vlgmr.msrb.gmra.mxu3 %vm456_vm1, %v1316_v15  ;;  %v1312_v27 = vunpack.c.l.bf16 %v2678_v50  ;;  %v1313_v21 = vunpack.c.h.bf16 %v2678_v50 }
 0xb0d   : > { %1812 = vmatpush.bf16.msrb.mxu2 %v3428_v37  ;;  %1826 = vmatpush.bf16.msrb.mxu3 %v3439_v41 }
 0xb10   : > { %v1294_v22 = vpop.permute.xlu0 %1293 }
 0xb11   : > { %v4139_v62 = vsel %vm1278_vm9, %v1294_v22, %v4079_v38  ;;  %1813 = vmatpush.bf16.msrb.mxu2 %v3448_v44  ;;  %1827 = vmatpush.bf16.msrb.mxu3 %v3452_v45  ;;  %vm1399_vm9 = vcmp.lt.s32.totalorder %v3639_v26, %v3555_v55  ;;  %v2682_v26 = vld [vmem:[%s3414_s26 + $0x80] sm:$0xff] }
 0xb12   : > { %1364 = vrot.lane.b32.xlu2 %v4139_v62, %s4763_s29 }
 0xb15   : > { %1814 = vmatpush.bf16.msrb.mxu2 %v3470_v51  ;;  %1828 = vmatpush.bf16.msrb.mxu3 %v3475_v52 }
 0xb19   : > { %1815 = vmatpush.bf16.msrb.mxu2 %v3492_v57  ;;  %1829 = vmatpush.bf16.msrb.mxu3 %v3499_v60 }
 0xb5b   : > { %v1363_v47 = vpop.permute.xlu1 %1362 }
 0xb6c   : > { %v1365_v22 = vpop.permute.xlu2 %1364 }
 0xb8f   : > { %v1329_v24 = vpop.f32.mrf.mxu2  ;;  %v1343_v38 = vpop.f32.mrf.mxu3 }
 0xb90   : > { %v1348_v16 = vadd.f32 %v1329_v24, %v1312_v27  ;;  %v1349_v19 = vadd.f32 %v1343_v38, %v1313_v21 }
 0xb92   : > { %v1352_v1 = vmul.f32 0.5, %v1348_v16  ;;  %v1384_v36 = vmul.f32 0.5, %v1349_v19 }
 0xb94   : > { %2944 = vtanh.f32 %v1352_v1 }
 0xb95   : > { %2946 = vtanh.f32 %v1349_v19 }
 0xb97   : > { %v1331_v11 = vpop.f32.mrf.mxu2  ;;  %v1345_v13 = vpop.f32.mrf.mxu3 }
 0xb98   : > { %v1350_v6 = vadd.f32 %v1331_v11, %v1314_v3  ;;  %v1351_v12 = vadd.f32 %v1345_v13, %v1315_v29 }
 0xb9a   : > { %v2945_v39 = vpop.eup %2944  ;;  %v1353_v23 = vmul.f32 0.5, %v1350_v6  ;;  %v1385_v49 = vmul.f32 0.5, %v1351_v12 }
 0xb9b   : > { %v1356_v25 = vadd.f32 1.0, %v2945_v39  ;;  %v2947_v33 = vpop.eup %2946 }
 0xb9c   : > { %2948 = vtanh.f32 %v1353_v23 }
 0xb9d   : > { %v1358_v31 = vmul.f32 0.5, %v1356_v25  ;;  %2950 = vtanh.f32 %v1351_v12 }
 0xb9e   : > { %2952 = vtanh.f32 %v1384_v36 }
 0xb9f   : > { %v1372_v9 = vmul.f32 %v2947_v33, %v1358_v31  ;;  %v1368_v40 = vmul.f32 %v1363_v47, %v1358_v31  ;;  %2954 = vtanh.f32 %v1385_v49 }
 0xba1   : > { %1376 = vrot.lane.b32.xlu0 %v1372_v9, %s4763_s29 }
 0xba2   : > { %v2949_v28 = vpop.eup %2948 }
 0xba3   : > { %v1357_v20 = vadd.f32 1.0, %v2949_v28  ;;  %v2951_v4 = vpop.eup %2950 }
 0xba4   : > { %v2953_v59 = vpop.eup %2952 }
 0xba5   : > { %v1359_v32 = vmul.f32 0.5, %v1357_v20  ;;  %v1388_v15 = vadd.f32 1.0, %v2953_v59  ;;  %v2955_v27 = vpop.eup %2954 }
 0xba6   : > { %v1389_v1 = vadd.f32 1.0, %v2955_v27 }
 0xba7   : > { %v1373_v17 = vmul.f32 %v2951_v4, %v1359_v32  ;;  %v1369_v50 = vmul.f32 %v1365_v22, %v1359_v32  ;;  %v1390_v24 = vmul.f32 0.5, %v1388_v15  ;;  %v1435_v4 = vunpack.c.h.bf16 %v2682_v26 }
 0xba8   : > { %v1391_v19 = vmul.f32 0.5, %v1389_v1 }
 0xba9   : > { %1378 = vrot.lane.b32.xlu1 %v1373_v17, %s4763_s29  ;;  %v2683_v17 = vld [vmem:[%s3414_s26 + $0x88] sm:$0xff] }
 0xbaa   : > { %v1436_v49 = vunpack.c.l.bf16 %v2683_v17  ;;  %v1437_v59 = vunpack.c.h.bf16 %v2683_v17 }
 0xc13   : > { %v1377_v61 = vpop.permute.xlu0 %1376 }
 0xc14   : > { %v1382_v14 = vadd.f32 %v1377_v61, %v1368_v40 }
 0xc16   : > { %2956 = vtanh.f32 %v1382_v14  ;;  %1413 = vrot.lane.b32.xlu1 %v1382_v14, %s4763_s29 }
 0xc1b   : > { %v1379_v38 = vpop.permute.xlu1 %1378 }
 0xc1c   : > { %v2957_v16 = vpop.eup %2956  ;;  %v1383_v21 = vadd.f32 %v1379_v38, %v1369_v50 }
 0xc1d   : > { %v1394_v54 = vmul.f32 %v2957_v16, %v1390_v24 }
 0xc1e   : > { %2958 = vtanh.f32 %v1383_v21 }
 0xc1f   : > { %1403 = vrot.lane.b32.xlu2 %v1394_v54, %s4763_s29 }
 0xc24   : > { %v2959_v3 = vpop.eup %2958 }
 0xc25   : > { %v1395_v11 = vmul.f32 %v2959_v3, %v1391_v19 }
 0xc27   : > { %1415 = vrot.lane.b32.xlu2 %v1383_v21, %s4763_s29  ;;  %1405 = vrot.lane.b32.xlu0 %v1395_v11, %s4763_s29 }
 0xc79   : > { %v1404_v6 = vpop.permute.xlu2 %1403 }
 0xc7a   : > { %v1421_v29 = vsel %vm1399_vm9, %v1404_v6, 0.0  ;;  %v1425_v13 = vmax.f32 %v4129_v8, %v1404_v6 }
 0xc7b   : > { %v4161_v39 = vadd.f32 %v1421_v29, %v4124_v58 }
 0xc7c   : > { %v4164_v23 = vsel %vm1399_vm9, %v1425_v13, %v4129_v8  ;;  %v4180_v8 = vsel %vm1399_vm9, %v1404_v6, %v4120_v10 }
 0xc81   : > { %v1416_v25 = vpop.permute.xlu2 %1415 }
 0xc82   : > { %v4170_v12 = vsel %vm1400_vm10, %v1416_v25, %v4139_v62 }
 0xc83   : > { %1486 = vrot.lane.b32.xlu1 %v4170_v12, %s4763_s29 }
 0xc88   : > { %v1414_v31 = vpop.permute.xlu1 %1413 }
 0xc89   : > { %v4175_v33 = vsel %vm1399_vm9, %v1414_v31, %v4096_v46  ;;  %vm4770_vm9 = vmmov %vm4768_vm7 }
 0xc8a   : > { %1484 = vrot.lane.b32.xlu0 %v4175_v33, %s4763_s29 }
 0xc99   : > { %v1406_v58 = vpop.permute.xlu0 %1405 }
 0xc9a   : > { %v4186_v62 = vsel %vm1400_vm10, %v1406_v58, %v4117_v18  ;;  %v1422_v9 = vsel %vm1400_vm10, %v1406_v58, 0.0  ;;  %v1426_v46 = vmax.f32 %v4111_v5, %v1406_v58 }
 0xc9b   : > { %v4193_v28 = vadd.f32 %v1422_v9, %v4105_v53  ;;  %v1438_v10 = vpack.c.bf16 %v4186_v62, %v4180_v8  ;;  %v1434_v53 = vunpack.c.l.bf16 %v2682_v26 }
 0xc9c   : > { %v4201_v20 = vsel %vm1400_vm10, %v1426_v46, %v4111_v5  ;;  %vm1521_vm10 = vcmp.lt.s32.totalorder %v3647_v30, %v3555_v55 }
 0xc9d   : > { %2684 = vmatmul.msk.bf16.vlgmr.msra.gmra.mxu0 %vm456_vm1, %v1438_v10  ;;  %2685 = vmatmul.msk.bf16.vlgmr.msra.gmra.mxu1 %vm456_vm1, %v1438_v10 }
 0xc9e   : > { %1934 = vmatpush.bf16.msra.mxu0 %v3428_v37  ;;  %1948 = vmatpush.bf16.msra.mxu1 %v3439_v41 }
 0xca2   : > { %1935 = vmatpush.bf16.msra.mxu0 %v3448_v44  ;;  %1949 = vmatpush.bf16.msra.mxu1 %v3452_v45 }
 0xca6   : > { %1936 = vmatpush.bf16.msra.mxu0 %v3470_v51  ;;  %1950 = vmatpush.bf16.msra.mxu1 %v3475_v52 }
 0xcaa   : > { %1937 = vmatpush.bf16.msra.mxu0 %v3492_v57  ;;  %1951 = vmatpush.bf16.msra.mxu1 %v3499_v60 }
 0xcfc   : > { %v1485_v6 = vpop.permute.xlu0 %1484 }
 0xd1a   : > { %v1451_v5 = vpop.f32.mrf.mxu0  ;;  %v1465_v18 = vpop.f32.mrf.mxu1 }
 0xd1b   : > { %v1470_v32 = vadd.f32 %v1451_v5, %v1434_v53  ;;  %v1471_v47 = vadd.f32 %v1465_v18, %v1435_v4  ;;  %v1487_v53 = vpop.permute.xlu1 %1486 }
 0xd1d   : > { %v1474_v36 = vmul.f32 0.5, %v1470_v32  ;;  %v1506_v11 = vmul.f32 0.5, %v1471_v47 }
 0xd1f   : > { %2960 = vtanh.f32 %v1474_v36 }
 0xd20   : > { %2962 = vtanh.f32 %v1471_v47 }
 0xd22   : > { %v1453_v40 = vpop.f32.mrf.mxu0  ;;  %v1467_v14 = vpop.f32.mrf.mxu1 }
 0xd23   : > { %v1472_v61 = vadd.f32 %v1453_v40, %v1436_v49  ;;  %v1473_v27 = vadd.f32 %v1467_v14, %v1437_v59 }
 0xd25   : > { %v2961_v15 = vpop.eup %2960  ;;  %v1475_v22 = vmul.f32 0.5, %v1472_v61  ;;  %v1507_v26 = vmul.f32 0.5, %v1473_v27 }
 0xd26   : > { %v1478_v50 = vadd.f32 1.0, %v2961_v15  ;;  %v2963_v38 = vpop.eup %2962 }
 0xd27   : > { %2964 = vtanh.f32 %v1475_v22 }
 0xd28   : > { %v1480_v24 = vmul.f32 0.5, %v1478_v50  ;;  %2966 = vtanh.f32 %v1473_v27 }
 0xd29   : > { %2968 = vtanh.f32 %v1506_v11  ;;  %v2687_v11 = vld [vmem:[%s3414_s26 + $0x98] sm:$0xff] }
 0xd2a   : > { %v1494_v16 = vmul.f32 %v2963_v38, %v1480_v24  ;;  %v1490_v29 = vmul.f32 %v1485_v6, %v1480_v24  ;;  %v1558_v30 = vunpack.c.l.bf16 %v2687_v11 }
 0xd2c   : > { %1498 = vrot.lane.b32.xlu2 %v1494_v16, %s4763_s29 }
 0xd2d   : > { %v2965_v21 = vpop.eup %2964 }
 0xd2e   : > { %v1479_v54 = vadd.f32 1.0, %v2965_v21  ;;  %v2967_v19 = vpop.eup %2966 }
 0xd2f   : > { %v2969_v25 = vpop.eup %2968 }
 0xd30   : > { %v1481_v1 = vmul.f32 0.5, %v1479_v54  ;;  %v1510_v58 = vadd.f32 1.0, %v2969_v25  ;;  %v1559_v25 = vunpack.c.h.bf16 %v2687_v11 }
 0xd32   : > { %v1495_v3 = vmul.f32 %v2967_v19, %v1481_v1  ;;  %v1512_v9 = vmul.f32 0.5, %v1510_v58  ;;  %v1491_v5 = vmul.f32 %v1487_v53, %v1481_v1 }
 0xd34   : > { %1500 = vrot.lane.b32.xlu0 %v1495_v3, %s4763_s29 }
 0xd86   : > { %v1499_v13 = vpop.permute.xlu2 %1498 }
 0xd87   : > { %v1504_v31 = vadd.f32 %v1499_v13, %v1490_v29 }
 0xd89   : > { %2970 = vtanh.f32 %v1504_v31  ;;  %1535 = vrot.lane.b32.xlu0 %v1504_v31, %s4763_s29 }
 0xd8a   : > { %2972 = vtanh.f32 %v1507_v26 }
 0xd8f   : > { %v2971_v46 = vpop.eup %2970 }
 0xd90   : > { %v1516_v10 = vmul.f32 %v2971_v46, %v1512_v9  ;;  %v2973_v32 = vpop.eup %2972 }
 0xd91   : > { %v1511_v17 = vadd.f32 1.0, %v2973_v32 }
 0xd92   : > { %1525 = vrot.lane.b32.xlu1 %v1516_v10, %s4763_s29 }
 0xd93   : > { %v1513_v36 = vmul.f32 0.5, %v1511_v17 }
 0xda6   : > { %v1501_v18 = vpop.permute.xlu0 %1500 }
 0xda7   : > { %v1505_v4 = vadd.f32 %v1501_v18, %v1491_v5 }
 0xda9   : > { %2974 = vtanh.f32 %v1505_v4  ;;  %1537 = vrot.lane.b32.xlu1 %v1505_v4, %s4763_s29 }
 0xdaf   : > { %v2975_v47 = vpop.eup %2974 }
 0xdb0   : > { %v1517_v49 = vmul.f32 %v2975_v47, %v1513_v36 }
 0xdb2   : > { %1527 = vrot.lane.b32.xlu2 %v1517_v49, %s4763_s29 }
 0xdfb   : > { %v1536_v40 = vpop.permute.xlu0 %1535 }
 0xdfc   : > { %v4224_v61 = vsel %vm1521_vm10, %v1536_v40, %v4175_v33 }
 0xdfd   : > { %1606 = vrot.lane.b32.xlu2 %v4224_v61, %s4763_s29 }
 0xe04   : > { %v1526_v59 = vpop.permute.xlu1 %1525 }
 0xe05   : > { %v1543_v14 = vsel %vm1521_vm10, %v1526_v59, 0.0  ;;  %v1547_v15 = vmax.f32 %v4164_v23, %v1526_v59  ;;  %v4236_v24 = vsel %vm1521_vm10, %v1526_v59, %v4180_v8 }
 0xe06   : > { %v4230_v22 = vadd.f32 %v1543_v14, %v4161_v39 }
 0xe07   : > { %v4233_v50 = vsel %vm1521_vm10, %v1547_v15, %v4164_v23  ;;  %vm4771_vm10 = vmmov %vm4768_vm7 }
 0xe0c   : > { %v1528_v27 = vpop.permute.xlu2 %1527 }
 0xe0d   : > { %v4242_v33 = vsel %vm1522_vm11, %v1528_v27, %v4186_v62  ;;  %v1544_v38 = vsel %vm1522_vm11, %v1528_v27, 0.0  ;;  %v1548_v39 = vmax.f32 %v4201_v20, %v1528_v27 }
 0xe0e   : > { %v4249_v16 = vadd.f32 %v1544_v38, %v4193_v28  ;;  %v1560_v23 = vpack.c.bf16 %v4242_v33, %v4236_v24 }
 0xe0f   : > { %v4257_v8 = vsel %vm1522_vm11, %v1548_v39, %v4201_v20  ;;  %v2686_v20 = vld [vmem:[%s3414_s26 + $0x90] sm:$0xff] }
 0xe10   : > { %2688 = vmatmul.msk.bf16.vlgmr.msra.gmra.mxu2 %vm456_vm1, %v1560_v23  ;;  %2689 = vmatmul.msk.bf16.vlgmr.msra.gmra.mxu3 %vm456_vm1, %v1560_v23  ;;  %v1556_v21 = vunpack.c.l.bf16 %v2686_v20  ;;  %v1557_v3 = vunpack.c.h.bf16 %v2686_v20 }
 0xe11   : > { %2056 = vmatpush.bf16.msra.mxu2 %v3428_v37  ;;  %2070 = vmatpush.bf16.msra.mxu3 %v3439_v41 }
 0xe15   : > { %2057 = vmatpush.bf16.msra.mxu2 %v3448_v44  ;;  %2071 = vmatpush.bf16.msra.mxu3 %v3452_v45 }
 0xe19   : > { %2058 = vmatpush.bf16.msra.mxu2 %v3470_v51  ;;  %2072 = vmatpush.bf16.msra.mxu3 %v3475_v52 }
 0xe1b   : > { %v1538_v62 = vpop.permute.xlu1 %1537 }
 0xe1c   : > { %v4271_v28 = vsel %vm1522_vm11, %v1538_v62, %v4170_v12  ;;  %vm1643_vm11 = vcmp.lt.s32.totalorder %v3655_v34, %v3555_v55 }
 0xe1d   : > { %1608 = vrot.lane.b32.xlu0 %v4271_v28, %s4763_s29  ;;  %2059 = vmatpush.bf16.msra.mxu2 %v3492_v57 }
 0xe1e   : > { %2073 = vmatpush.bf16.msra.mxu3 %v3499_v60 }
 0xe57   : > { %v1607_v49 = vpop.permute.xlu2 %1606 }
 0xe8f   : > { %v1609_v40 = vpop.permute.xlu0 %1608 }
 0xe93   : > { %v1573_v54 = vpop.f32.mrf.mxu2  ;;  %v1587_v1 = vpop.f32.mrf.mxu3 }
 0xe94   : > { %v1592_v19 = vadd.f32 %v1573_v54, %v1556_v21  ;;  %v1593_v29 = vadd.f32 %v1587_v1, %v1557_v3 }
 0xe96   : > { %v1596_v6 = vmul.f32 0.5, %v1592_v19  ;;  %v1628_v39 = vmul.f32 0.5, %v1593_v29 }
 0xe98   : > { %2976 = vtanh.f32 %v1596_v6 }
 0xe99   : > { %2978 = vtanh.f32 %v1593_v29 }
 0xe9b   : > { %v1575_v12 = vpop.f32.mrf.mxu2  ;;  %v1589_v31 = vpop.f32.mrf.mxu3 }
 0xe9c   : > { %v1594_v13 = vadd.f32 %v1575_v12, %v1558_v30  ;;  %v1595_v10 = vadd.f32 %v1589_v31, %v1559_v25 }
 0xe9e   : > { %v2977_v58 = vpop.eup %2976  ;;  %v1597_v9 = vmul.f32 0.5, %v1594_v13  ;;  %v1629_v47 = vmul.f32 0.5, %v1595_v10 }
 0xe9f   : > { %v1600_v46 = vadd.f32 1.0, %v2977_v58  ;;  %v2979_v53 = vpop.eup %2978 }
 0xea0   : > { %2980 = vtanh.f32 %v1597_v9 }
 0xea1   : > { %v1602_v26 = vmul.f32 0.5, %v1600_v46  ;;  %2982 = vtanh.f32 %v1595_v10 }
 0xea2   : > { %2984 = vtanh.f32 %v1629_v47 }
 0xea3   : > { %v1616_v5 = vmul.f32 %v2979_v53, %v1602_v26  ;;  %v1612_v21 = vmul.f32 %v1607_v49, %v1602_v26 }
 0xea5   : > { %1620 = vrot.lane.b32.xlu1 %v1616_v5, %s4763_s29 }
 0xea6   : > { %v2981_v18 = vpop.eup %2980 }
 0xea7   : > { %v1601_v32 = vadd.f32 1.0, %v2981_v18  ;;  %v2983_v17 = vpop.eup %2982 }
 0xea8   : > { %v2985_v15 = vpop.eup %2984 }
 0xea9   : > { %v1603_v4 = vmul.f32 0.5, %v1601_v32  ;;  %v1633_v38 = vadd.f32 1.0, %v2985_v15 }
 0xeab   : > { %v1617_v36 = vmul.f32 %v2983_v17, %v1603_v4  ;;  %v1613_v59 = vmul.f32 %v1609_v40, %v1603_v4  ;;  %v1635_v23 = vmul.f32 0.5, %v1633_v38  ;;  %v2691_v4 = vld [vmem:[%s3414_s26 + $0xa8] sm:$0xff] }
 0xeac   : > { %v1680_v47 = vunpack.c.l.bf16 %v2691_v4 }
 0xead   : > { %1622 = vrot.lane.b32.xlu2 %v1617_v36, %s4763_s29 }
 0xf07   : > { %v1623_v14 = vpop.permute.xlu2 %1622 }
 0xf08   : > { %v1627_v27 = vadd.f32 %v1623_v14, %v1613_v59  ;;  %v1681_v59 = vunpack.c.h.bf16 %v2691_v4 }
 0xf0a   : > { %2986 = vtanh.f32 %v1627_v27 }
 0xf0b   : > { %2988 = vtanh.f32 %v1628_v39 }
 0xf10   : > { %v2987_v62 = vpop.eup %2986 }
 0xf11   : > { %v1639_v20 = vmul.f32 %v2987_v62, %v1635_v23  ;;  %v2989_v1 = vpop.eup %2988 }
 0xf12   : > { %v1632_v3 = vadd.f32 1.0, %v2989_v1 }
 0xf13   : > { %1649 = vrot.lane.b32.xlu1 %v1639_v20, %s4763_s29 }
 0xf14   : > { %v1634_v11 = vmul.f32 0.5, %v1632_v3 }
 0xf17   : > { %v1621_v54 = vpop.permute.xlu1 %1620 }
 0xf18   : > { %v1626_v19 = vadd.f32 %v1621_v54, %v1612_v21 }
 0xf1a   : > { %2990 = vtanh.f32 %v1626_v19  ;;  %1657 = vrot.lane.b32.xlu2 %v1626_v19, %s4763_s29 }
 0xf20   : > { %v2991_v6 = vpop.eup %2990 }
 0xf21   : > { %v1638_v30 = vmul.f32 %v2991_v6, %v1634_v11 }
 0xf23   : > { %1647 = vrot.lane.b32.xlu0 %v1638_v30, %s4763_s29 }
 0xf2b   : > { %1659 = vrot.lane.b32.xlu0 %v1627_v27, %s4763_s29 }
 0xf74   : > { %v1658_v29 = vpop.permute.xlu2 %1657 }
 0xf75   : > { %v4288_v12 = vsel %vm1643_vm11, %v1658_v29, %v4224_v61 }
 0xf76   : > { %1728 = vrot.lane.b32.xlu1 %v4288_v12, %s4763_s29 }
 0xf85   : > { %v1650_v13 = vpop.permute.xlu1 %1649 }
 0xf86   : > { %v1666_v25 = vsel %vm1644_vm12, %v1650_v13, 0.0  ;;  %v1670_v31 = vmax.f32 %v4257_v8, %v1650_v13  ;;  %v4309_v46 = vsel %vm1644_vm12, %v1650_v13, %v4242_v33 }
 0xf87   : > { %v4297_v58 = vadd.f32 %v1666_v25, %v4249_v16 }
 0xf88   : > { %v4303_v9 = vsel %vm1644_vm12, %v1670_v31, %v4257_v8 }
 0xf95   : > { %v1648_v61 = vpop.permute.xlu0 %1647 }
 0xf96   : > { %v4312_v10 = vsel %vm1643_vm11, %v1648_v61, %v4236_v24  ;;  %v1665_v26 = vsel %vm1643_vm11, %v1648_v61, 0.0  ;;  %v1669_v16 = vmax.f32 %v4233_v50, %v1648_v61 }
 0xf97   : > { %v4316_v53 = vadd.f32 %v1665_v26, %v4230_v22  ;;  %v1682_v8 = vpack.c.bf16 %v4309_v46, %v4312_v10 }
 0xf98   : > { %v4321_v5 = vsel %vm1643_vm11, %v1669_v16, %v4233_v50  ;;  %v2690_v50 = vld [vmem:[%s3414_s26 + $0xa0] sm:$0xff]  ;;  %vm2131_vm11 = vcmp.lt.s32.totalorder %v3685_v48, %v3555_v55 }
 0xf99   : > { %2692 = vmatmul.msk.bf16.vlgmr.msrb.gmra.mxu0 %vm456_vm1, %v1682_v8  ;;  %2693 = vmatmul.msk.bf16.vlgmr.msrb.gmra.mxu1 %vm456_vm1, %v1682_v8  ;;  %v1678_v33 = vunpack.c.l.bf16 %v2690_v50  ;;  %v1679_v32 = vunpack.c.h.bf16 %v2690_v50 }
 0xf9a   : > { %2178 = vmatpush.bf16.msrb.mxu0 %v3428_v37  ;;  %2192 = vmatpush.bf16.msrb.mxu1 %v3439_v41 }
 0xf9d   : > { %v1660_v24 = vpop.permute.xlu0 %1659 }
 0xf9e   : > { %v4331_v22 = vsel %vm1644_vm12, %v1660_v24, %v4271_v28  ;;  %2179 = vmatpush.bf16.msrb.mxu0 %v3448_v44  ;;  %2193 = vmatpush.bf16.msrb.mxu1 %v3452_v45  ;;  %vm1765_vm12 = vcmp.lt.s32.totalorder %v3659_v35, %v3555_v55  ;;  %v2694_v35 = vld [vmem:[%s3414_s26 + $0xb0] sm:$0xff] }
 0xf9f   : > { %1730 = vrot.lane.b32.xlu2 %v4331_v22, %s4763_s29 }
 0xfa2   : > { %2180 = vmatpush.bf16.msrb.mxu0 %v3470_v51  ;;  %2194 = vmatpush.bf16.msrb.mxu1 %v3475_v52 }
 0xfa6   : > { %2181 = vmatpush.bf16.msrb.mxu0 %v3492_v57  ;;  %2195 = vmatpush.bf16.msrb.mxu1 %v3499_v60 }
 0xfe8   : > { %v1729_v6 = vpop.permute.xlu1 %1728 }
 0xff9   : > { %v1731_v26 = vpop.permute.xlu2 %1730 }
0x1016   : > { %v1695_v34 = vpop.f32.mrf.mxu0  ;;  %v1709_v28 = vpop.f32.mrf.mxu1 }
0x1017   : > { %v1714_v18 = vadd.f32 %v1695_v34, %v1678_v33  ;;  %v1715_v36 = vadd.f32 %v1709_v28, %v1679_v32 }
0x1019   : > { %v1718_v17 = vmul.f32 0.5, %v1714_v18  ;;  %v1750_v11 = vmul.f32 0.5, %v1715_v36 }
0x101b   : > { %2992 = vtanh.f32 %v1718_v17 }
0x101c   : > { %2994 = vtanh.f32 %v1715_v36 }
0x101e   : > { %v1697_v49 = vpop.f32.mrf.mxu0  ;;  %v1711_v14 = vpop.f32.mrf.mxu1 }
0x101f   : > { %v1716_v40 = vadd.f32 %v1697_v49, %v1680_v47  ;;  %v1717_v39 = vadd.f32 %v1711_v14, %v1681_v59 }
0x1021   : > { %v2993_v15 = vpop.eup %2992  ;;  %v1719_v27 = vmul.f32 0.5, %v1716_v40  ;;  %v1751_v30 = vmul.f32 0.5, %v1717_v39 }
0x1022   : > { %v1722_v38 = vadd.f32 1.0, %v2993_v15  ;;  %v2995_v62 = vpop.eup %2994 }
0x1023   : > { %2996 = vtanh.f32 %v1719_v27 }
0x1024   : > { %v1724_v23 = vmul.f32 0.5, %v1722_v38  ;;  %2998 = vtanh.f32 %v1717_v39 }
0x1025   : > { %3000 = vtanh.f32 %v1750_v11 }
0x1026   : > { %v1738_v20 = vmul.f32 %v2995_v62, %v1724_v23  ;;  %v1734_v29 = vmul.f32 %v1729_v6, %v1724_v23  ;;  %3002 = vtanh.f32 %v1751_v30 }
0x1028   : > { %1742 = vrot.lane.b32.xlu0 %v1738_v20, %s4763_s29 }
0x1029   : > { %v2997_v21 = vpop.eup %2996 }
0x102a   : > { %v1723_v54 = vadd.f32 1.0, %v2997_v21  ;;  %v2999_v19 = vpop.eup %2998  ;;  %v2695_v21 = vld [vmem:[%s3414_s26 + $0xb8] sm:$0xff] }
0x102b   : > { %v3001_v25 = vpop.eup %3000 }
0x102c   : > { %v1725_v1 = vmul.f32 0.5, %v1723_v54  ;;  %v1754_v61 = vadd.f32 1.0, %v3001_v25  ;;  %v3003_v8 = vpop.eup %3002  ;;  %v1802_v54 = vunpack.c.l.bf16 %v2695_v21 }
0x102d   : > { %v1755_v18 = vadd.f32 1.0, %v3003_v8 }
0x102e   : > { %v1739_v3 = vmul.f32 %v2999_v19, %v1725_v1  ;;  %v1735_v16 = vmul.f32 %v1731_v26, %v1725_v1  ;;  %v1756_v24 = vmul.f32 0.5, %v1754_v61  ;;  %v1803_v1 = vunpack.c.h.bf16 %v2695_v21 }
0x102f   : > { %v1757_v32 = vmul.f32 0.5, %v1755_v18 }
0x1030   : > { %1744 = vrot.lane.b32.xlu1 %v1739_v3, %s4763_s29 }
0x109a   : > { %v1743_v13 = vpop.permute.xlu0 %1742 }
0x109b   : > { %v1748_v31 = vadd.f32 %v1743_v13, %v1734_v29 }
0x109d   : > { %3004 = vtanh.f32 %v1748_v31  ;;  %1779 = vrot.lane.b32.xlu1 %v1748_v31, %s4763_s29 }
0x10a2   : > { %v1745_v50 = vpop.permute.xlu1 %1744 }
0x10a3   : > { %v3005_v33 = vpop.eup %3004  ;;  %v1749_v34 = vadd.f32 %v1745_v50, %v1735_v16 }
0x10a4   : > { %v1760_v28 = vmul.f32 %v3005_v33, %v1756_v24 }
0x10a5   : > { %3006 = vtanh.f32 %v1749_v34 }
0x10a6   : > { %1769 = vrot.lane.b32.xlu2 %v1760_v28, %s4763_s29 }
0x10ab   : > { %v3007_v4 = vpop.eup %3006 }
0x10ac   : > { %v1761_v17 = vmul.f32 %v3007_v4, %v1757_v32 }
0x10ae   : > { %1781 = vrot.lane.b32.xlu2 %v1749_v34, %s4763_s29  ;;  %1771 = vrot.lane.b32.xlu0 %v1761_v17, %s4763_s29 }
0x1100   : > { %v1770_v36 = vpop.permute.xlu2 %1769 }
0x1101   : > { %v1787_v47 = vsel %vm1765_vm12, %v1770_v36, 0.0  ;;  %v1791_v49 = vmax.f32 %v4321_v5, %v1770_v36 }
0x1102   : > { %v4353_v40 = vadd.f32 %v1787_v47, %v4316_v53 }
0x1103   : > { %v4356_v59 = vsel %vm1765_vm12, %v1791_v49, %v4321_v5  ;;  %v4372_v5 = vsel %vm1765_vm12, %v1770_v36, %v4312_v10 }
0x1108   : > { %v1782_v14 = vpop.permute.xlu2 %1781 }
0x1109   : > { %v4362_v15 = vsel %vm1766_vm13, %v1782_v14, %v4331_v22 }
0x110a   : > { %1852 = vrot.lane.b32.xlu1 %v4362_v15, %s4763_s29 }
0x110f   : > { %v1780_v27 = vpop.permute.xlu1 %1779 }
0x1110   : > { %v4367_v38 = vsel %vm1765_vm12, %v1780_v27, %v4288_v12 }
0x1111   : > { %1850 = vrot.lane.b32.xlu0 %v4367_v38, %s4763_s29 }
0x1120   : > { %v1772_v53 = vpop.permute.xlu0 %1771 }
0x1121   : > { %v4378_v22 = vsel %vm1766_vm13, %v1772_v53, %v4309_v46  ;;  %v1788_v39 = vsel %vm1766_vm13, %v1772_v53, 0.0  ;;  %v1792_v12 = vmax.f32 %v4303_v9, %v1772_v53 }
0x1122   : > { %v4385_v23 = vadd.f32 %v1788_v39, %v4297_v58  ;;  %v1804_v10 = vpack.c.bf16 %v4378_v22, %v4372_v5  ;;  %v1800_v58 = vunpack.c.l.bf16 %v2694_v35 }
0x1123   : > { %v4393_v62 = vsel %vm1766_vm13, %v1792_v12, %v4303_v9  ;;  %vm1887_vm13 = vcmp.lt.s32.totalorder %v3672_v42, %v3555_v55 }
0x1124   : > { %2696 = vmatmul.msk.bf16.vlgmr.msrb.gmra.mxu2 %vm456_vm1, %v1804_v10  ;;  %2697 = vmatmul.msk.bf16.vlgmr.msrb.gmra.mxu3 %vm456_vm1, %v1804_v10 }
0x1125   : > { %2300 = vmatpush.bf16.msrb.mxu2 %v3428_v37  ;;  %2314 = vmatpush.bf16.msrb.mxu3 %v3439_v41  ;;  %v1801_v37 = vunpack.c.h.bf16 %v2694_v35 }
0x1129   : > { %2301 = vmatpush.bf16.msrb.mxu2 %v3448_v44  ;;  %2315 = vmatpush.bf16.msrb.mxu3 %v3452_v45 }
0x112d   : > { %2302 = vmatpush.bf16.msrb.mxu2 %v3470_v51  ;;  %2316 = vmatpush.bf16.msrb.mxu3 %v3475_v52 }
0x1131   : > { %2303 = vmatpush.bf16.msrb.mxu2 %v3492_v57  ;;  %2317 = vmatpush.bf16.msrb.mxu3 %v3499_v60 }
0x117c   : > { %v1853_v17 = vpop.permute.xlu1 %1852 }
0x1183   : > { %v1851_v16 = vpop.permute.xlu0 %1850 }
0x11a7   : > { %v1817_v9 = vpop.f32.mrf.mxu2  ;;  %v1831_v46 = vpop.f32.mrf.mxu3 }
0x11a8   : > { %v1836_v20 = vadd.f32 %v1817_v9, %v1800_v58  ;;  %v1837_v44 = vadd.f32 %v1831_v46, %v1801_v37 }
0x11aa   : > { %v1840_v41 = vmul.f32 0.5, %v1836_v20  ;;  %v1872_v26 = vmul.f32 0.5, %v1837_v44 }
0x11ac   : > { %3008 = vtanh.f32 %v1840_v41 }
0x11ad   : > { %3010 = vtanh.f32 %v1837_v44 }
0x11af   : > { %v1819_v45 = vpop.f32.mrf.mxu2  ;;  %v1833_v52 = vpop.f32.mrf.mxu3 }
0x11b0   : > { %v1838_v51 = vadd.f32 %v1819_v45, %v1802_v54  ;;  %v1839_v60 = vadd.f32 %v1833_v52, %v1803_v1  ;;  %v2698_v45 = vld [vmem:[%s3414_s26 + $0xc0] sm:$0xff] }
0x11b2   : > { %v3009_v19 = vpop.eup %3008  ;;  %v1841_v57 = vmul.f32 0.5, %v1838_v51  ;;  %v1873_v4 = vmul.f32 0.5, %v1839_v60  ;;  %v1922_v51 = vunpack.c.l.bf16 %v2698_v45 }
0x11b3   : > { %v1844_v3 = vadd.f32 1.0, %v3009_v19  ;;  %v3011_v6 = vpop.eup %3010  ;;  %v1923_v19 = vunpack.c.h.bf16 %v2698_v45 }
0x11b4   : > { %3012 = vtanh.f32 %v1841_v57  ;;  %v2699_v57 = vld [vmem:[%s3414_s26 + $0xc8] sm:$0xff] }
0x11b5   : > { %v1846_v11 = vmul.f32 0.5, %v1844_v3  ;;  %3014 = vtanh.f32 %v1839_v60  ;;  %v1925_v42 = vunpack.c.h.bf16 %v2699_v57 }
0x11b6   : > { %3016 = vtanh.f32 %v1872_v26 }
0x11b7   : > { %v1860_v30 = vmul.f32 %v3011_v6, %v1846_v11  ;;  %v1856_v8 = vmul.f32 %v1851_v16, %v1846_v11  ;;  %v1924_v11 = vunpack.c.l.bf16 %v2699_v57 }
0x11b9   : > { %1864 = vrot.lane.b32.xlu2 %v1860_v30, %s4763_s29 }
0x11ba   : > { %v3013_v29 = vpop.eup %3012 }
0x11bb   : > { %v1845_v13 = vadd.f32 1.0, %v3013_v29  ;;  %v3015_v31 = vpop.eup %3014 }
0x11bc   : > { %v3017_v50 = vpop.eup %3016 }
0x11bd   : > { %v1847_v25 = vmul.f32 0.5, %v1845_v13  ;;  %v1876_v34 = vadd.f32 1.0, %v3017_v50 }
0x11bf   : > { %v1861_v61 = vmul.f32 %v3015_v31, %v1847_v25  ;;  %v1878_v28 = vmul.f32 0.5, %v1876_v34  ;;  %v1857_v36 = vmul.f32 %v1853_v17, %v1847_v25 }
0x11c1   : > { %1866 = vrot.lane.b32.xlu0 %v1861_v61, %s4763_s29 }
0x1213   : > { %v1865_v24 = vpop.permute.xlu2 %1864 }
0x1214   : > { %v1870_v33 = vadd.f32 %v1865_v24, %v1856_v8 }
0x1216   : > { %3018 = vtanh.f32 %v1870_v33  ;;  %1901 = vrot.lane.b32.xlu0 %v1870_v33, %s4763_s29 }
0x1217   : > { %3020 = vtanh.f32 %v1873_v4 }
0x121c   : > { %v3019_v18 = vpop.eup %3018 }
0x121d   : > { %v1882_v32 = vmul.f32 %v3019_v18, %v1878_v28  ;;  %v3021_v49 = vpop.eup %3020 }
0x121e   : > { %v1877_v27 = vadd.f32 1.0, %v3021_v49 }
0x121f   : > { %1891 = vrot.lane.b32.xlu1 %v1882_v32, %s4763_s29 }
0x1220   : > { %v1879_v53 = vmul.f32 0.5, %v1877_v27 }
0x1233   : > { %v1867_v47 = vpop.permute.xlu0 %1866 }
0x1234   : > { %v1871_v14 = vadd.f32 %v1867_v47, %v1857_v36 }
0x1236   : > { %3022 = vtanh.f32 %v1871_v14  ;;  %1903 = vrot.lane.b32.xlu1 %v1871_v14, %s4763_s29 }
0x123c   : > { %v3023_v39 = vpop.eup %3022 }
0x123d   : > { %v1883_v12 = vmul.f32 %v3023_v39, %v1879_v53 }
0x123f   : > { %1893 = vrot.lane.b32.xlu2 %v1883_v12, %s4763_s29 }
0x1288   : > { %v1902_v10 = vpop.permute.xlu0 %1901 }
0x1289   : > { %v4416_v35 = vsel %vm1887_vm13, %v1902_v10, %v4367_v38 }
0x128a   : > { %1972 = vrot.lane.b32.xlu2 %v4416_v35, %s4763_s29 }
0x1291   : > { %v1892_v58 = vpop.permute.xlu1 %1891 }
0x1292   : > { %v1909_v9 = vsel %vm1887_vm13, %v1892_v58, 0.0  ;;  %v1913_v46 = vmax.f32 %v4356_v59, %v1892_v58  ;;  %v4428_v41 = vsel %vm1887_vm13, %v1892_v58, %v4372_v5 }
0x1293   : > { %v4422_v20 = vadd.f32 %v1909_v9, %v4353_v40 }
0x1294   : > { %v4425_v37 = vsel %vm1887_vm13, %v1913_v46, %v4356_v59 }
0x1299   : > { %v1894_v21 = vpop.permute.xlu2 %1893 }
0x129a   : > { %v4434_v38 = vsel %vm4764_vm2, %v1894_v21, %v4378_v22  ;;  %v1910_v44 = vsel %vm4765_vm3, %v1894_v21, 0.0  ;;  %v1914_v40 = vmax.f32 %v4393_v62, %v1894_v21 }
0x129b   : > { %v4441_v59 = vadd.f32 %v1910_v44, %v4385_v23  ;;  %v1926_v5 = vpack.c.bf16 %v4434_v38, %v4428_v41 }
0x129c   : > { %v4449_v54 = vsel %vm4766_vm4, %v1914_v40, %v4393_v62 }
0x129d   : > { %2700 = vmatmul.msk.bf16.vlgmr.msra.gmra.mxu0 %vm456_vm1, %v1926_v5  ;;  %2701 = vmatmul.msk.bf16.vlgmr.msra.gmra.mxu1 %vm456_vm1, %v1926_v5 }
0x12a8   : > { %v1904_v22 = vpop.permute.xlu1 %1903 }
0x12a9   : > { %v4457_v23 = vsel %vm4767_vm5, %v1904_v22, %v4362_v15 }
0x12aa   : > { %1974 = vrot.lane.b32.xlu0 %v4457_v23, %s4763_s29 }
0x12e4   : > { %v1973_v18 = vpop.permute.xlu2 %1972 }
0x131a   : > { %v1939_v1 = vpop.f32.mrf.mxu0  ;;  %v1953_v52 = vpop.f32.mrf.mxu1 }
0x131b   : > { %v1958_v62 = vadd.f32 %v1939_v1, %v1922_v51  ;;  %v1959_v60 = vadd.f32 %v1953_v52, %v1923_v19 }
0x131c   : > { %v1975_v32 = vpop.permute.xlu0 %1974 }
0x131d   : > { %v1962_v3 = vmul.f32 0.5, %v1958_v62  ;;  %v1994_v14 = vmul.f32 0.5, %v1959_v60 }
0x131f   : > { %3024 = vtanh.f32 %v1962_v3 }
0x1320   : > { %3026 = vtanh.f32 %v1959_v60 }
0x1322   : > { %v1941_v6 = vpop.f32.mrf.mxu0  ;;  %v1955_v15 = vpop.f32.mrf.mxu1 }
0x1323   : > { %v1960_v30 = vadd.f32 %v1941_v6, %v1924_v11  ;;  %v1961_v31 = vadd.f32 %v1955_v15, %v1925_v42 }
0x1325   : > { %v3025_v29 = vpop.eup %3024  ;;  %v1963_v13 = vmul.f32 0.5, %v1960_v30  ;;  %v1995_v28 = vmul.f32 0.5, %v1961_v31 }
0x1326   : > { %v1966_v25 = vadd.f32 1.0, %v3025_v29  ;;  %v3027_v26 = vpop.eup %3026  ;;  %v2703_v29 = vld [vmem:[%s3414_s26 + $0xd8] sm:$0xff] }
0x1327   : > { %3028 = vtanh.f32 %v1963_v13  ;;  %v2047_v43 = vunpack.c.h.bf16 %v2703_v29 }
0x1328   : > { %v1968_v61 = vmul.f32 0.5, %v1966_v25  ;;  %3030 = vtanh.f32 %v1961_v31  ;;  %v2046_v31 = vunpack.c.l.bf16 %v2703_v29 }
0x1329   : > { %3032 = vtanh.f32 %v1995_v28 }
0x132a   : > { %v1982_v16 = vmul.f32 %v3027_v26, %v1968_v61  ;;  %v1978_v12 = vmul.f32 %v1973_v18, %v1968_v61 }
0x132c   : > { %1986 = vrot.lane.b32.xlu1 %v1982_v16, %s4763_s29 }
0x132d   : > { %v3029_v8 = vpop.eup %3028 }
0x132e   : > { %v1967_v24 = vadd.f32 1.0, %v3029_v8  ;;  %v3031_v33 = vpop.eup %3030 }
0x132f   : > { %v3033_v36 = vpop.eup %3032 }
0x1330   : > { %v1969_v50 = vmul.f32 0.5, %v1967_v24  ;;  %v1999_v49 = vadd.f32 1.0, %v3033_v36 }
0x1332   : > { %v1983_v34 = vmul.f32 %v3031_v33, %v1969_v50  ;;  %v1979_v4 = vmul.f32 %v1975_v32, %v1969_v50  ;;  %v2001_v27 = vmul.f32 0.5, %v1999_v49 }
0x1334   : > { %1988 = vrot.lane.b32.xlu2 %v1983_v34, %s4763_s29 }
0x138e   : > { %v1989_v17 = vpop.permute.xlu2 %1988 }
0x138f   : > { %v1993_v47 = vadd.f32 %v1989_v17, %v1979_v4 }
0x1391   : > { %3034 = vtanh.f32 %v1993_v47 }
0x1392   : > { %3036 = vtanh.f32 %v1994_v14 }
0x1397   : > { %v3035_v53 = vpop.eup %3034 }
0x1398   : > { %v2005_v39 = vmul.f32 %v3035_v53, %v2001_v27  ;;  %v3037_v58 = vpop.eup %3036 }
0x1399   : > { %v1998_v46 = vadd.f32 1.0, %v3037_v58 }
0x139a   : > { %2015 = vrot.lane.b32.xlu1 %v2005_v39, %s4763_s29 }
0x139b   : > { %v2000_v21 = vmul.f32 0.5, %v1998_v46 }
0x139e   : > { %v1987_v10 = vpop.permute.xlu1 %1986 }
0x139f   : > { %v1992_v9 = vadd.f32 %v1987_v10, %v1978_v12 }
0x13a1   : > { %3038 = vtanh.f32 %v1992_v9  ;;  %2023 = vrot.lane.b32.xlu2 %v1992_v9, %s4763_s29 }
0x13a7   : > { %v3039_v44 = vpop.eup %3038 }
0x13a8   : > { %v2004_v40 = vmul.f32 %v3039_v44, %v2000_v21 }
0x13aa   : > { %2013 = vrot.lane.b32.xlu0 %v2004_v40, %s4763_s29 }
0x13b2   : > { %2025 = vrot.lane.b32.xlu0 %v1993_v47, %s4763_s29 }
0x13fb   : > { %v2024_v5 = vpop.permute.xlu2 %2023 }
0x13fc   : > { %v4472_v22 = vsel %vm2009_vm6, %v2024_v5, %v4416_v35 }
0x13fd   : > { %2094 = vrot.lane.b32.xlu1 %v4472_v22, %s4763_s29 }
0x140c   : > { %v2016_v45 = vpop.permute.xlu1 %2015 }
0x140d   : > { %v2032_v51 = vsel %vm4768_vm7, %v2016_v45, 0.0  ;;  %v2036_v1 = vmax.f32 %v4449_v54, %v2016_v45  ;;  %v4493_v19 = vsel %vm4770_vm9, %v2016_v45, %v4434_v38 }
0x140e   : > { %v4481_v52 = vadd.f32 %v2032_v51, %v4441_v59 }
0x140f   : > { %v4487_v35 = vsel %vm4769_vm8, %v2036_v1, %v4449_v54 }
0x141c   : > { %v2014_v62 = vpop.permute.xlu0 %2013 }
0x141d   : > { %v4496_v57 = vsel %vm2009_vm6, %v2014_v62, %v4428_v41  ;;  %v2031_v3 = vsel %vm2009_vm6, %v2014_v62, 0.0  ;;  %v2035_v59 = vmax.f32 %v4425_v37, %v2014_v62 }
0x141e   : > { %v4500_v60 = vadd.f32 %v2031_v3, %v4422_v20  ;;  %v2048_v54 = vpack.c.bf16 %v4493_v19, %v4496_v57  ;;  %v2702_v20 = vld [vmem:[%s3414_s26 + $0xd0] sm:$0xff] }
0x141f   : > { %v4505_v11 = vsel %vm2009_vm6, %v2035_v59, %v4425_v37  ;;  %v2044_v6 = vunpack.c.l.bf16 %v2702_v20  ;;  %v2045_v15 = vunpack.c.h.bf16 %v2702_v20 }
0x1420   : > { %2704 = vmatmul.msk.bf16.vlgmr.msra.gmra.mxu2 %vm456_vm1, %v2048_v54  ;;  %2705 = vmatmul.msk.bf16.vlgmr.msra.gmra.mxu3 %vm456_vm1, %v2048_v54 }
0x1424   : > { %v2026_v38 = vpop.permute.xlu0 %2025 }
0x1425   : > { %v4513_v41 = vsel %vm4771_vm10, %v2026_v38, %v4457_v23 }
0x1426   : > { %2096 = vrot.lane.b32.xlu2 %v4513_v41, %s4763_s29 }
0x146f   : > { %v2095_v49 = vpop.permute.xlu1 %2094 }
0x1480   : > { %v2097_v58 = vpop.permute.xlu2 %2096 }
0x14a3   : > { %v2061_v30 = vpop.f32.mrf.mxu2  ;;  %v2075_v42 = vpop.f32.mrf.mxu3 }
0x14a4   : > { %v2080_v37 = vadd.f32 %v2061_v30, %v2044_v6  ;;  %v2081_v25 = vadd.f32 %v2075_v42, %v2045_v15 }
0x14a6   : > { %v2084_v13 = vmul.f32 0.5, %v2080_v37  ;;  %v2116_v47 = vmul.f32 0.5, %v2081_v25 }
0x14a8   : > { %3040 = vtanh.f32 %v2084_v13 }
0x14a9   : > { %3042 = vtanh.f32 %v2081_v25 }
0x14ab   : > { %v2063_v61 = vpop.f32.mrf.mxu2  ;;  %v2077_v23 = vpop.f32.mrf.mxu3 }
0x14ac   : > { %v2082_v26 = vadd.f32 %v2063_v61, %v2046_v31  ;;  %v2083_v50 = vadd.f32 %v2077_v23, %v2047_v43  ;;  %v2707_v23 = vld [vmem:[%s3414_s26 + $0xe8] sm:$0xff] }
0x14ae   : > { %v3041_v16 = vpop.eup %3040  ;;  %v2085_v8 = vmul.f32 0.5, %v2082_v26  ;;  %v2117_v14 = vmul.f32 0.5, %v2083_v50 }
0x14af   : > { %v2088_v24 = vadd.f32 1.0, %v3041_v16  ;;  %v3043_v34 = vpop.eup %3042 }
0x14b0   : > { %3044 = vtanh.f32 %v2085_v8 }
0x14b1   : > { %v2090_v33 = vmul.f32 0.5, %v2088_v24  ;;  %3046 = vtanh.f32 %v2083_v50  ;;  %v2168_v24 = vunpack.c.l.bf16 %v2707_v23 }
0x14b2   : > { %3048 = vtanh.f32 %v2116_v47 }
0x14b3   : > { %v2104_v28 = vmul.f32 %v3043_v34, %v2090_v33  ;;  %v2100_v27 = vmul.f32 %v2095_v49, %v2090_v33  ;;  %3050 = vtanh.f32 %v2117_v14 }
0x14b5   : > { %2108 = vrot.lane.b32.xlu0 %v2104_v28, %s4763_s29 }
0x14b6   : > { %v3045_v18 = vpop.eup %3044 }
0x14b7   : > { %v2089_v32 = vadd.f32 1.0, %v3045_v18  ;;  %v3047_v17 = vpop.eup %3046 }
0x14b8   : > { %v3049_v39 = vpop.eup %3048 }
0x14b9   : > { %v2091_v4 = vmul.f32 0.5, %v2089_v32  ;;  %v2120_v10 = vadd.f32 1.0, %v3049_v39  ;;  %v3051_v46 = vpop.eup %3050 }
0x14ba   : > { %v2121_v51 = vadd.f32 1.0, %v3051_v46 }
0x14bb   : > { %v2105_v36 = vmul.f32 %v3047_v17, %v2091_v4  ;;  %v2101_v9 = vmul.f32 %v2097_v58, %v2091_v4  ;;  %v2122_v21 = vmul.f32 0.5, %v2120_v10 }
0x14bc   : > { %v2123_v1 = vmul.f32 0.5, %v2121_v51 }
0x14bd   : > { %2110 = vrot.lane.b32.xlu1 %v2105_v36, %s4763_s29 }
0x1527   : > { %v2109_v53 = vpop.permute.xlu0 %2108 }
0x1528   : > { %v2114_v12 = vadd.f32 %v2109_v53, %v2100_v27 }
0x152a   : > { %3052 = vtanh.f32 %v2114_v12  ;;  %2145 = vrot.lane.b32.xlu1 %v2114_v12, %s4763_s29 }
0x152f   : > { %v2111_v44 = vpop.permute.xlu1 %2110 }
0x1530   : > { %v3053_v40 = vpop.eup %3052  ;;  %v2115_v5 = vadd.f32 %v2111_v44, %v2101_v9 }
0x1531   : > { %v2126_v45 = vmul.f32 %v3053_v40, %v2122_v21 }
0x1532   : > { %3054 = vtanh.f32 %v2115_v5 }
0x1533   : > { %2135 = vrot.lane.b32.xlu2 %v2126_v45, %s4763_s29 }
0x1538   : > { %v3055_v62 = vpop.eup %3054 }
0x1539   : > { %v2127_v3 = vmul.f32 %v3055_v62, %v2123_v1 }
0x153b   : > { %2147 = vrot.lane.b32.xlu2 %v2115_v5, %s4763_s29  ;;  %2137 = vrot.lane.b32.xlu0 %v2127_v3, %s4763_s29 }
0x158d   : > { %v2136_v59 = vpop.permute.xlu2 %2135 }
0x158e   : > { %v2153_v54 = vsel %vm2131_vm11, %v2136_v59, 0.0  ;;  %v2157_v38 = vmax.f32 %v4505_v11, %v2136_v59 }
0x158f   : > { %v4529_v20 = vadd.f32 %v2153_v54, %v4500_v60 }
0x1590   : > { %v4532_v6 = vsel %vm2131_vm11, %v2157_v38, %v4505_v11  ;;  %v4548_v11 = vsel %vm2131_vm11, %v2136_v59, %v4496_v57 }
0x1595   : > { %v2148_v30 = vpop.permute.xlu2 %2147 }
0x1596   : > { %v4538_v42 = vsel %vm2132_vm0, %v2148_v30, %v4513_v41 }
0x1597   : > { %2218 = vrot.lane.b32.xlu1 %v4538_v42, %s4763_s29 }
0x159c   : > { %v2146_v37 = vpop.permute.xlu1 %2145 }
0x159d   : > { %v4543_v15 = vsel %vm2131_vm11, %v2146_v37, %v4472_v22 }
0x159e   : > { %2216 = vrot.lane.b32.xlu0 %v4543_v15, %s4763_s29 }
0x15ad   : > { %v2138_v60 = vpop.permute.xlu0 %2137 }
0x15ae   : > { %v4554_v41 = vsel %vm2132_vm0, %v2138_v60, %v4493_v19  ;;  %v2154_v29 = vsel %vm2132_vm0, %v2138_v60, 0.0  ;;  %v2158_v22 = vmax.f32 %v4487_v35, %v2138_v60  ;;  %v2706_v19 = vld [vmem:[%s3414_s26 + $0xe0] sm:$0xff] }
0x15af   : > { %v4561_v13 = vadd.f32 %v2154_v29, %v4481_v52  ;;  %v2170_v25 = vpack.c.bf16 %v4554_v41, %v4548_v11  ;;  %v2166_v31 = vunpack.c.l.bf16 %v2706_v19  ;;  %v2167_v52 = vunpack.c.h.bf16 %v2706_v19 }
0x15b0   : > { %v4569_v57 = vsel %vm2132_vm0, %v2158_v22, %v4487_v35  ;;  %v2169_v35 = vunpack.c.h.bf16 %v2707_v23  ;;  %vm2253_vm0 = vcmp.lt.s32.totalorder %v3691_v56, %v3555_v55 }
0x15b1   : > { %2708 = vmatmul.msk.bf16.vlgmr.msrb.gmra.mxu0 %vm456_vm1, %v2170_v25  ;;  %2709 = vmatmul.msk.bf16.vlgmr.msrb.gmra.mxu1 %vm456_vm1, %v2170_v25 }
0x1609   : > { %v2219_v51 = vpop.permute.xlu1 %2218 }
0x1610   : > { %v2217_v12 = vpop.permute.xlu0 %2216 }
0x162e   : > { %v2183_v61 = vpop.f32.mrf.mxu0  ;;  %v2197_v26 = vpop.f32.mrf.mxu1 }
0x162f   : > { %v2202_v43 = vadd.f32 %v2183_v61, %v2166_v31  ;;  %v2203_v8 = vadd.f32 %v2197_v26, %v2167_v52 }
0x1631   : > { %v2206_v16 = vmul.f32 0.5, %v2202_v43  ;;  %v2238_v39 = vmul.f32 0.5, %v2203_v8 }
0x1633   : > { %3056 = vtanh.f32 %v2206_v16  ;;  %v2710_v16 = vld [vmem:[%s3414_s26 + $0xf0] sm:$0xff] }
0x1634   : > { %3058 = vtanh.f32 %v2203_v8  ;;  %v2288_v8 = vunpack.c.l.bf16 %v2710_v16 }
0x1636   : > { %v2185_v50 = vpop.f32.mrf.mxu0  ;;  %v2199_v33 = vpop.f32.mrf.mxu1 }
0x1637   : > { %v2204_v48 = vadd.f32 %v2185_v50, %v2168_v24  ;;  %v2205_v32 = vadd.f32 %v2199_v33, %v2169_v35  ;;  %v2711_v35 = vld [vmem:[%s3414_s26 + $0xf8] sm:$0xff]  ;;  %s3210_s26 = smov (!%p2714_p5), 96  }
0x1638   : > { %v2291_v56 = vunpack.c.h.bf16 %v2711_v35 }
0x1639   : > { %v3057_v34 = vpop.eup %3056  ;;  %v2207_v28 = vmul.f32 0.5, %v2204_v48  ;;  %v2239_v45 = vmul.f32 0.5, %v2205_v32  ;;  %v2289_v48 = vunpack.c.h.bf16 %v2710_v16 }
0x163a   : > { %v2210_v18 = vadd.f32 1.0, %v3057_v34  ;;  %v3059_v17 = vpop.eup %3058 }
0x163b   : > { %3060 = vtanh.f32 %v2207_v28  ;;  %v2290_v28 = vunpack.c.l.bf16 %v2711_v35 }
0x163c   : > { %v2212_v4 = vmul.f32 0.5, %v2210_v18  ;;  %3062 = vtanh.f32 %v2205_v32 }
0x163d   : > { %3064 = vtanh.f32 %v2238_v39 }
0x163e   : > { %v2226_v36 = vmul.f32 %v3059_v17, %v2212_v4  ;;  %v2222_v10 = vmul.f32 %v2217_v12, %v2212_v4 }
0x1640   : > { %2230 = vrot.lane.b32.xlu2 %v2226_v36, %s4763_s29 }
0x1641   : > { %v3061_v47 = vpop.eup %3060 }
0x1642   : > { %v2211_v49 = vadd.f32 1.0, %v3061_v47  ;;  %v3063_v27 = vpop.eup %3062 }
0x1643   : > { %v3065_v9 = vpop.eup %3064 }
0x1644   : > { %v2213_v14 = vmul.f32 0.5, %v2211_v49  ;;  %v2242_v21 = vadd.f32 1.0, %v3065_v9 }
0x1646   : > { %v2227_v53 = vmul.f32 %v3063_v27, %v2213_v14  ;;  %v2244_v44 = vmul.f32 0.5, %v2242_v21  ;;  %v2223_v1 = vmul.f32 %v2219_v51, %v2213_v14 }
0x1648   : > { %2232 = vrot.lane.b32.xlu0 %v2227_v53, %s4763_s29 }
0x169a   : > { %v2231_v58 = vpop.permute.xlu2 %2230 }
0x169b   : > { %v2236_v46 = vadd.f32 %v2231_v58, %v2222_v10 }
0x169d   : > { %3066 = vtanh.f32 %v2236_v46  ;;  %2267 = vrot.lane.b32.xlu0 %v2236_v46, %s4763_s29 }
0x169e   : > { %3068 = vtanh.f32 %v2239_v45 }
0x16a3   : > { %v3067_v40 = vpop.eup %3066 }
0x16a4   : > { %v2248_v5 = vmul.f32 %v3067_v40, %v2244_v44  ;;  %v3069_v3 = vpop.eup %3068 }
0x16a5   : > { %v2243_v54 = vadd.f32 1.0, %v3069_v3 }
0x16a6   : > { %2257 = vrot.lane.b32.xlu1 %v2248_v5, %s4763_s29 }
0x16a7   : > { %v2245_v38 = vmul.f32 0.5, %v2243_v54 }
0x16ba   : > { %v2233_v62 = vpop.permute.xlu0 %2232 }
0x16bb   : > { %v2237_v59 = vadd.f32 %v2233_v62, %v2223_v1 }
0x16bd   : > { %3070 = vtanh.f32 %v2237_v59  ;;  %2269 = vrot.lane.b32.xlu1 %v2237_v59, %s4763_s29 }
0x16c3   : > { %v3071_v30 = vpop.eup %3070 }
0x16c4   : > { %v2249_v37 = vmul.f32 %v3071_v30, %v2245_v38 }
0x16c6   : > { %2259 = vrot.lane.b32.xlu2 %v2249_v37, %s4763_s29 }
0x170f   : > { %v2268_v60 = vpop.permute.xlu0 %2267 }
0x1710   : > { %v4584_v29 = vsel %vm2253_vm0, %v2268_v60, %v4543_v15 }
0x1711   : > { %2338 = vrot.lane.b32.xlu2 %v4584_v29, %s4763_s29 }
0x1718   : > { %v2258_v22 = vpop.permute.xlu1 %2257 }
0x1719   : > { %v2275_v25 = vsel %vm2253_vm0, %v2258_v22, 0.0  ;;  %v2279_v19 = vmax.f32 %v4532_v6, %v2258_v22  ;;  %v4596_v43 = vsel %vm2253_vm0, %v2258_v22, %v4548_v11 }
0x171a   : > { %v4590_v31 = vadd.f32 %v2275_v25, %v4529_v20 }
0x171b   : > { %v4593_v61 = vsel %vm2253_vm0, %v2279_v19, %v4532_v6 }
0x1720   : > { %v2260_v26 = vpop.permute.xlu2 %2259 }
0x1721   : > { %v4602_v15 = vsel %vm2254_vm14, %v2260_v26, %v4554_v41  ;;  %v2276_v52 = vsel %vm2254_vm14, %v2260_v26, 0.0  ;;  %v2280_v20 = vmax.f32 %v4569_v57, %v2260_v26 }
0x1722   : > { %v4609_v6 = vadd.f32 %v2276_v52, %v4561_v13  ;;  %v2292_v11 = vpack.c.bf16 %v4602_v15, %v4596_v43 }
0x1723   : > { %v4617_v23 = vsel %vm2254_vm14, %v2280_v20, %v4569_v57 }
0x1724   : > { %2712 = vmatmul.msk.bf16.vlgmr.msrb.gmra.mxu2 %vm456_vm1, %v2292_v11  ;;  %2713 = vmatmul.msk.bf16.vlgmr.msrb.gmra.mxu3 %vm456_vm1, %v2292_v11 }
0x172f   : > { %v2270_v41 = vpop.permute.xlu1 %2269 }
0x1730   : > { %v4625_v13 = vsel %vm2254_vm14, %v2270_v41, %v4538_v42  ;;  %vm2375_vm14 = vcmp.lt.s32.totalorder %v3697_v2, %v3555_v55 }
0x1731   : > { %2340 = vrot.lane.b32.xlu0 %v4625_v13, %s4763_s29 }
0x176b   : > { %v2339_v46 = vpop.permute.xlu2 %2338 }
0x17a3   : > { %v2341_v21 = vpop.permute.xlu0 %2340 }
0x17a7   : > { %v2305_v24 = vpop.f32.mrf.mxu2  ;;  %v2319_v50 = vpop.f32.mrf.mxu3 }
0x17a8   : > { %v2324_v57 = vadd.f32 %v2305_v24, %v2288_v8  ;;  %v2325_v34 = vadd.f32 %v2319_v50, %v2289_v48 }
0x17aa   : > { %v2328_v33 = vmul.f32 0.5, %v2324_v57  ;;  %v2360_v1 = vmul.f32 0.5, %v2325_v34 }
0x17ac   : > { %3072 = vtanh.f32 %v2328_v33 }
0x17ad   : > { %3074 = vtanh.f32 %v2325_v34 }
0x17af   : > { %v2307_v18 = vpop.f32.mrf.mxu2  ;;  %v2321_v42 = vpop.f32.mrf.mxu3 }
0x17b0   : > { %v2326_v32 = vadd.f32 %v2307_v18, %v2290_v28  ;;  %v2327_v47 = vadd.f32 %v2321_v42, %v2291_v56 }
0x17b2   : > { %v3073_v4 = vpop.eup %3072  ;;  %v2329_v17 = vmul.f32 0.5, %v2326_v32  ;;  %v2361_v9 = vmul.f32 0.5, %v2327_v47 }
0x17b3   : > { %v2332_v36 = vadd.f32 1.0, %v3073_v4  ;;  %v3075_v14 = vpop.eup %3074 }
0x17b4   : > { %3076 = vtanh.f32 %v2329_v17 }
0x17b5   : > { %v2334_v49 = vmul.f32 0.5, %v2332_v36  ;;  %3078 = vtanh.f32 %v2327_v47 }
0x17b6   : > { %3080 = vtanh.f32 %v2361_v9 }
0x17b7   : > { %v2348_v27 = vmul.f32 %v3075_v14, %v2334_v49  ;;  %v2344_v54 = vmul.f32 %v2339_v46, %v2334_v49 }
0x17b9   : > { %2352 = vrot.lane.b32.xlu1 %v2348_v27, %s4763_s29 }
0x17ba   : > { %v3077_v53 = vpop.eup %3076 }
0x17bb   : > { %v2333_v39 = vadd.f32 1.0, %v3077_v53  ;;  %v3079_v10 = vpop.eup %3078 }
0x17bc   : > { %v3081_v5 = vpop.eup %3080 }
0x17bd   : > { %v2335_v12 = vmul.f32 0.5, %v2333_v39  ;;  %v2365_v51 = vadd.f32 1.0, %v3081_v5 }
0x17bf   : > { %v2349_v58 = vmul.f32 %v3079_v10, %v2335_v12  ;;  %v2345_v44 = vmul.f32 %v2341_v21, %v2335_v12  ;;  %v2367_v62 = vmul.f32 0.5, %v2365_v51 }
0x17c1   : > { %2354 = vrot.lane.b32.xlu2 %v2349_v58, %s4763_s29 }
0x181b   : > { %v2355_v40 = vpop.permute.xlu2 %2354 }
0x181c   : > { %v2359_v45 = vadd.f32 %v2355_v40, %v2345_v44 }
0x181e   : > { %3082 = vtanh.f32 %v2359_v45 }
0x181f   : > { %3084 = vtanh.f32 %v2360_v1 }
0x1824   : > { %v3083_v3 = vpop.eup %3082 }
0x1825   : > { %v2371_v59 = vmul.f32 %v3083_v3, %v2367_v62  ;;  %v3085_v30 = vpop.eup %3084 }
0x1826   : > { %v2364_v60 = vadd.f32 1.0, %v3085_v30 }
0x1827   : > { %2381 = vrot.lane.b32.xlu1 %v2371_v59, %s4763_s29 }
0x1828   : > { %v2366_v22 = vmul.f32 0.5, %v2364_v60 }
0x182b   : > { %v2353_v38 = vpop.permute.xlu1 %2352 }
0x182c   : > { %v2358_v37 = vadd.f32 %v2353_v38, %v2344_v54 }
0x182e   : > { %3086 = vtanh.f32 %v2358_v37  ;;  %2389 = vrot.lane.b32.xlu2 %v2358_v37, %s4763_s29 }
0x1834   : > { %v3087_v25 = vpop.eup %3086 }
0x1835   : > { %v2370_v19 = vmul.f32 %v3087_v25, %v2366_v22 }
0x1837   : > { %2379 = vrot.lane.b32.xlu0 %v2370_v19, %s4763_s29 }
0x183f   : > { %2391 = vrot.lane.b32.xlu0 %v2359_v45, %s4763_s29 }
0x1888   : > { %v2390_v26 = vpop.permute.xlu2 %2389 }
0x1889   : > { %v2395_v52 = vsel %vm2375_vm14, %v2390_v26, %v4584_v29 }
0x188a   : > { %2407 = vst.msk [vmem:[#allocation3] sm:$0xff] %vm456_vm1, %v2395_v52 }
0x1899   : > { %v2382_v20 = vpop.permute.xlu1 %2381 }
0x189a   : > { %v2386_v11 = vsel %vm2376_vm15, %v2382_v20, %v4602_v15  ;;  %v2398_v41 = vsel %vm2376_vm15, %v2382_v20, 0.0  ;;  %v2402_v16 = vmax.f32 %v4617_v23, %v2382_v20 }
0x189b   : > { %v4653_v8 = vadd.f32 %v2398_v41, %v4609_v6  ;;  %2406 = vst.msk [vmem:[#allocation2 + $0x8] sm:$0xff] %vm456_vm1, %v2386_v11 }
0x189c   : > { %v2404_v29 = vsel %vm2376_vm15, %v2402_v16, %v4617_v23 }
0x189d   : > { %2410 = vst.msk [vmem:[#allocation4 + $0x8] sm:$0xff] %vm456_vm1, %v4653_v8 }
0x189e   : > { %2412 = vst.msk [vmem:[#allocation5 + $0x8] sm:$0xff] %vm456_vm1, %v2404_v29 }
0x18a9   : > { %v2380_v15 = vpop.permute.xlu0 %2379 }
0x18aa   : > { %v2385_v24 = vsel %vm2375_vm14, %v2380_v15, %v4596_v43  ;;  %v2397_v6 = vsel %vm2375_vm14, %v2380_v15, 0.0  ;;  %v2401_v50 = vmax.f32 %v4593_v61, %v2380_v15 }
0x18ab   : > { %v2399_v57 = vadd.f32 %v2397_v6, %v4590_v31  ;;  %2405 = vst.msk [vmem:[#allocation2] sm:$0xff] %vm456_vm1, %v2385_v24 }
0x18ac   : > { %v2403_v23 = vsel %vm2375_vm14, %v2401_v50, %v4593_v61 }
0x18ad   : > { %2409 = vst.msk [vmem:[#allocation4] sm:$0xff] %vm456_vm1, %v2399_v57 }
0x18ae   : > { %2411 = vst.msk [vmem:[#allocation5] sm:$0xff] %vm456_vm1, %v2403_v23 }
0x18af   : > { %2416 = sbr.rel (%p2714_p5) target bundleno = 6584 (0x19b8), region = 78 }
0x18b1   : > { %v2392_v43 = vpop.permute.xlu0 %2391 }
0x18b2   : > { %v2396_v48 = vsel %vm2376_vm15, %v2392_v43, %v4625_v13 }
0x18b3   : > { %2408 = vst.msk [vmem:[#allocation3 + $0x8] sm:$0xff] %vm456_vm1, %v2396_v48 }
0x18b4   : > { %v2417_v55 = vcvt.s32.f32 %v3541_v0  ;;  %2490 = vst.msk [vmem:[%s3416_s28 + $0x8] sm:$0xff] %vm456_vm1, %v2403_v23  ;;  %v3209_v31 = vmov 0   ;;  %2461 = vrot.lane.b32.xlu1 %v2385_v24, %s3210_s26  ;;  %v2418_v63 = vcvt.s32.f32 %v3545_v7  ;;  %2470 = vrot.lane.b32.xlu2 %v2385_v24, %s3211_s17  ;;  %vm2467_vm15 = vcmask 261120  }
0x18b5   : > { %3088 = vset.pattern.permute.xlu0 %v3209_v31  ;;  %2491 = vst.msk [vmem:[%s3416_s28 + $0x18] sm:$0xff] %vm456_vm1, %v2404_v29  ;;  %vm2476_vm12 = vcmask 523520   ;;  %vm2487_vm8 = vcmask 1048064  }
0x18b6   : > { %2421 = vperm.xlu0 %3088, %v2417_v55  }
0x18bc   : > { %2463 = vrot.lane.b32.xlu1 %v2386_v11, %s3210_s26  ;;  %2472 = vrot.lane.b32.xlu2 %v2386_v11, %s3211_s17 }
0x18be   : > { %2426 = vperm.xlu0 %3088, %v2418_v63  }
0x190e   : > { %v2471_v0 = vpop.permute.xlu2 %2470 }
0x1916   : > { %v2473_v21 = vpop.permute.xlu2 %2472 }
0x1926   : > { %v2462_v2 = vpop.permute.xlu1 %2461 }
0x1927   : > { %2468 = vst.msk [vmem:[%s3416_s28] sm:$0xff] %vm2467_vm15, %v2462_v2 }
0x1928   : > { %v2422_v61 = vpop.permute.xlu0 %2421  ;;  %2477 = vst.msk [vmem:[%s3416_s28] sm:$0xff] %vm2476_vm12, %v2471_v0 }
0x1929   : > { %3089 = vrcp.f32 %v2422_v61  ;;  %v2440_v28 = vand.u32 2147483648, %v2422_v61  ;;  %v2438_v32 = vand.u32 2147483647, %v2422_v61  ;;  %vm2434_vm13 = vweird.f32 %v2422_v61 }
0x192b   : > { %v2441_v4 = vor.u32 1.1754944e-38, %v2440_v28  ;;  %vm2439_vm3 = vcmp.eq.f32.partialorder %v2438_v32, 8.507059e+37 }
0x192e   : > { %v2464_v35 = vpop.permute.xlu1 %2463 }
0x192f   : > { %v3090_v13 = vpop.eup %3089  ;;  %2469 = vst.msk [vmem:[%s3416_s28 + $0x10] sm:$0xff] %vm2467_vm15, %v2464_v35 }
0x1930   : > { %v2430_v33 = vmul.f32 %v3090_v13, %v2422_v61  ;;  %v2427_v34 = vpop.permute.xlu0 %2426  ;;  %vm2435_vm1 = vweird.f32 %v3090_v13  ;;  %2478 = vst.msk [vmem:[%s3416_s28 + $0x10] sm:$0xff] %vm2476_vm12, %v2473_v21 }
0x1931   : > { %3091 = vrcp.f32 %v2427_v34  ;;  %vm2436_vm2 = vmor %vm2434_vm13, %vm2435_vm1  ;;  %v2455_v27 = vand.u32 2147483648, %v2427_v34  ;;  %v2453_v39 = vand.u32 2147483647, %v2427_v34  ;;  %vm2449_vm5 = vweird.f32 %v2427_v34 }
0x1932   : > { %v2431_v7 = vsub.f32 1.0, %v2430_v33 }
0x1933   : > { %v2456_v10 = vor.u32 1.1754944e-38, %v2455_v27  ;;  %vm2454_vm7 = vcmp.eq.f32.partialorder %v2453_v39, 8.507059e+37 }
0x1934   : > { %v2432_v18 = vmul.f32 %v3090_v13, %v2431_v7 }
0x1936   : > { %v2433_v56 = vadd.f32 %v3090_v13, %v2432_v18 }
0x1937   : > { %v3092_v42 = vpop.eup %3091 }
0x1938   : > { %v2445_v17 = vmul.f32 %v3092_v42, %v2427_v34  ;;  %v2437_v36 = vsel %vm2436_vm2, %v3090_v13, %v2433_v56  ;;  %vm2450_vm4 = vweird.f32 %v3092_v42 }
0x1939   : > { %v2442_v47 = vsel %vm2439_vm3, %v2441_v4, %v2437_v36  ;;  %vm2451_vm6 = vmor %vm2449_vm5, %vm2450_vm4 }
0x193a   : > { %v2446_v49 = vsub.f32 1.0, %v2445_v17  ;;  %v2443_v14 = vmul.f32 %v2442_v47, %v2399_v57 }
0x193c   : > { %v2447_v53 = vmul.f32 %v3092_v42, %v2446_v49  ;;  %2481 = vrot.lane.b32.xlu0 %v2443_v14, %s3212_s0 }
0x193e   : > { %v2448_v12 = vadd.f32 %v3092_v42, %v2447_v53 }
0x1940   : > { %v2452_v58 = vsel %vm2451_vm6, %v3092_v42, %v2448_v12 }
0x1941   : > { %v2457_v9 = vsel %vm2454_vm7, %v2456_v10, %v2452_v58 }
0x1942   : > { %v2458_v46 = vmul.f32 %v2457_v9, %v4653_v8 }
0x1944   : > { %2483 = vrot.lane.b32.xlu1 %v2458_v46, %s3212_s0 }
0x19ae   : > { %v2482_v44 = vpop.permute.xlu0 %2481 }
0x19af   : > { %2488 = vst.msk [vmem:[%s3416_s28] sm:$0xff] %vm2487_vm8, %v2482_v44 }
0x19b6   : > { %v2484_v40 = vpop.permute.xlu1 %2483 }
0x19b7   : > { %2489 = vst.msk [vmem:[%s3416_s28 + $0x10] sm:$0xff] %vm2487_vm8, %v2484_v40 }
0x19b8 PF: > { %s2732_s9 = sshll.u32 %s3191_s18, 5  ;;  %s2506_s5 = sshll.u32 %s3416_s28, 4  ;;  %s2507_s5 = int_to_ptr.vmem [resolvable:$true] %s2506_s5 }
0x19b9   : > { %s2505_s15 = scalar_lea.hbm %s4754_s3, %s2732_s9  ;;  %s4772_s10 = sand.u32 1, %s3171_s13  }
0x19ba   : > { %s2508_s22 = sshll.u32 %s2505_s15, 4  ;;  %s2493_s11 = scalar_lea.sflag [#allocation8], %s4772_s10  ;;  %s2509_s22 = int_to_ptr.hbm [resolvable:$true] %s2508_s22 }
0x19bb   : > { %s3107_s23 = sshra.s32 %s2509_s22, 4  ;;  %s3113_s18 = scalar_lea.hbm %s4754_s3, 64  ;;  %s3108_s23 = int_to_ptr.hbm [resolvable:$true] %s3107_s23 }
0x19bc   : > { %s3109_s29 = scalar_lea.hbm %s3108_s23, 32  ;;  %p3114_p10 = scmp.lt.s32.totalorder %s3108_s23, %s4754_s3 }
0x19bd   : > { %p3110_p6 = scmp.ne.s32.totalorder %s3108_s23, %s3109_s29  ;;  %p3115_p11 = scmp.lt.s32.totalorder %s3113_s18, %s3109_s29 }
0x19bf   : > { %p3111_p8 = pnand %p3110_p6, %p3307_p7  ;;  %p3116_p13 = por %p3115_p11, %p3114_p10 }
0x19c1   : > { %p3112_p9 = pneg %p3111_p8 }
0x19c3   : > { %p3117_p0 = pnand %p3116_p13, %p3112_p9 }
0x19c5   : > { %3120 = shalt.err (!%p3117_p0)
}
0x19c6   : > { %s3213_s28 = smov 256   ;;  %s3214_s9 = smov 16  }
0x19c7   : > { %2733 = dma.vmem_to_hbm [thread:$0]  (%p3307_p7), %s2507_s5, 512, %s2509_s22, %s2493_s11, %s3213_s28, %s3213_s28, %s3214_s9  }
0x19c8 PF: > { %p2739_p1 = scmp.ge.s32.totalorder %s3203_s21, 2  ;;  %s2523_s4 = sand.u32 1, %s3167_s12  }
0x19c9   : > { %s2524_s15 = scalar_lea.sflag [#allocation8], %s2523_s4 }
0x19ca   : > { %p2736_p2 = pnand %p2739_p1, %p3315_p12 }
0x19cc   : > { %p2737_p3 = pneg %p2736_p2 }
0x19ce   : > { %3162 = dma.done.wait (%p2737_p3), %s2524_s15, 512  }
0x19cf   : > { %3164 = vsyncadd (%p2737_p3), %s2524_s15, 4294966784  ;;  %s16_s21 = sadd.s32 1, %s3203_s21   ;;  %s4773_s12 = smov %s3171_s13 }
0x19d0   : > { %p13_p4 = scmp.ge.s32.totalorder %s16_s21, 6   ;;  %s4774_s13 = smov %s3175_s14 }
0x19d1   : > { %s4775_s14 = smov %s3320_s7  ;;  %s4776_s15 = smov %s3183_s16 }
0x19d2   : > { %s4777_s16 = smov %s3323_s8  ;;  %s4778_s17 = smov %s3195_s19 }
0x19d3   : > { %s4779_s18 = smov %s3199_s20  ;;  %s4780_s19 = smov %s4783_s24 }
0x19d4   : > { %s4781_s20 = smov %s4787_s25  ;;  %15 = sbr.rel (!%p13_p4) target bundleno = 8 (0x8), region = 136 }
0x19d9   :  { %2530 = vsyncpa [#allocation8], 1 }
0x19da   :  { %2532 = vsyncpa [#allocation8 + $0x1], 1 }

</bundles_post_ra>
